<compile_context>
chip_gen: v7x
topology: tpu7x:2x2x1
jax: 0.10.0
libtpu: 0.0.40
codegen_flags: <defaults>
</compile_context>

<pallas_src>
import functools

import jax
import jax.numpy as jnp
from jax.experimental import pallas as pl
from jax.experimental.pallas import tpu as pltpu

_C = 256        # init_reduce_dim / fc1 output width (fixed by the module)
_H = 512        # reduce_dim output width (fixed by the module)
_BN_EPS = 1e-5


# ------------------------------ kernels ------------------------------------


def _finish_head(reduced, w_fc1, b_fc1, bn_a, bn_b, w_fc2, b_fc2, mask, o_ref,
                 training):
    """fc1 -> batch_norm1 -> relu -> dropout -> fc2 (all on one (tb, ·) tile)."""
    h1 = jnp.dot(reduced.astype(w_fc1.dtype), w_fc1[...],
                 preferred_element_type=jnp.float32)
    h1 = h1 + b_fc1[...].astype(jnp.float32)                       # (tb, 256)

    if training:
        # whole batch lives in this tile (tb == B) -> exact batch statistics
        mean = jnp.mean(h1, axis=0, keepdims=True)
        var = jnp.mean(jnp.square(h1 - mean), axis=0, keepdims=True)
        h1 = (h1 - mean) * jax.lax.rsqrt(var + _BN_EPS)
        # bn_a = gamma, bn_b = beta
    # eval: bn_a = gamma/sqrt(run_var+eps), bn_b = beta - run_mean*bn_a
    h1 = h1 * bn_a[...].astype(jnp.float32) + bn_b[...].astype(jnp.float32)

    h1 = jnp.maximum(h1, 0.0)
    if training:
        h1 = h1 * mask[...]                     # mask already holds {0, 1/(1-p)}

    y = jnp.dot(h1.astype(w_fc2.dtype), w_fc2[...],
                preferred_element_type=jnp.float32)
    y = y + b_fc2[...].astype(jnp.float32)
    o_ref[...] = y.astype(o_ref.dtype)


def _attr_kernel_fold(training, *refs):
    """F<=256 path: init_reduce_dim pre-folded into reduce_dim (W_eff)."""
    if training:
        (x0, x1, x2, w_eff, b_red, w_fc1, b_fc1,
         bn_a, bn_b, w_fc2, b_fc2, mask, o_ref) = refs
    else:
        (x0, x1, x2, w_eff, b_red, w_fc1, b_fc1,
         bn_a, bn_b, w_fc2, b_fc2, o_ref) = refs
        mask = None

    mxu = w_eff.dtype
    # reduced = x0f @ W_eff[0] + x1f @ W_eff[1] + x2f @ W_eff[2] + b_red_eff
    r = jnp.dot(x0[...].astype(mxu), w_eff[0], preferred_element_type=jnp.float32)
    r = r + jnp.dot(x1[...].astype(mxu), w_eff[1], preferred_element_type=jnp.float32)
    r = r + jnp.dot(x2[...].astype(mxu), w_eff[2], preferred_element_type=jnp.float32)
    r = r + b_red[...].astype(jnp.float32)                           # (tb, 512)

    _finish_head(r, w_fc1, b_fc1, bn_a, bn_b, w_fc2, b_fc2, mask, o_ref, training)


def _attr_kernel_general(training, num_tokens, feat, *refs):
    """General path: per-(token, stream) matmul chained straight into reduce_dim
    (f32 accumulator) — no concatenated-activation scratch is materialized."""
    if training:
        (x0, x1, x2, w_init3, w_red, b_red, w_fc1, b_fc1,
         bn_a, bn_b, w_fc2, b_fc2, mask, o_ref) = refs
    else:
        (x0, x1, x2, w_init3, w_red, b_red, w_fc1, b_fc1,
         bn_a, bn_b, w_fc2, b_fc2, o_ref) = refs
        mask = None

    mxu = w_red.dtype
    x_refs = (x0, x1, x2)
    tb = x0.shape[0]

    r = jnp.zeros((tb, _H), jnp.float32)
    for t in range(num_tokens):
        for s in range(3):
            xt = x_refs[s][:, t * feat:(t + 1) * feat].astype(w_init3.dtype)
            h = jnp.dot(xt, w_init3[s], preferred_element_type=jnp.float32)
            blk = w_red[(t * 3 + s) * _C:(t * 3 + s + 1) * _C, :]    # (256, 512)
            r = r + jnp.dot(h.astype(mxu), blk, preferred_element_type=jnp.float32)
    r = r + b_red[...].astype(jnp.float32)                           # (tb, 512)

    _finish_head(r, w_fc1, b_fc1, bn_a, bn_b, w_fc2, b_fc2, mask, o_ref, training)


# ------------------------------ wrapper -------------------------------------


def _auto_tb(batch, row_bytes, in_budget=8 << 20):
    """Batch tile: multiple of 8, <=256, keeps >=2 grid steps when the batch
    allows it (v7x megacore + DMA/compute pipelining), and keeps the
    double-buffered input tiles under `in_budget` bytes."""
    if batch <= 8:
        return batch
    tb = 8
    while True:
        nxt = tb * 2
        if nxt > 256 or batch <= nxt or 2 * nxt * row_bytes > in_budget:
            break
        tb = nxt
    return tb


def _dropout_mask(key, batch, p):
    """Pre-scaled inverted-dropout mask with values in {0, 1/(1-p)}."""
    if p <= 0.0:
        return jnp.ones((batch, _C), jnp.float32)
    keep = jax.random.bernoulli(key, 1.0 - p, (batch, _C))
    return keep.astype(jnp.float32) / (1.0 - p)


def attribute_prediction_forward(tensors, params, *, training=False,
                                 dropout_p=0.5, dropout_key=None,
                                 tb=None, mxu_dtype=None, fold=None):
    """tensors: list of 3 arrays [B, T, F].  Returns [B, num_attr]."""
    x0, x1, x2 = tensors
    B, T, F = x0.shape
    TF = T * F
    in_dtype = x0.dtype
    f32 = jnp.float32
    hp = jax.lax.Precision.HIGHEST

    num_attr = params["w_fc2"].shape[1]
    a_pad = ((num_attr + 127) // 128) * 128
    assert params["w_red"].shape[0] == T * 3 * _C, "w_red does not match num_tokens"

    if mxu_dtype is None:
        mxu_dtype = in_dtype                     # never silently down-cast
    if fold is None:
        fold = F <= 256                          # fold is a FLOP win for small F

    # --- host-side weight preparation (all exact f32 algebra) ---------------
    lw = params["layer_weights"]                 # (shallower, middle, deeper)
    w_init3 = jnp.stack([jnp.asarray(w, f32) * params["w_init"].astype(f32)
                         for w in lw])           # (3, F, 256)
    w_red_f32 = params["w_red"].astype(f32)      # (3T*256, 512)
    wr_k = w_red_f32.reshape(T, 3, _C, _H)       # row k = t*768 + s*256 + c

    # fold b_init through reduce_dim: b_red_eff = b_red + tile(b_init,3T) @ w_red
    b_red_eff = (params["b_red"].astype(f32)
                 + jnp.einsum("c,tscd->d", params["b_init"].astype(f32), wr_k,
                              precision=hp)).reshape(1, _H)

    if fold:
        # W_eff[s, t*F+f, d] = sum_c lw_s*w_init[f,c] * w_red[t*768+s*256+c, d]
        w_eff = jnp.einsum("sfc,tscd->stfd", w_init3, wr_k, precision=hp)
        w_eff = w_eff.reshape(3, TF, _H).astype(mxu_dtype)
        big_args, big_specs = [w_eff], [pl.BlockSpec((3, TF, _H),
                                                     lambda i: (0, 0, 0))]
        big_w_bytes = 3 * TF * _H * jnp.dtype(mxu_dtype).itemsize
        mm_flops = 2 * B * 3 * TF * _H
    else:
        w_init3_m = w_init3.astype(mxu_dtype)
        w_red_m = w_red_f32.astype(mxu_dtype)
        big_args = [w_init3_m, w_red_m]
        big_specs = [pl.BlockSpec((3, F, _C), lambda i: (0, 0, 0)),
                     pl.BlockSpec((3 * T * _C, _H), lambda i: (0, 0))]
        big_w_bytes = (3 * F * _C + 3 * T * _C * _H) * jnp.dtype(mxu_dtype).itemsize
        mm_flops = 2 * B * (3 * T * F * _C + 3 * T * _C * _H)

    # small head weights stay f32 (negligible compute, better precision)
    w_fc1 = params["w_fc1"].astype(f32)
    b_fc1 = params["b_fc1"].astype(f32).reshape(1, _C)
    if training:
        bn_a = params["bn_gamma"].astype(f32).reshape(1, _C)
        bn_b = params["bn_beta"].astype(f32).reshape(1, _C)
    else:
        scale = params["bn_gamma"].astype(f32) / jnp.sqrt(
            params["bn_var"].astype(f32) + _BN_EPS)
        bn_a = scale.reshape(1, _C)
        bn_b = (params["bn_beta"].astype(f32)
                - params["bn_mean"].astype(f32) * scale).reshape(1, _C)

    # lane-dense output: pad num_attr up to a multiple of 128, slice off below
    w_fc2 = jnp.pad(params["w_fc2"].astype(f32), ((0, 0), (0, a_pad - num_attr)))
    b_fc2 = jnp.pad(params["b_fc2"].astype(f32), (0, a_pad - num_attr)).reshape(1, a_pad)

    # --- batch tiling --------------------------------------------------------
    bpe_in = jnp.dtype(in_dtype).itemsize
    row_bytes = 3 * TF * bpe_in
    if training:
        tb_eff = B                               # exact batch statistics
        if dropout_p > 0.0:
            assert dropout_key is not None, "training with dropout needs a key"
        mask = _dropout_mask(dropout_key, B, dropout_p)
    else:
        tb_eff = tb if tb is not None else _auto_tb(B, row_bytes)
        mask = None
    B_pad = -(-B // tb_eff) * tb_eff

    # flatten tokens into the lane axis; zero-pad the batch to a tile multiple
    xf = [x.reshape(B, TF) for x in (x0, x1, x2)]
    if B_pad != B:
        xf = [jnp.pad(x, ((0, B_pad - B), (0, 0))) for x in xf]

    # --- specs ---------------------------------------------------------------
    x_spec = pl.BlockSpec((tb_eff, TF), lambda i: (i, 0))
    c2 = lambda i: (0, 0)
    in_specs = [x_spec, x_spec, x_spec] + big_specs + [
        pl.BlockSpec((1, _H), c2),               # b_red_eff
        pl.BlockSpec((_H, _C), c2),              # w_fc1
        pl.BlockSpec((1, _C), c2),               # b_fc1
        pl.BlockSpec((1, _C), c2),               # bn_a
        pl.BlockSpec((1, _C), c2),               # bn_b
        pl.BlockSpec((_C, a_pad), c2),           # w_fc2 (padded)
        pl.BlockSpec((1, a_pad), c2),            # b_fc2 (padded)
    ]
    args = xf + big_args + [b_red_eff, w_fc1, b_fc1, bn_a, bn_b, w_fc2, b_fc2]
    if training:
        in_specs.append(pl.BlockSpec((tb_eff, _C), lambda i: (i, 0)))
        args.append(mask)

    # --- VMEM budget + cost estimate -----------------------------------------
    small_w_bytes = 4 * (_H * _C + _C * a_pad + 2 * _H + 4 * _C + a_pad)
    vmem_needed = (2 * 3 * tb_eff * TF * bpe_in          # inputs, double-buffered
                   + 2 * (big_w_bytes + small_w_bytes)   # resident weights (2 bufs)
                   + 2 * tb_eff * a_pad * bpe_in         # output, double-buffered
                   + 4 * tb_eff * (_H + 2 * _C + a_pad)  # f32 intermediates
                   + (2 * tb_eff * _C * 4 if training else 0))
    vmem_limit = int(min(max(vmem_needed + (8 << 20), 32 << 20), 64 << 20))

    total_flops = mm_flops + 2 * B * (_H * _C + _C * a_pad)
    bytes_accessed = int(3 * B * TF * bpe_in + big_w_bytes + small_w_bytes
                         + B * a_pad * bpe_in)
    cost = pl.CostEstimate(flops=int(total_flops), transcendentals=0,
                           bytes_accessed=bytes_accessed)

    grid_spec = pltpu.PrefetchScalarGridSpec(
        num_scalar_prefetch=0,
        grid=(B_pad // tb_eff,),
        in_specs=in_specs,
        out_specs=pl.BlockSpec((tb_eff, a_pad), lambda i: (i, 0)),
    )
    if fold:
        kern = functools.partial(_attr_kernel_fold, training)
    else:
        kern = functools.partial(_attr_kernel_general, training, T, F)

    out = pl.pallas_call(
        kern,
        out_shape=jax.ShapeDtypeStruct((B_pad, a_pad), in_dtype),
        grid_spec=grid_spec,
        compiler_params=pltpu.CompilerParams(
            dimension_semantics=("parallel",),   # batch tiles are independent
            vmem_limit_bytes=vmem_limit),
        cost_estimate=cost,
    )(*args)
    return out[:B, :num_attr]


# ------------------------------ params & reference ---------------------------


def init_attribute_prediction_params(key, num_tokens, feature_dim, num_attr,
                                     deeper_layer_weight=0.5, dtype=jnp.float32):
    """nn.Linear-style init; weights stored pre-transposed as (in, out)."""
    ks = jax.random.split(key, 4)

    def linear(k, fan_in, fan_out):
        kw, kb = jax.random.split(k)
        bound = 1.0 / (fan_in ** 0.5)
        w = jax.random.uniform(kw, (fan_in, fan_out), dtype, -bound, bound)
        b = jax.random.uniform(kb, (fan_out,), dtype, -bound, bound)
        return w, b

    w_init, b_init = linear(ks[0], feature_dim, _C)
    w_red, b_red = linear(ks[1], num_tokens * _C * 3, _H)
    w_fc1, b_fc1 = linear(ks[2], _H, _C)
    w_fc2, b_fc2 = linear(ks[3], _C, num_attr)
    mlw = (1.0 - deeper_layer_weight) / 2.0
    return dict(
        layer_weights=(mlw, mlw, deeper_layer_weight),
        w_init=w_init, b_init=b_init, w_red=w_red, b_red=b_red,
        w_fc1=w_fc1, b_fc1=b_fc1,
        bn_gamma=jnp.ones((_C,), dtype), bn_beta=jnp.zeros((_C,), dtype),
        bn_mean=jnp.zeros((_C,), dtype), bn_var=jnp.ones((_C,), dtype),
        w_fc2=w_fc2, b_fc2=b_fc2,
    )


def _reference_forward(tensors, p, *, training=False, dropout_mask=None):
    hp = jax.lax.Precision.HIGHEST
    red = [jnp.einsum("btf,fc->btc", x * w, p["w_init"], precision=hp) + p["b_init"]
           for x, w in zip(tensors, p["layer_weights"])]
    cat = jnp.concatenate(red, axis=-1)                        # (B, T, 768)
    flat = cat.reshape(cat.shape[0], -1)                       # (B, T*768)
    reduced = jnp.dot(flat, p["w_red"], precision=hp) + p["b_red"]
    h1 = jnp.dot(reduced, p["w_fc1"], precision=hp) + p["b_fc1"]
    if training:
        mean = h1.mean(axis=0)
        var = jnp.mean(jnp.square(h1 - mean), axis=0)
        h1 = (h1 - mean) / jnp.sqrt(var + _BN_EPS) * p["bn_gamma"] + p["bn_beta"]
    else:
        h1 = ((h1 - p["bn_mean"]) / jnp.sqrt(p["bn_var"] + _BN_EPS)
              * p["bn_gamma"] + p["bn_beta"])
    h1 = jnp.maximum(h1, 0.0)
    if training and dropout_mask is not None:
        h1 = h1 * dropout_mask
    return jnp.dot(h1, p["w_fc2"], precision=hp) + p["b_fc2"]


if __name__ == "__main__":
    num_tokens, feature_dim, num_attr, batch = 4, 128, 40, 16

    root = jax.random.PRNGKey(0)
    kx0, kx1, kx2, kp, kd = jax.random.split(root, 5)
    tensors = [jax.random.normal(k, (batch, num_tokens, feature_dim), jnp.float32)
               for k in (kx0, kx1, kx2)]
    params = init_attribute_prediction_params(kp, num_tokens, feature_dim, num_attr)

    ref = _reference_forward(tensors, params, training=False)

    # ---- eval, folded-weight path (default when F <= 256) ----
    out = jax.block_until_ready(attribute_prediction_forward(tensors, params))
    assert out.shape == (batch, num_attr)
    assert jnp.allclose(out, ref, atol=5e-3, rtol=5e-3), \
        float(jnp.max(jnp.abs(out - ref)))

    # ---- eval, general path (scratch-free K-blocked accumulation) ----
    out_g = jax.block_until_ready(
        attribute_prediction_forward(tensors, params, fold=False))
    assert jnp.allclose(out_g, ref, atol=5e-3, rtol=5e-3), \
        float(jnp.max(jnp.abs(out_g - ref)))

    # ---- eval, bf16 MXU operands with f32 accumulation (looser tolerance) ----
    out_bf = jax.block_until_ready(
        attribute_prediction_forward(tensors, params, mxu_dtype=jnp.bfloat16))
    assert jnp.allclose(out_bf, ref, atol=5e-2, rtol=5e-2), \
        float(jnp.max(jnp.abs(out_bf - ref)))

    # ---- training mode: in-kernel batch-norm stats + inverted dropout ----
    out_tr = jax.block_until_ready(
        attribute_prediction_forward(tensors, params, training=True,
                                     dropout_p=0.5, dropout_key=kd))
    mask = _dropout_mask(kd, batch, 0.5)
    ref_tr = _reference_forward(tensors, params, training=True, dropout_mask=mask)
    assert jnp.allclose(out_tr, ref_tr, atol=5e-3, rtol=5e-3), \
        float(jnp.max(jnp.abs(out_tr - ref_tr)))

    print("KERNEL_OK")
</pallas_src>

<mosaic_0001>
module attributes {stable_mosaic.version = 11 : i64} {
  func.func @_attr_kernel_fold(%arg0: i32, %arg1: memref<8x512xf32, #tpu.memory_space<vmem>>, %arg2: memref<8x512xf32, #tpu.memory_space<vmem>>, %arg3: memref<8x512xf32, #tpu.memory_space<vmem>>, %arg4: memref<3x512x512xf32, #tpu.memory_space<vmem>>, %arg5: memref<1x512xf32, #tpu.memory_space<vmem>>, %arg6: memref<512x256xf32, #tpu.memory_space<vmem>>, %arg7: memref<1x256xf32, #tpu.memory_space<vmem>>, %arg8: memref<1x256xf32, #tpu.memory_space<vmem>>, %arg9: memref<1x256xf32, #tpu.memory_space<vmem>>, %arg10: memref<256x128xf32, #tpu.memory_space<vmem>>, %arg11: memref<1x128xf32, #tpu.memory_space<vmem>>, %arg12: memref<8x128xf32, #tpu.memory_space<vmem>>) attributes {dimension_semantics = [#tpu.dimension_semantics<parallel>], iteration_bounds = array<i64: 2>, scalar_prefetch = 0 : i64, scratch_operands = 0 : i64, tpu.core_type = #tpu.core_type<tc>, window_params = [{transform_indices = @transform_0, window_bounds = array<i64: 8, 512>}, {transform_indices = @transform_1, window_bounds = array<i64: 8, 512>}, {transform_indices = @transform_2, window_bounds = array<i64: 8, 512>}, {pipeline_mode = #tpu.pipeline_mode<synchronous>, transform_indices = @transform_3, window_bounds = array<i64: 3, 512, 512>}, {pipeline_mode = #tpu.pipeline_mode<synchronous>, transform_indices = @transform_4, window_bounds = array<i64: 1, 512>}, {pipeline_mode = #tpu.pipeline_mode<synchronous>, transform_indices = @transform_5, window_bounds = array<i64: 512, 256>}, {pipeline_mode = #tpu.pipeline_mode<synchronous>, transform_indices = @transform_6, window_bounds = array<i64: 1, 256>}, {pipeline_mode = #tpu.pipeline_mode<synchronous>, transform_indices = @transform_7, window_bounds = array<i64: 1, 256>}, {pipeline_mode = #tpu.pipeline_mode<synchronous>, transform_indices = @transform_8, window_bounds = array<i64: 1, 256>}, {pipeline_mode = #tpu.pipeline_mode<synchronous>, transform_indices = @transform_9, window_bounds = array<i64: 256, 128>}, {pipeline_mode = #tpu.pipeline_mode<synchronous>, transform_indices = @transform_10, window_bounds = array<i64: 1, 128>}, {transform_indices = @transform_11, window_bounds = array<i64: 8, 128>}]} {
    %c0 = arith.constant 0 : index
    %c0_0 = arith.constant 0 : index
    %0 = vector.load %arg1[%c0, %c0_0] : memref<8x512xf32, #tpu.memory_space<vmem>>, vector<8x512xf32>
    %c0_1 = arith.constant 0 : index
    %c0_2 = arith.constant 0 : index
    %c0_3 = arith.constant 0 : index
    %1 = vector.load %arg4[%c0_1, %c0_2, %c0_3] : memref<3x512x512xf32, #tpu.memory_space<vmem>>, vector<1x512x512xf32>
    %2 = vector.shape_cast %1 : vector<1x512x512xf32> to vector<512x512xf32>
    %cst = arith.constant dense<0.000000e+00> : vector<8x512xf32>
    %3 = tpu.matmul %0, %2, %cst {dimension_numbers = #tpu.dot_dimension_numbers<[1], [0], [0], [1], [0, 0, 1, 1], [], []>} : vector<8x512xf32>, vector<512x512xf32>, vector<8x512xf32> -> vector<8x512xf32>
    %c0_4 = arith.constant 0 : index
    %c0_5 = arith.constant 0 : index
    %4 = vector.load %arg2[%c0_4, %c0_5] : memref<8x512xf32, #tpu.memory_space<vmem>>, vector<8x512xf32>
    %c1 = arith.constant 1 : index
    %c0_6 = arith.constant 0 : index
    %c0_7 = arith.constant 0 : index
    %5 = vector.load %arg4[%c1, %c0_6, %c0_7] : memref<3x512x512xf32, #tpu.memory_space<vmem>>, vector<1x512x512xf32>
    %6 = vector.shape_cast %5 : vector<1x512x512xf32> to vector<512x512xf32>
    %cst_8 = arith.constant dense<0.000000e+00> : vector<8x512xf32>
    %7 = tpu.matmul %4, %6, %cst_8 {dimension_numbers = #tpu.dot_dimension_numbers<[1], [0], [0], [1], [0, 0, 1, 1], [], []>} : vector<8x512xf32>, vector<512x512xf32>, vector<8x512xf32> -> vector<8x512xf32>
    %8 = arith.addf %3, %7 : vector<8x512xf32>
    %c0_9 = arith.constant 0 : index
    %c0_10 = arith.constant 0 : index
    %9 = vector.load %arg3[%c0_9, %c0_10] : memref<8x512xf32, #tpu.memory_space<vmem>>, vector<8x512xf32>
    %c2 = arith.constant 2 : index
    %c0_11 = arith.constant 0 : index
    %c0_12 = arith.constant 0 : index
    %10 = vector.load %arg4[%c2, %c0_11, %c0_12] : memref<3x512x512xf32, #tpu.memory_space<vmem>>, vector<1x512x512xf32>
    %11 = vector.shape_cast %10 : vector<1x512x512xf32> to vector<512x512xf32>
    %cst_13 = arith.constant dense<0.000000e+00> : vector<8x512xf32>
    %12 = tpu.matmul %9, %11, %cst_13 {dimension_numbers = #tpu.dot_dimension_numbers<[1], [0], [0], [1], [0, 0, 1, 1], [], []>} : vector<8x512xf32>, vector<512x512xf32>, vector<8x512xf32> -> vector<8x512xf32>
    %13 = arith.addf %8, %12 : vector<8x512xf32>
    %c0_14 = arith.constant 0 : index
    %c0_15 = arith.constant 0 : index
    %14 = vector.load %arg5[%c0_14, %c0_15] : memref<1x512xf32, #tpu.memory_space<vmem>>, vector<1x512xf32>
    %15 = vector.broadcast %14 : vector<1x512xf32> to vector<8x512xf32>
    %16 = arith.addf %13, %15 : vector<8x512xf32>
    %c0_16 = arith.constant 0 : index
    %c0_17 = arith.constant 0 : index
    %17 = vector.load %arg6[%c0_16, %c0_17] : memref<512x256xf32, #tpu.memory_space<vmem>>, vector<512x256xf32>
    %cst_18 = arith.constant dense<0.000000e+00> : vector<8x256xf32>
    %18 = tpu.matmul %16, %17, %cst_18 {dimension_numbers = #tpu.dot_dimension_numbers<[1], [0], [0], [1], [0, 0, 1, 1], [], []>} : vector<8x512xf32>, vector<512x256xf32>, vector<8x256xf32> -> vector<8x256xf32>
    %c0_19 = arith.constant 0 : index
    %c0_20 = arith.constant 0 : index
    %19 = vector.load %arg7[%c0_19, %c0_20] : memref<1x256xf32, #tpu.memory_space<vmem>>, vector<1x256xf32>
    %20 = vector.broadcast %19 : vector<1x256xf32> to vector<8x256xf32>
    %21 = arith.addf %18, %20 : vector<8x256xf32>
    %c0_21 = arith.constant 0 : index
    %c0_22 = arith.constant 0 : index
    %22 = vector.load %arg8[%c0_21, %c0_22] : memref<1x256xf32, #tpu.memory_space<vmem>>, vector<1x256xf32>
    %23 = vector.broadcast %22 : vector<1x256xf32> to vector<8x256xf32>
    %24 = arith.mulf %21, %23 : vector<8x256xf32>
    %c0_23 = arith.constant 0 : index
    %c0_24 = arith.constant 0 : index
    %25 = vector.load %arg9[%c0_23, %c0_24] : memref<1x256xf32, #tpu.memory_space<vmem>>, vector<1x256xf32>
    %26 = vector.broadcast %25 : vector<1x256xf32> to vector<8x256xf32>
    %27 = arith.addf %24, %26 : vector<8x256xf32>
    %cst_25 = arith.constant 0.000000e+00 : f32
    %28 = vector.broadcast %cst_25 : f32 to vector<8x256xf32>
    %29 = arith.maximumf %27, %28 : vector<8x256xf32>
    %c0_26 = arith.constant 0 : index
    %c0_27 = arith.constant 0 : index
    %30 = vector.load %arg10[%c0_26, %c0_27] : memref<256x128xf32, #tpu.memory_space<vmem>>, vector<256x128xf32>
    %cst_28 = arith.constant dense<0.000000e+00> : vector<8x128xf32>
    %31 = tpu.matmul %29, %30, %cst_28 {dimension_numbers = #tpu.dot_dimension_numbers<[1], [0], [0], [1], [0, 0, 1, 1], [], []>} : vector<8x256xf32>, vector<256x128xf32>, vector<8x128xf32> -> vector<8x128xf32>
    %c0_29 = arith.constant 0 : index
    %c0_30 = arith.constant 0 : index
    %32 = vector.load %arg11[%c0_29, %c0_30] : memref<1x128xf32, #tpu.memory_space<vmem>>, vector<1x128xf32>
    %33 = vector.broadcast %32 : vector<1x128xf32> to vector<8x128xf32>
    %34 = arith.addf %31, %33 : vector<8x128xf32>
    %c0_31 = arith.constant 0 : index
    %c0_32 = arith.constant 0 : index
    %35 = vector.load %arg12[%c0_31, %c0_32] : memref<8x128xf32, #tpu.memory_space<vmem>>, vector<8x128xf32>
    tpu.vector_store %arg12[%c0_31, %c0_32], %34 {strides = array<i32>} : memref<8x128xf32, #tpu.memory_space<vmem>>, vector<8x128xf32>,
    return
  }
  func.func @transform_0(%arg0: i32) -> (i32, i32) {
    %c0_i32 = arith.constant 0 : i32
    %c0_i32_0 = arith.constant 0 : i32
    return %arg0, %c0_i32 : i32, i32
  }
  func.func @transform_1(%arg0: i32) -> (i32, i32) {
    %c0_i32 = arith.constant 0 : i32
    %c0_i32_0 = arith.constant 0 : i32
    return %arg0, %c0_i32 : i32, i32
  }
  func.func @transform_2(%arg0: i32) -> (i32, i32) {
    %c0_i32 = arith.constant 0 : i32
    %c0_i32_0 = arith.constant 0 : i32
    return %arg0, %c0_i32 : i32, i32
  }
  func.func @transform_3(%arg0: i32) -> (i32, i32, i32) {
    %c0_i32 = arith.constant 0 : i32
    %c0_i32_0 = arith.constant 0 : i32
    %c0_i32_1 = arith.constant 0 : i32
    %c0_i32_2 = arith.constant 0 : i32
    return %c0_i32, %c0_i32_0, %c0_i32_1 : i32, i32, i32
  }
  func.func @transform_4(%arg0: i32) -> (i32, i32) {
    %c0_i32 = arith.constant 0 : i32
    %c0_i32_0 = arith.constant 0 : i32
    %c0_i32_1 = arith.constant 0 : i32
    return %c0_i32, %c0_i32_0 : i32, i32
  }
  func.func @transform_5(%arg0: i32) -> (i32, i32) {
    %c0_i32 = arith.constant 0 : i32
    %c0_i32_0 = arith.constant 0 : i32
    %c0_i32_1 = arith.constant 0 : i32
    return %c0_i32, %c0_i32_0 : i32, i32
  }
  func.func @transform_6(%arg0: i32) -> (i32, i32) {
    %c0_i32 = arith.constant 0 : i32
    %c0_i32_0 = arith.constant 0 : i32
    %c0_i32_1 = arith.constant 0 : i32
    return %c0_i32, %c0_i32_0 : i32, i32
  }
  func.func @transform_7(%arg0: i32) -> (i32, i32) {
    %c0_i32 = arith.constant 0 : i32
    %c0_i32_0 = arith.constant 0 : i32
    %c0_i32_1 = arith.constant 0 : i32
    return %c0_i32, %c0_i32_0 : i32, i32
  }
  func.func @transform_8(%arg0: i32) -> (i32, i32) {
    %c0_i32 = arith.constant 0 : i32
    %c0_i32_0 = arith.constant 0 : i32
    %c0_i32_1 = arith.constant 0 : i32
    return %c0_i32, %c0_i32_0 : i32, i32
  }
  func.func @transform_9(%arg0: i32) -> (i32, i32) {
    %c0_i32 = arith.constant 0 : i32
    %c0_i32_0 = arith.constant 0 : i32
    %c0_i32_1 = arith.constant 0 : i32
    return %c0_i32, %c0_i32_0 : i32, i32
  }
  func.func @transform_10(%arg0: i32) -> (i32, i32) {
    %c0_i32 = arith.constant 0 : i32
    %c0_i32_0 = arith.constant 0 : i32
    %c0_i32_1 = arith.constant 0 : i32
    return %c0_i32, %c0_i32_0 : i32, i32
  }
  func.func @transform_11(%arg0: i32) -> (i32, i32) {
    %c0_i32 = arith.constant 0 : i32
    %c0_i32_0 = arith.constant 0 : i32
    return %arg0, %c0_i32 : i32, i32
  }
}

</mosaic_0001>

<bundles_post_ra>
// kernel: tpu_custom_call.1
= control target key start
LH: loop header
LB: loop body
LE: loop exit
PB: predicated region body
PF: predicated region fallthrough
CT: control target
= control target key end

     0   :  { %s5030_s0 = inlined_call_operand.hbm [shape: f32[16,512], index: 0, kind: input, shape index: {}]   ;;  %s5031_s1 = inlined_call_operand.hbm [shape: f32[16,512], index: 1, kind: input, shape index: {}]   ;;  %s5032_s2 = inlined_call_operand.hbm [shape: f32[16,512], index: 2, kind: input, shape index: {}]   ;;  %s5033_s3 = inlined_call_operand.hbm [shape: f32[3,512,512], index: 3, kind: input, shape index: {}]   ;;  %s5034_s4 = inlined_call_operand.hbm [shape: f32[1,512], index: 4, kind: input, shape index: {}]   ;;  %s5035_s5 = inlined_call_operand.hbm [shape: f32[512,256], index: 5, kind: input, shape index: {}]   ;;  %s5036_s6 = inlined_call_operand.hbm [shape: f32[1,256], index: 6, kind: input, shape index: {}]   ;;  %s5037_s7 = inlined_call_operand.hbm [shape: f32[1,256], index: 7, kind: input, shape index: {}]   ;;  %s5038_s8 = inlined_call_operand.hbm [shape: f32[1,256], index: 8, kind: input, shape index: {}]   ;;  %s5039_s9 = inlined_call_operand.hbm [shape: f32[256,128], index: 9, kind: input, shape index: {}]   ;;  %s5040_s10 = inlined_call_operand.hbm [shape: f32[1,128], index: 10, kind: input, shape index: {}]   ;;  %s5041_s11 = inlined_call_operand.hbm [shape: f32[16,128], index: 11, kind: output, shape index: {}]  }
   0x1   :  { %5062 = sst [smem:[#allocation33_spill]] %s5031_s1 }
   0x2   :  { %5063 = sst [smem:[#allocation34_spill]] %s5032_s2 }
   0x3   :  { %5064 = sst [smem:[#allocation35_spill]] %s5033_s3 }
   0x4   :  { %5065 = sst [smem:[#allocation36_spill]] %s5035_s5 }
   0x5   :  { %5066 = sst [smem:[#allocation37_spill]] %s5037_s7 }
   0x6   :  { %5067 = sst [smem:[#allocation38_spill]] %s5039_s9 }
   0x7   :  { %5068 = sst [smem:[#allocation39_spill]] %s5041_s11 }
   0x8   :  { %16 = vsyncpa [#allocation3], 0 }
   0x9   :  { %18 = vsyncpa [#allocation3 + $0x1], 0 }
   0xa   :  { %19 = vsyncpa [#allocation6], 0 }
   0xb   :  { %21 = vsyncpa [#allocation6 + $0x1], 0 }
   0xc   :  { %22 = vsyncpa [#allocation9], 0 }
   0xd   :  { %23 = vsyncpa [#allocation12], 0 }
   0xe   :  { %24 = vsyncpa [#allocation15], 0 }
   0xf   :  { %25 = vsyncpa [#allocation18], 0 }
  0x10   :  { %26 = vsyncpa [#allocation4], 0 }
  0x11   :  { %28 = vsyncpa [#allocation4 + $0x1], 0  ;;  %s4528_s17 = smov 0   ;;  %s4530_s18 = smov 0  }
  0x12   :  { %s4532_s19 = smov 0   ;;  %s4534_s20 = smov 0  }
  0x13 LB: > { %5069 = sst [smem:[#allocation28_spill]] %s4448_s20  ;;  %s4450_s21 = smov [#allocation8]   ;;  %s4448_s20 = sphi %s4534_s20, %s5112_s20   ;;  %s4444_s19 = sphi %s4532_s19, %s5116_s19   ;;  %s4440_s18 = sphi %s4530_s18, %s5115_s18   ;;  %s4436_s17 = sphi %s4528_s17, %s5114_s17  }
  0x14   : > { %s323_s22 = sshll.u32 %s4450_s21, 4  ;;  %s4549_s23 = sadd.s32 4294967295, %s4448_s20   ;;  %s4554_s22 = int_to_ptr.vmem [resolvable:$true] %s323_s22 }
  0x15   : > { %p2872_p0 = scmp.ge.s32.totalorder %s4448_s20, 1  ;;  %p5045_p1 = scmp.eq.s32.totalorder %s4549_s23, 0 }
  0x16   : > { %p311_p2 = scmp.lt.s32.totalorder %s4448_s20, 3  ;;  %s4451_s25 = smov [#allocation11]  }
  0x17   : > { %s347_s26 = sshll.u32 %s4451_s25, 4  ;;  %s4452_s28 = smov [#allocation14]   ;;  %s4569_s26 = int_to_ptr.vmem [resolvable:$true] %s347_s26 }
  0x18   : > { %p4556_p3 = pnand %p2872_p0, %p311_p2  ;;  %s4571_s29 = sshll.u32 %s4452_s28, 4  ;;  %s373_s29 = int_to_ptr.vmem [resolvable:$true] %s4571_s29 }
  0x19   : > { %s5073_s3 = sld [smem:[#allocation35_spill]] }
  0x1a   : > { %s5070_s24 = scalar_select %p4556_p3, 1, 0 }
  0x1b   : > { %p3939_p5 = pneg %p4556_p3 }
  0x1c   : > { %5071 = sst [smem:[#allocation29_spill]] %s5070_s24 }
  0x1d   : > { %p4565_p6 = pnand %p3939_p5, %p5045_p1 }
  0x1f   : > { %s5072_s27 = scalar_select %p4565_p6, 1, 0 }
  0x20   : > { %s4048_s13 = scalar_lea.hbm %s5073_s3, 98304  ;;  %p4581_p8 = pneg %p4565_p6 }
  0x21   : > { %p4049_p7 = scmp.ne.s32.totalorder %s5073_s3, %s4048_s13  ;;  %p4055_p11 = scmp.lt.u32.totalorder %s4048_s13, %s5073_s3 }
  0x22   : > { %s5074_s16 = scalar_select %p4581_p8, 1, 0 }
  0x23   : > { %p4051_p9 = pnand %p4581_p8, %p4049_p7 }
  0x25   : > { %p4052_p10 = pneg %p4051_p9 }
  0x27   : > { %p4057_p12 = pnand %p4055_p11, %p4052_p10 }
  0x29   : > { %4060 = shalt.err (!%p4057_p12)
}
  0x2a   : > { %s4061_s28 = scalar_lea.vmem %s4554_s22, 98304  ;;  %p4069_p5 = scmp.lt.s32.totalorder %s4554_s22, %s4554_s22 }
  0x2b   : > { %p4062_p13 = scmp.ne.s32.totalorder %s4554_s22, %s4061_s28  ;;  %p4070_p4 = scmp.lt.s32.totalorder %s4061_s28, %s4061_s28 }
  0x2d   : > { %p4064_p0 = pnand %p4062_p13, %p4581_p8  ;;  %p4071_p7 = por %p4070_p4, %p4069_p5 }
  0x2f   : > { %p4065_p2 = pneg %p4064_p0 }
  0x31   : > { %p4072_p9 = pnand %p4071_p7, %p4065_p2 }
  0x33   : > { %4075 = shalt.err (!%p4072_p9)
}
  0x34   : > { %s4453_s30 = smov 512   ;;  %s4454_s12 = smov 32  }
  0x35   : > { %3942 = dma.hbm_to_vmem [thread:$0]  (!%p4565_p6), %s5073_s3, 98304, %s4554_s22, [#allocation9], %s4453_s30, %s4453_s30, %s4454_s12  }
  0x36   : > { %s5075_s5 = sld [smem:[#allocation36_spill]] }
  0x3c   : > { %s4076_s25 = scalar_lea.hbm %s5075_s5, 16384 }
  0x3d   : > { %p4077_p4 = scmp.ne.s32.totalorder %s5075_s5, %s4076_s25  ;;  %p4083_p12 = scmp.lt.u32.totalorder %s4076_s25, %s5075_s5 }
  0x3f   : > { %p4079_p10 = pnand %p4077_p4, %p4581_p8 }
  0x41   : > { %p4080_p11 = pneg %p4079_p10 }
  0x43   : > { %p4085_p13 = pnand %p4083_p12, %p4080_p11 }
  0x45   : > { %4088 = shalt.err (!%p4085_p13)
}
  0x46   : > { %s4089_s22 = scalar_lea.vmem %s4569_s26, 16384  ;;  %p4097_p7 = scmp.lt.s32.totalorder %s4569_s26, %s4569_s26 }
  0x47   : > { %p4090_p0 = scmp.ne.s32.totalorder %s4569_s26, %s4089_s22  ;;  %p4098_p9 = scmp.lt.s32.totalorder %s4089_s22, %s4089_s22 }
  0x49   : > { %p4092_p2 = pnand %p4090_p0, %p4581_p8  ;;  %p4099_p4 = por %p4098_p9, %p4097_p7 }
  0x4b   : > { %p4093_p5 = pneg %p4092_p2 }
  0x4d   : > { %p4100_p10 = pnand %p4099_p4, %p4093_p5 }
  0x4f   : > { %4103 = shalt.err (!%p4100_p10)
}
  0x50   : > { %s4455_s11 = smov 256   ;;  %s4456_s2 = smov 16  }
  0x51   : > { %3948 = dma.hbm_to_vmem [thread:$0]  (!%p4565_p6), %s5075_s5, 16384, %s4569_s26, [#allocation12], %s4455_s11, %s4455_s11, %s4456_s2  }
  0x52   : > { %s5076_s7 = sld [smem:[#allocation37_spill]] }
  0x58   : > { %s4104_s14 = scalar_lea.hbm %s5076_s7, 32 }
  0x59   : > { %p4105_p11 = scmp.ne.s32.totalorder %s5076_s7, %s4104_s14  ;;  %p4111_p0 = scmp.lt.u32.totalorder %s4104_s14, %s5076_s7 }
  0x5b   : > { %p4107_p12 = pnand %p4105_p11, %p4581_p8 }
  0x5d   : > { %p4108_p13 = pneg %p4107_p12 }
  0x5f   : > { %p4113_p2 = pnand %p4111_p0, %p4108_p13 }
  0x61   : > { %4116 = shalt.err (!%p4113_p2)
}
  0x62   : > { %s4117_s22 = scalar_lea.vmem %s373_s29, 32  ;;  %p4125_p4 = scmp.lt.s32.totalorder %s373_s29, %s373_s29 }
  0x63   : > { %p4118_p5 = scmp.ne.s32.totalorder %s373_s29, %s4117_s22  ;;  %p4126_p10 = scmp.lt.s32.totalorder %s4117_s22, %s4117_s22 }
  0x65   : > { %p4120_p7 = pnand %p4118_p5, %p4581_p8  ;;  %p4127_p1 = por %p4126_p10, %p4125_p4 }
  0x67   : > { %p4121_p9 = pneg %p4120_p7 }
  0x69   : > { %p4128_p3 = pnand %p4127_p1, %p4121_p9 }
  0x6b   : > { %4131 = shalt.err (!%p4128_p3)
}
  0x6c   : > { %3954 = dma.hbm_to_vmem [thread:$0]  (!%p4565_p6), %s5076_s7, 32, %s373_s29, [#allocation15]  }
  0x6d   : > { %s4457_s2 = smov [#allocation17]   ;;  %s5077_s9 = sld [smem:[#allocation38_spill]] }
  0x6e   : > { %s393_s24 = sshll.u32 %s4457_s2, 4  ;;  %s394_s24 = int_to_ptr.vmem [resolvable:$true] %s393_s24 }
  0x73   : > { %s4132_s13 = scalar_lea.hbm %s5077_s9, 4096 }
  0x74   : > { %p4133_p11 = scmp.ne.s32.totalorder %s5077_s9, %s4132_s13  ;;  %p4139_p12 = scmp.lt.u32.totalorder %s4132_s13, %s5077_s9 }
  0x76   : > { %p4135_p1 = pnand %p4133_p11, %p4581_p8 }
  0x78   : > { %p4136_p3 = pneg %p4135_p1 }
  0x7a   : > { %p4141_p13 = pnand %p4139_p12, %p4136_p3 }
  0x7c   : > { %4144 = shalt.err (!%p4141_p13)
}
  0x7d   : > { %s4145_s29 = scalar_lea.vmem %s394_s24, 4096  ;;  %p4153_p7 = scmp.lt.s32.totalorder %s394_s24, %s394_s24 }
  0x7e   : > { %p4146_p0 = scmp.ne.s32.totalorder %s394_s24, %s4145_s29  ;;  %p4154_p9 = scmp.lt.s32.totalorder %s4145_s29, %s4145_s29 }
  0x80   : > { %p4148_p2 = pnand %p4146_p0, %p4581_p8  ;;  %p4155_p4 = por %p4154_p9, %p4153_p7 }
  0x82   : > { %p4149_p5 = pneg %p4148_p2 }
  0x84   : > { %p4156_p10 = pnand %p4155_p4, %p4149_p5 }
  0x86   : > { %4159 = shalt.err (!%p4156_p10)
}
  0x87   : > { %s4458_s28 = smov 128   ;;  %s4459_s22 = smov 8  }
  0x88   : > { %3960 = dma.hbm_to_vmem [thread:$0]  (!%p4565_p6), %s5077_s9, 4096, %s394_s24, [#allocation18], %s4458_s28, %s4458_s28, %s4459_s22  }
  0x89   : > { %s2871_s2 = sadd.s32 4294967294, %s4448_s20   ;;  %s4664_s30 = sadd.s32 1, %s4448_s20  }
  0x8a   : > { %5078 = sst [smem:[#allocation30_spill]] %s4664_s30  ;;  %s38_s12 = ssub.s32 %s4448_s20, %s4664_s30 }
  0x8b   : > { %s41_s13 = sadd.s32 1, %s4444_s19  ;;  %p39_p11 = scmp.eq.s32.totalorder %s38_s12, 0 }
  0x8c   : > { %p48_p1 = scmp.ne.s32.totalorder %s4444_s19, %s4440_s18  ;;  %p49_p3 = scmp.eq.s32.totalorder %s4448_s20, 0 }
  0x8d   : > { %p54_p12 = scmp.ne.s32.totalorder %s4440_s18, %s4436_s17  ;;  %p5080_p0 = scmp.eq.s32.totalorder %s4549_s23, 0 }
  0x8e   : > { %s4675_s14 = scalar_select %p39_p11, %s4444_s19, %s41_s13  }
  0x8f   : > { %p50_p13 = por %p49_p3, %p48_p1  ;;  %p4679_p2 = por %p5080_p0, %p54_p12 }
  0x90   : > { %5079 = sst [smem:[#allocation31_spill]] %s4675_s14  ;;  %p298_p5 = scmp.eq.s32.totalorder %s4549_s23, 1 }
  0x91   : > { %s5081_s15 = scalar_select %p4679_p2, 1, 0 }
  0x92   : > { %p304_p7 = scmp.eq.s32.totalorder %s2871_s2, 1  ;;  %p3986_p9 = scmp.lt.s32.totalorder %s4448_s20, 2 }
  0x93   : > { %s5047_s24 = sand.u32 1, %s4444_s19   ;;  %p4686_p4 = por %p298_p5, %p48_p1 }
  0x94   : > { %p4690_p10 = por %p304_p7, %p54_p12  ;;  %s4696_s29 = sshll.u32 %s5047_s24, 5 }
  0x95   : > { %s5082_s21 = scalar_select %p4686_p4, 1, 0 }
  0x96   : > { %s5083_s25 = scalar_select %p4690_p10, 1, 0 }
  0x97   : > { %s4699_s28 = sshll.u32 %s4448_s20, 9  ;;  %p4701_p11 = pnand %p3986_p9, %p50_p13 }
  0x98   : > { %5084 = sst [smem:[#allocation32_spill]] %s5083_s25  ;;  %s437_s26 = sand.u32 1, %s4448_s20  }
  0x99   : > { %s5085_s22 = scalar_select %p4701_p11, 1, 0 }
  0x9a   : > { %s5086_s1 = sld [smem:[#allocation33_spill]]  ;;  %s441_s13 = scalar_lea.vmem [#allocation5], %s4696_s29 }
  0x9b   : > { %s449_s24 = sshll.u32 %s441_s13, 4  ;;  %s4460_s3 = smov [#allocation10]   ;;  %s4713_s24 = int_to_ptr.vmem [resolvable:$true] %s449_s24 }
  0x9c   : > { %s4715_s5 = sshll.u32 %s4460_s3, 4  ;;  %s4717_s7 = scalar_lea.sflag [#allocation6], %s437_s26  ;;  %s338_s5 = int_to_ptr.vmem [resolvable:$true] %s4715_s5 }
  0x9d   : > { %p4723_p3 = pneg %p4701_p11 }
  0x9f   : > { %s5087_s11 = scalar_select %p4723_p3, 1, 0 }
  0xa0   : > { %s4710_s12 = scalar_lea.hbm %s5086_s1, %s4699_s28  ;;  %s4165_s14 = scalar_lea.hbm %s5086_s1, 1024 }
  0xa1   : > { %s4160_s9 = scalar_lea.hbm %s4710_s12, 512  ;;  %p4166_p0 = scmp.lt.u32.totalorder %s4710_s12, %s5086_s1 }
  0xa2   : > { %p4161_p1 = scmp.ne.s32.totalorder %s4710_s12, %s4160_s9  ;;  %p4167_p5 = scmp.lt.u32.totalorder %s4165_s14, %s4160_s9 }
  0xa3   : > { %p4169_p9 = scmp.lt.u32.totalorder %s4160_s9, %s4710_s12 }
  0xa4   : > { %p4163_p12 = pnand %p4723_p3, %p4161_p1  ;;  %p4168_p7 = por %p4167_p5, %p4166_p0 }
  0xa6   : > { %p4164_p13 = pneg %p4163_p12  ;;  %p4170_p10 = por %p4169_p9, %p4168_p7 }
  0xa8   : > { %p4171_p4 = pnand %p4170_p10, %p4164_p13 }
  0xaa   : > { %4174 = shalt.err (!%p4171_p4)
}
  0xab   : > { %s4175_s26 = scalar_lea.vmem %s4713_s24, 512  ;;  %s4461_s2 = smov [#allocation5]  }
  0xac   : > { %p4176_p1 = scmp.ne.s32.totalorder %s4713_s24, %s4175_s26  ;;  %s4180_s13 = sshll.u32 %s4461_s2, 4  ;;  %s4181_s13 = int_to_ptr.vmem [resolvable:$false] %s4180_s13 }
  0xad   : > { %s4182_s30 = scalar_lea.vmem %s4181_s13, 1024  ;;  %p4183_p6 = scmp.lt.s32.totalorder %s4713_s24, %s4181_s13 }
  0xae   : > { %p4178_p12 = pnand %p4176_p1, %p4723_p3  ;;  %p4184_p8 = scmp.lt.s32.totalorder %s4182_s30, %s4175_s26 }
  0xb0   : > { %p4179_p2 = pneg %p4178_p12  ;;  %p4185_p0 = por %p4184_p8, %p4183_p6 }
  0xb2   : > { %p4186_p5 = pnand %p4185_p0, %p4179_p2 }
  0xb4   : > { %4189 = shalt.err (!%p4186_p5)
}
  0xb5   : > { %3970 = dma.hbm_to_vmem [thread:$0]  (!%p4701_p11), %s4710_s12, 512, %s4713_s24, %s4717_s7  }
  0xb6   : > { %s4190_s3 = scalar_lea.hbm %s5034_s4, 64  ;;  %p5088_p6 = scmp.ne.s32.totalorder %s5074_s16, 0 }
  0xb7   : > { %p4191_p4 = scmp.ne.s32.totalorder %s5034_s4, %s4190_s3  ;;  %p4197_p10 = scmp.lt.u32.totalorder %s4190_s3, %s5034_s4 }
  0xb9   : > { %p4193_p8 = pnand %p4191_p4, %p5088_p6 }
  0xbb   : > { %p4194_p2 = pneg %p4193_p8 }
  0xbd   : > { %p4199_p13 = pnand %p4197_p10, %p4194_p2 }
  0xbf   : > { %4202 = shalt.err (!%p4199_p13)
}
  0xc0   : > { %s4203_s30 = scalar_lea.vmem %s338_s5, 64  ;;  %p4211_p12 = scmp.lt.s32.totalorder %s338_s5, %s338_s5 }
  0xc1   : > { %p4204_p7 = scmp.ne.s32.totalorder %s338_s5, %s4203_s30  ;;  %p4212_p0 = scmp.lt.s32.totalorder %s4203_s30, %s4203_s30 }
  0xc3   : > { %p4206_p9 = pnand %p4204_p7, %p5088_p6  ;;  %p4213_p5 = por %p4212_p0, %p4211_p12 }
  0xc5   : > { %p4207_p1 = pneg %p4206_p9 }
  0xc7   : > { %p4214_p11 = pnand %p4213_p5, %p4207_p1 }
  0xc9   : > { %4217 = shalt.err (!%p4214_p11)
}
  0xca   : > { %p5089_p4 = scmp.ne.s32.totalorder %s5072_s27, 0  ;;  %s4462_s12 = smov [#allocation13]  }
  0xcb   : > { %s361_s9 = sshll.u32 %s4462_s12, 4  ;;  %s4463_s14 = smov [#allocation16]   ;;  %s362_s9 = int_to_ptr.vmem [resolvable:$true] %s361_s9 }
  0xcc   : > { %3945 = dma.hbm_to_vmem [thread:$0]  (!%p5089_p4), %s5034_s4, 64, %s338_s5, [#allocation9]  }
  0xcd   : > { %s383_s3 = sshll.u32 %s4463_s14, 4  ;;  %s4218_s13 = scalar_lea.hbm %s5036_s6, 32  ;;  %s384_s3 = int_to_ptr.vmem [resolvable:$true] %s383_s3 }
  0xce   : > { %p4219_p11 = scmp.ne.s32.totalorder %s5036_s6, %s4218_s13  ;;  %p4225_p10 = scmp.lt.u32.totalorder %s4218_s13, %s5036_s6 }
  0xd0   : > { %p4221_p8 = pnand %p4219_p11, %p5088_p6 }
  0xd2   : > { %p4222_p2 = pneg %p4221_p8 }
  0xd4   : > { %p4227_p13 = pnand %p4225_p10, %p4222_p2 }
  0xd6   : > { %4230 = shalt.err (!%p4227_p13)
}
  0xd7   : > { %s4231_s5 = scalar_lea.vmem %s362_s9, 32  ;;  %p4239_p12 = scmp.lt.s32.totalorder %s362_s9, %s362_s9 }
  0xd8   : > { %p4232_p7 = scmp.ne.s32.totalorder %s362_s9, %s4231_s5  ;;  %p4240_p0 = scmp.lt.s32.totalorder %s4231_s5, %s4231_s5 }
  0xda   : > { %p4234_p9 = pnand %p4232_p7, %p5088_p6  ;;  %p4241_p5 = por %p4240_p0, %p4239_p12 }
  0xdc   : > { %p4235_p1 = pneg %p4234_p9 }
  0xde   : > { %p4242_p3 = pnand %p4241_p5, %p4235_p1 }
  0xe0   : > { %4245 = shalt.err (!%p4242_p3)
}
  0xe1   : > { %3951 = dma.hbm_to_vmem [thread:$0]  (!%p5089_p4), %s5036_s6, 32, %s362_s9, [#allocation12]  }
  0xe2   : > { %s4246_s14 = scalar_lea.hbm %s5038_s8, 32 }
  0xe3   : > { %p4247_p11 = scmp.ne.s32.totalorder %s5038_s8, %s4246_s14  ;;  %p4253_p3 = scmp.lt.u32.totalorder %s4246_s14, %s5038_s8 }
  0xe5   : > { %p4249_p8 = pnand %p4247_p11, %p5088_p6 }
  0xe7   : > { %p4250_p2 = pneg %p4249_p8 }
  0xe9   : > { %p4255_p10 = pnand %p4253_p3, %p4250_p2 }
  0xeb   : > { %4258 = shalt.err (!%p4255_p10)
}
  0xec   : > { %s4259_s1 = scalar_lea.vmem %s384_s3, 32  ;;  %p4267_p1 = scmp.lt.s32.totalorder %s384_s3, %s384_s3 }
  0xed   : > { %p4260_p13 = scmp.ne.s32.totalorder %s384_s3, %s4259_s1  ;;  %p4268_p12 = scmp.lt.s32.totalorder %s4259_s1, %s4259_s1 }
  0xef   : > { %p4262_p7 = pnand %p4260_p13, %p5088_p6  ;;  %p4269_p0 = por %p4268_p12, %p4267_p1 }
  0xf1   : > { %p4263_p9 = pneg %p4262_p7 }
  0xf3   : > { %p4270_p5 = pnand %p4269_p0, %p4263_p9 }
  0xf5   : > { %4273 = shalt.err (!%p4270_p5)
}
  0xf6   : > { %3957 = dma.hbm_to_vmem [thread:$0]  (!%p5089_p4), %s5038_s8, 32, %s384_s3, [#allocation15]  }
  0xf7   : > { %s4464_s20 = smov [#allocation19]   ;;  %s4274_s14 = scalar_lea.hbm %s5040_s10, 16 }
  0xf8   : > { %s407_s24 = sshll.u32 %s4464_s20, 4  ;;  %p4275_p11 = scmp.ne.s32.totalorder %s5040_s10, %s4274_s14  ;;  %s408_s24 = int_to_ptr.vmem [resolvable:$true] %s407_s24 }
  0xf9   : > { %p4281_p3 = scmp.lt.u32.totalorder %s4274_s14, %s5040_s10 }
  0xfa   : > { %p4277_p8 = pnand %p4275_p11, %p5088_p6 }
  0xfc   : > { %p4278_p2 = pneg %p4277_p8 }
  0xfe   : > { %p4283_p10 = pnand %p4281_p3, %p4278_p2 }
 0x100   : > { %4286 = shalt.err (!%p4283_p10)
}
 0x101   : > { %s4287_s3 = scalar_lea.vmem %s408_s24, 16  ;;  %s4294_s1 = scalar_lea.vmem %s408_s24, 32 }
 0x102   : > { %p4288_p13 = scmp.ne.s32.totalorder %s408_s24, %s4287_s3  ;;  %p4295_p1 = scmp.lt.s32.totalorder %s408_s24, %s408_s24 }
 0x103   : > { %p4296_p12 = scmp.lt.s32.totalorder %s4294_s1, %s4287_s3 }
 0x104   : > { %p4290_p7 = pnand %p4288_p13, %p5088_p6 }
 0x105   : > { %p4297_p0 = por %p4296_p12, %p4295_p1 }
 0x106   : > { %p4291_p9 = pneg %p4290_p7 }
 0x108   : > { %p4298_p5 = pnand %p4297_p0, %p4291_p9 }
 0x10a   : > { %4301 = shalt.err (!%p4298_p5)
}
 0x10b   : > { %3963 = dma.hbm_to_vmem [thread:$0]  (!%p5089_p4), %s5040_s10, 16, %s408_s24, [#allocation18]  }
 0x10c   : > { %s4824_s25 = scalar_lea.hbm %s5030_s0, %s4699_s28  ;;  %s422_s12 = scalar_lea.vmem [#allocation2], %s4696_s29 }
 0x10d   : > { %s430_s14 = sshll.u32 %s422_s12, 4  ;;  %s5090_s27 = sand.u32 1, %s4444_s19   ;;  %s431_s14 = int_to_ptr.vmem [resolvable:$true] %s430_s14 }
 0x10e   : > { %s419_s2 = scalar_lea.sflag [#allocation3], %s5090_s27  ;;  %s4302_s26 = scalar_lea.hbm %s4824_s25, 512 }
 0x10f   : > { %p4303_p6 = scmp.ne.s32.totalorder %s4824_s25, %s4302_s26  ;;  %p5091_p11 = scmp.ne.s32.totalorder %s5087_s11, 0 }
 0x110   : > { %s4307_s30 = scalar_lea.hbm %s5030_s0, 1024  ;;  %p4308_p4 = scmp.lt.u32.totalorder %s4824_s25, %s5030_s0 }
 0x111   : > { %p4305_p8 = pnand %p4303_p6, %p5091_p11  ;;  %p4309_p3 = scmp.lt.u32.totalorder %s4307_s30, %s4302_s26 }
 0x112   : > { %p4311_p13 = scmp.lt.u32.totalorder %s4302_s26, %s4824_s25 }
 0x113   : > { %p4306_p2 = pneg %p4305_p8  ;;  %p4310_p10 = por %p4309_p3, %p4308_p4 }
 0x115   : > { %p4312_p7 = por %p4311_p13, %p4310_p10 }
 0x117   : > { %p4313_p9 = pnand %p4312_p7, %p4306_p2 }
 0x119   : > { %4316 = shalt.err (!%p4313_p9)
}
 0x11a   : > { %s4317_s9 = scalar_lea.vmem %s431_s14, 512  ;;  %s4465_s5 = smov [#allocation2]  }
 0x11b   : > { %p4318_p1 = scmp.ne.s32.totalorder %s431_s14, %s4317_s9  ;;  %s4322_s20 = sshll.u32 %s4465_s5, 4  ;;  %s4323_s20 = int_to_ptr.vmem [resolvable:$false] %s4322_s20 }
 0x11c   : > { %s4324_s16 = scalar_lea.vmem %s4323_s20, 1024  ;;  %p4325_p5 = scmp.lt.s32.totalorder %s431_s14, %s4323_s20 }
 0x11d   : > { %p4320_p12 = pnand %p4318_p1, %p5091_p11  ;;  %p4326_p6 = scmp.lt.s32.totalorder %s4324_s16, %s4317_s9 }
 0x11f   : > { %p4321_p0 = pneg %p4320_p12  ;;  %p4327_p8 = por %p4326_p6, %p4325_p5 }
 0x121   : > { %p4328_p3 = pnand %p4327_p8, %p4321_p0 }
 0x123   : > { %4331 = shalt.err (!%p4328_p3)
}
 0x124   : > { %p5092_p4 = scmp.ne.s32.totalorder %s5085_s22, 0  ;;  %s5093_s26 = sld [smem:[#allocation34_spill]] }
 0x125   : > { %s460_s13 = scalar_lea.vmem [#allocation7], %s4696_s29 }
 0x126   : > { %3967 = dma.hbm_to_vmem [thread:$0]  (!%p5092_p4), %s4824_s25, 512, %s431_s14, %s419_s2  }
 0x127   : > { %s468_s30 = sshll.u32 %s460_s13, 4  ;;  %s469_s30 = int_to_ptr.vmem [resolvable:$true] %s468_s30 }
 0x12a   : > { %s4850_s24 = scalar_lea.hbm %s5093_s26, %s4699_s28  ;;  %s4337_s25 = scalar_lea.hbm %s5093_s26, 1024 }
 0x12b   : > { %s4332_s3 = scalar_lea.hbm %s4850_s24, 512  ;;  %p4338_p7 = scmp.lt.u32.totalorder %s4850_s24, %s5093_s26 }
 0x12c   : > { %p4333_p2 = scmp.ne.s32.totalorder %s4850_s24, %s4332_s3  ;;  %p4339_p9 = scmp.lt.u32.totalorder %s4337_s25, %s4332_s3 }
 0x12d   : > { %p4341_p12 = scmp.lt.u32.totalorder %s4332_s3, %s4850_s24 }
 0x12e   : > { %p4335_p10 = pnand %p4333_p2, %p5091_p11  ;;  %p4340_p1 = por %p4339_p9, %p4338_p7 }
 0x130   : > { %p4336_p13 = pneg %p4335_p10  ;;  %p4342_p0 = por %p4341_p12, %p4340_p1 }
 0x132   : > { %p4343_p5 = pnand %p4342_p0, %p4336_p13 }
 0x134   : > { %4346 = shalt.err (!%p4343_p5)
}
 0x135   : > { %s4347_s29 = scalar_lea.vmem %s469_s30, 512  ;;  %s4466_s28 = smov [#allocation7]  }
 0x136   : > { %p4348_p6 = scmp.ne.s32.totalorder %s469_s30, %s4347_s29  ;;  %s4352_s5 = sshll.u32 %s4466_s28, 4  ;;  %s4353_s5 = int_to_ptr.vmem [resolvable:$false] %s4352_s5 }
 0x137   : > { %s4354_s20 = scalar_lea.vmem %s4353_s5, 1024  ;;  %p4355_p2 = scmp.lt.s32.totalorder %s469_s30, %s4353_s5 }
 0x138   : > { %p4350_p8 = pnand %p4348_p6, %p5091_p11  ;;  %p4356_p10 = scmp.lt.s32.totalorder %s4354_s20, %s4347_s29 }
 0x13a   : > { %p4351_p3 = pneg %p4350_p8  ;;  %p4357_p4 = por %p4356_p10, %p4355_p2 }
 0x13c   : > { %p4358_p7 = pnand %p4357_p4, %p4351_p3 }
 0x13e   : > { %4361 = shalt.err (!%p4358_p7)
}
 0x13f   : > { %p5094_p9 = scmp.ne.s32.totalorder %s5085_s22, 0  ;;  %s5095_s16 = sld [smem:[#allocation29_spill]] }
 0x141   : > { %3973 = dma.hbm_to_vmem [thread:$0]  (!%p5094_p9), %s4850_s24, 512, %s469_s30, %s4717_s7  }
 0x145   : > { %p5096_p13 = scmp.ne.s32.totalorder %s5095_s16, 0 }
 0x146   : > { %s4874_s11 = sand.u32 (!%p5096_p13), 1, %s4440_s18   ;;  %p5097_p11 = scmp.ne.s32.totalorder (!%p5096_p13), %s5081_s15, 0 }
 0x147   : > { %477 = sbr.rel (%p5096_p13) target bundleno = 1473 (0x5c1), region = 64  ;;  %s2892_s12 = sshll.u32 (!%p5096_p13), %s4874_s11, 5 }
 0x148   : > { %s480_s27 = scalar_lea.sflag (!%p5096_p13), [#allocation3], %s4874_s11  ;;  %s4878_s13 = scalar_lea.vmem (!%p5096_p13), [#allocation2], %s2892_s12 }
 0x14e   : > { %4407 = dma.done.wait (%p5097_p11), %s480_s27, 512  }
 0x14f   : > { %4409 = vsyncadd (%p5097_p11), %s480_s27, 4294966784  ;;  %s488_s7 = sand.u32 1, %s4549_s23   ;;  %s4885_s24 = scalar_lea.vmem [#allocation5], %s2892_s12 }
 0x150   : > { %s489_s22 = scalar_lea.sflag [#allocation6], %s488_s7 }
 0x151   : > { %4411 = dma.done.wait (%p5097_p11), %s489_s22, 1024  }
 0x152   : > { %4413 = vsyncadd (%p5097_p11), %s489_s22, 4294966272  ;;  %s4891_s30 = scalar_lea.vmem [#allocation7], %s2892_s12  ;;  %p5098_p4 = scmp.eq.s32.totalorder %s4549_s23, 0 }
 0x154   : > { %4415 = dma.done.wait (%p5098_p4), [#allocation9], 98368   ;;  %p5099_p1 = pmov %p5098_p4 }
 0x156   : > { %4417 = vsyncadd (%p5099_p1), [#allocation9], 4294868928  ;;  %p5100_p12 = pmov %p5099_p1 }
 0x157   : > { %p5101_p0 = pmov %p5099_p1 }
 0x158   : > { %4419 = dma.done.wait (%p5100_p12), [#allocation12], 16416  }
 0x159   : > { %4421 = vsyncadd (%p5101_p0), [#allocation12], 4294950880  ;;  %p5102_p5 = pmov %p5101_p0 }
 0x15a   : > { %p5103_p6 = pmov %p5101_p0 }
 0x15b   : > { %4423 = dma.done.wait (%p5102_p5), [#allocation15], 64  }
 0x15c   : > { %4425 = vsyncadd (%p5103_p6), [#allocation15], 4294967232  ;;  %p5104_p8 = pmov %p5101_p0 }
 0x15d   : > { %p5105_p3 = pmov %p5101_p0 }
 0x15e   : > { %4427 = dma.done.wait (%p5104_p8), [#allocation18], 4112  }
 0x15f   : > { %4429 = vsyncadd (%p5105_p3), [#allocation18], 4294963184  ;;  %v848_v0 = vld [vmem:[#allocation8 + $0x808] sm:$0xff]  ;;  %v847_v5 = vld [vmem:[#allocation8 + $0x800] sm:$0xff]  ;;  %s2903_s15 = sshll.u32 %s4874_s11, 3  ;;  %s2906_s3 = sshll.u32 %s4549_s23, 7 }
 0x160   : > { %v852_v1 = vld [vmem:[#allocation8 + $0x828] sm:$0xff]  ;;  %v851_v6 = vld [vmem:[#allocation8 + $0x820] sm:$0xff]  ;;  %s581_s1 = scalar_lea.vmem [#allocation20], %s2903_s15  ;;  %s5106_s2 = sld [smem:[#allocation39_spill]] }
 0x161   : > { %v976_v2 = vld [vmem:[#allocation8 + $0xc08] sm:$0xff]  ;;  %v2947_v3 = vpack.c.bf16 %v852_v1, %v848_v0  ;;  %v2949_v8 = vpack.c.bf16 %v851_v6, %v847_v5  ;;  %v975_v9 = vld [vmem:[#allocation8 + $0xc00] sm:$0xff]  ;;  %s2682_s9 = sshll.u32 %s581_s1, 4  ;;  %s2669_s28 = scalar_lea.sflag [#allocation4], %s4874_s11  ;;  %s4988_s9 = int_to_ptr.vmem [resolvable:$true] %s2682_s9 }
 0x162   : > { %v980_v4 = vld [vmem:[#allocation8 + $0xc28] sm:$0xff]  ;;  %v979_v10 = vld [vmem:[#allocation8 + $0xc20] sm:$0xff]  ;;  %s4362_s5 = scalar_lea.vmem %s4988_s9, 128  ;;  %p5107_p10 = scmp.ne.s32.totalorder %s5082_s21, 0 }
 0x163   : > { %v3011_v7 = vpack.c.bf16 %v980_v4, %v976_v2  ;;  %v856_v11 = vld [vmem:[#allocation8 + $0x848] sm:$0xff]  ;;  %2948 = vmatprep.subr.bf16.mxu1 %v2947_v3  ;;  %v3013_v12 = vpack.c.bf16 %v979_v10, %v975_v9  ;;  %v855_v18 = vld [vmem:[#allocation8 + $0x840] sm:$0xff]  ;;  %p4363_p2 = scmp.ne.s32.totalorder %s4988_s9, %s4362_s5  ;;  %s4467_s23 = smov [#allocation20]  }
 0x164   : > { %v860_v13 = vld [vmem:[#allocation8 + $0x868] sm:$0xff]  ;;  %2950 = vmatpush1.bf16.msra.mxu1 %v2949_v8  ;;  %v859_v19 = vld [vmem:[#allocation8 + $0x860] sm:$0xff]  ;;  %s4366_s20 = sshll.u32 %s4467_s23, 4  ;;  %s4367_s20 = int_to_ptr.vmem [resolvable:$false] %s4366_s20 }
 0x165   : > { %v984_v14 = vld [vmem:[#allocation8 + $0xc48] sm:$0xff]  ;;  %3012 = vmatprep.subr.bf16.mxu0 %v3011_v7  ;;  %v2951_v16 = vpack.c.bf16 %v860_v13, %v856_v11  ;;  %v983_v20 = vld [vmem:[#allocation8 + $0xc40] sm:$0xff]  ;;  %v2953_v21 = vpack.c.bf16 %v859_v19, %v855_v18  ;;  %p4364_p7 = pnand %p4363_p2, %p5107_p10  ;;  %s4368_s16 = scalar_lea.vmem %s4367_s20, 256 }
 0x166   : > { %v988_v15 = vld [vmem:[#allocation8 + $0xc68] sm:$0xff]  ;;  %3014 = vmatpush1.bf16.msra.mxu0 %v3013_v12  ;;  %v987_v22 = vld [vmem:[#allocation8 + $0xc60] sm:$0xff]  ;;  %s4986_s29 = scalar_lea.hbm %s5106_s2, %s2906_s3  ;;  %p4369_p13 = scmp.lt.s32.totalorder %s4988_s9, %s4367_s20 }
 0x167   : > { %v3015_v17 = vpack.c.bf16 %v988_v15, %v984_v14  ;;  %v864_v23 = vld [vmem:[#allocation8 + $0x888] sm:$0xff]  ;;  %2952 = vmatprep.subr.bf16.mxu1 %v2951_v16  ;;  %v3017_v25 = vpack.c.bf16 %v987_v22, %v983_v20  ;;  %v863_v29 = vld [vmem:[#allocation8 + $0x880] sm:$0xff]  ;;  %p4365_p9 = pneg %p4364_p7  ;;  %p4370_p11 = scmp.lt.s32.totalorder %s4368_s16, %s4362_s5 }
 0x168   : > { %v868_v24 = vld [vmem:[#allocation8 + $0x8a8] sm:$0xff]  ;;  %v867_v31 = vld [vmem:[#allocation8 + $0x8a0] sm:$0xff]  ;;  %2954 = vmatpush1.bf16.msra.mxu1 %v2953_v21 }
 0x169   : > { %3016 = vmatprep.subr.bf16.mxu0 %v3015_v17  ;;  %v2955_v26 = vpack.c.bf16 %v868_v24, %v864_v23  ;;  %v992_v27 = vld [vmem:[#allocation8 + $0xc88] sm:$0xff]  ;;  %v991_v32 = vld [vmem:[#allocation8 + $0xc80] sm:$0xff]  ;;  %v2957_v34 = vpack.c.bf16 %v867_v31, %v863_v29  ;;  %p4371_p4 = por %p4370_p11, %p4369_p13 }
 0x16a   : > { %v996_v28 = vld [vmem:[#allocation8 + $0xca8] sm:$0xff]  ;;  %v995_v33 = vld [vmem:[#allocation8 + $0xca0] sm:$0xff]  ;;  %3018 = vmatpush1.bf16.msra.mxu0 %v3017_v25 }
 0x16b   : > { %v3019_v30 = vpack.c.bf16 %v996_v28, %v992_v27  ;;  %v872_v35 = vld [vmem:[#allocation8 + $0x8c8] sm:$0xff]  ;;  %2956 = vmatprep.subr.bf16.mxu1 %v2955_v26  ;;  %v3021_v38 = vpack.c.bf16 %v995_v33, %v991_v32  ;;  %v871_v41 = vld [vmem:[#allocation8 + $0x8c0] sm:$0xff]  ;;  %p4372_p1 = pnand %p4371_p4, %p4365_p9 }
 0x16c   : > { %v876_v36 = vld [vmem:[#allocation8 + $0x8e8] sm:$0xff]  ;;  %v875_v42 = vld [vmem:[#allocation8 + $0x8e0] sm:$0xff]  ;;  %2958 = vmatpush1.bf16.msra.mxu1 %v2957_v34 }
 0x16d   : > { %v1000_v37 = vld [vmem:[#allocation8 + $0xcc8] sm:$0xff]  ;;  %v2959_v39 = vpack.c.bf16 %v876_v36, %v872_v35  ;;  %3020 = vmatprep.subr.bf16.mxu0 %v3019_v30  ;;  %v999_v44 = vld [vmem:[#allocation8 + $0xcc0] sm:$0xff]  ;;  %v2961_v50 = vpack.c.bf16 %v875_v42, %v871_v41 }
 0x16e   : > { %v1004_v40 = vld [vmem:[#allocation8 + $0xce8] sm:$0xff]  ;;  %v1003_v45 = vld [vmem:[#allocation8 + $0xce0] sm:$0xff]  ;;  %3022 = vmatpush1.bf16.msra.mxu0 %v3021_v38 }
 0x16f   : > { %v3023_v43 = vpack.c.bf16 %v1004_v40, %v1000_v37  ;;  %v880_v46 = vld [vmem:[#allocation8 + $0x908] sm:$0xff]  ;;  %2960 = vmatprep.subr.bf16.mxu1 %v2959_v39  ;;  %v3025_v51 = vpack.c.bf16 %v1003_v45, %v999_v44  ;;  %v879_v53 = vld [vmem:[#allocation8 + $0x900] sm:$0xff] }
 0x170   : > { %v884_v47 = vld [vmem:[#allocation8 + $0x928] sm:$0xff]  ;;  %v883_v54 = vld [vmem:[#allocation8 + $0x920] sm:$0xff]  ;;  %2962 = vmatpush1.bf16.msra.mxu1 %v2961_v50 }
 0x171   : > { %v1008_v48 = vld [vmem:[#allocation8 + $0xd08] sm:$0xff]  ;;  %v2963_v52 = vpack.c.bf16 %v884_v47, %v880_v46  ;;  %v1007_v55 = vld [vmem:[#allocation8 + $0xd00] sm:$0xff]  ;;  %3024 = vmatprep.subr.bf16.mxu0 %v3023_v43  ;;  %v2965_v62 = vpack.c.bf16 %v883_v54, %v879_v53 }
 0x172   : > { %v1012_v49 = vld [vmem:[#allocation8 + $0xd28] sm:$0xff]  ;;  %v1011_v57 = vld [vmem:[#allocation8 + $0xd20] sm:$0xff]  ;;  %3026 = vmatpush1.bf16.msra.mxu0 %v3025_v51 }
 0x173   : > { %v3027_v56 = vpack.c.bf16 %v1012_v49, %v1008_v48  ;;  %v888_v58 = vld [vmem:[#allocation8 + $0x948] sm:$0xff]  ;;  %2964 = vmatprep.subr.bf16.mxu1 %v2963_v52  ;;  %v3029_v63 = vpack.c.bf16 %v1011_v57, %v1007_v55  ;;  %v887_v1 = vld [vmem:[#allocation8 + $0x940] sm:$0xff] }
 0x174   : > { %v892_v59 = vld [vmem:[#allocation8 + $0x968] sm:$0xff]  ;;  %v891_v2 = vld [vmem:[#allocation8 + $0x960] sm:$0xff]  ;;  %2966 = vmatpush1.bf16.msra.mxu1 %v2965_v62 }
 0x175   : > { %v1016_v60 = vld [vmem:[#allocation8 + $0xd48] sm:$0xff]  ;;  %v2967_v0 = vpack.c.bf16 %v892_v59, %v888_v58  ;;  %v1015_v3 = vld [vmem:[#allocation8 + $0xd40] sm:$0xff]  ;;  %3028 = vmatprep.subr.bf16.mxu0 %v3027_v56  ;;  %v2969_v10 = vpack.c.bf16 %v891_v2, %v887_v1 }
 0x176   : > { %v1020_v61 = vld [vmem:[#allocation8 + $0xd68] sm:$0xff]  ;;  %v1019_v5 = vld [vmem:[#allocation8 + $0xd60] sm:$0xff]  ;;  %3030 = vmatpush1.bf16.msra.mxu0 %v3029_v63 }
 0x177   : > { %v3031_v4 = vpack.c.bf16 %v1020_v61, %v1016_v60  ;;  %v896_v6 = vld [vmem:[#allocation8 + $0x988] sm:$0xff]  ;;  %2968 = vmatprep.subr.bf16.mxu1 %v2967_v0  ;;  %v3033_v11 = vpack.c.bf16 %v1019_v5, %v1015_v3  ;;  %v895_v13 = vld [vmem:[#allocation8 + $0x980] sm:$0xff] }
 0x178   : > { %v900_v7 = vld [vmem:[#allocation8 + $0x9a8] sm:$0xff]  ;;  %v899_v14 = vld [vmem:[#allocation8 + $0x9a0] sm:$0xff]  ;;  %2970 = vmatpush1.bf16.msra.mxu1 %v2969_v10 }
 0x179   : > { %v1024_v8 = vld [vmem:[#allocation8 + $0xd88] sm:$0xff]  ;;  %v2971_v12 = vpack.c.bf16 %v900_v7, %v896_v6  ;;  %v1023_v15 = vld [vmem:[#allocation8 + $0xd80] sm:$0xff]  ;;  %3032 = vmatprep.subr.bf16.mxu0 %v3031_v4  ;;  %v2973_v22 = vpack.c.bf16 %v899_v14, %v895_v13 }
 0x17a   : > { %v1028_v9 = vld [vmem:[#allocation8 + $0xda8] sm:$0xff]  ;;  %v1027_v17 = vld [vmem:[#allocation8 + $0xda0] sm:$0xff]  ;;  %3034 = vmatpush1.bf16.msra.mxu0 %v3033_v11 }
 0x17b   : > { %v3035_v16 = vpack.c.bf16 %v1028_v9, %v1024_v8  ;;  %v904_v18 = vld [vmem:[#allocation8 + $0x9c8] sm:$0xff]  ;;  %2972 = vmatprep.subr.bf16.mxu1 %v2971_v12  ;;  %v3037_v23 = vpack.c.bf16 %v1027_v17, %v1023_v15  ;;  %v903_v25 = vld [vmem:[#allocation8 + $0x9c0] sm:$0xff] }
 0x17c   : > { %v908_v19 = vld [vmem:[#allocation8 + $0x9e8] sm:$0xff]  ;;  %v907_v26 = vld [vmem:[#allocation8 + $0x9e0] sm:$0xff]  ;;  %2974 = vmatpush1.bf16.msra.mxu1 %v2973_v22 }
 0x17d   : > { %v1032_v20 = vld [vmem:[#allocation8 + $0xdc8] sm:$0xff]  ;;  %v2975_v24 = vpack.c.bf16 %v908_v19, %v904_v18  ;;  %v1031_v27 = vld [vmem:[#allocation8 + $0xdc0] sm:$0xff]  ;;  %3036 = vmatprep.subr.bf16.mxu0 %v3035_v16  ;;  %v2977_v34 = vpack.c.bf16 %v907_v26, %v903_v25  ;;  %v4914_v19 = vld [vmem:[%s4885_s24 + $0x18] sm:$0xff] }
 0x17e   : > { %v1036_v21 = vld [vmem:[#allocation8 + $0xde8] sm:$0xff]  ;;  %v1035_v29 = vld [vmem:[#allocation8 + $0xde0] sm:$0xff]  ;;  %3038 = vmatpush1.bf16.msra.mxu0 %v3037_v23  ;;  %1238 = vmatprep.mubr.f32.mxu0 %v4914_v19 }
 0x17f   : > { %v3039_v28 = vpack.c.bf16 %v1036_v21, %v1032_v20  ;;  %v912_v30 = vld [vmem:[#allocation8 + $0xa08] sm:$0xff]  ;;  %2976 = vmatprep.subr.bf16.mxu1 %v2975_v24  ;;  %v3041_v35 = vpack.c.bf16 %v1035_v29, %v1031_v27  ;;  %v911_v37 = vld [vmem:[#allocation8 + $0xa00] sm:$0xff] }
 0x180   : > { %v916_v31 = vld [vmem:[#allocation8 + $0xa28] sm:$0xff]  ;;  %v915_v38 = vld [vmem:[#allocation8 + $0xa20] sm:$0xff]  ;;  %2978 = vmatpush1.bf16.msra.mxu1 %v2977_v34 }
 0x181   : > { %v1040_v32 = vld [vmem:[#allocation8 + $0xe08] sm:$0xff]  ;;  %v2979_v36 = vpack.c.bf16 %v916_v31, %v912_v30  ;;  %v1039_v39 = vld [vmem:[#allocation8 + $0xe00] sm:$0xff]  ;;  %3040 = vmatprep.subr.bf16.mxu0 %v3039_v28  ;;  %v2981_v46 = vpack.c.bf16 %v915_v38, %v911_v37 }
 0x182   : > { %v1044_v33 = vld [vmem:[#allocation8 + $0xe28] sm:$0xff]  ;;  %v1043_v41 = vld [vmem:[#allocation8 + $0xe20] sm:$0xff]  ;;  %3042 = vmatpush1.bf16.msra.mxu0 %v3041_v35 }
 0x183   : > { %v3043_v40 = vpack.c.bf16 %v1044_v33, %v1040_v32  ;;  %v920_v42 = vld [vmem:[#allocation8 + $0xa48] sm:$0xff]  ;;  %2980 = vmatprep.subr.bf16.mxu1 %v2979_v36  ;;  %v3045_v47 = vpack.c.bf16 %v1043_v41, %v1039_v39  ;;  %v919_v49 = vld [vmem:[#allocation8 + $0xa40] sm:$0xff] }
 0x184   : > { %v924_v43 = vld [vmem:[#allocation8 + $0xa68] sm:$0xff]  ;;  %v923_v50 = vld [vmem:[#allocation8 + $0xa60] sm:$0xff]  ;;  %2982 = vmatpush1.bf16.msra.mxu1 %v2981_v46 }
 0x185   : > { %v1048_v44 = vld [vmem:[#allocation8 + $0xe48] sm:$0xff]  ;;  %v2983_v48 = vpack.c.bf16 %v924_v43, %v920_v42  ;;  %v1047_v51 = vld [vmem:[#allocation8 + $0xe40] sm:$0xff]  ;;  %3044 = vmatprep.subr.bf16.mxu0 %v3043_v40  ;;  %v2985_v58 = vpack.c.bf16 %v923_v50, %v919_v49 }
 0x186   : > { %v1052_v45 = vld [vmem:[#allocation8 + $0xe68] sm:$0xff]  ;;  %v1051_v53 = vld [vmem:[#allocation8 + $0xe60] sm:$0xff]  ;;  %3046 = vmatpush1.bf16.msra.mxu0 %v3045_v47 }
 0x187   : > { %v3047_v52 = vpack.c.bf16 %v1052_v45, %v1048_v44  ;;  %v928_v54 = vld [vmem:[#allocation8 + $0xa88] sm:$0xff]  ;;  %2984 = vmatprep.subr.bf16.mxu1 %v2983_v48  ;;  %v3049_v59 = vpack.c.bf16 %v1051_v53, %v1047_v51  ;;  %v927_v61 = vld [vmem:[#allocation8 + $0xa80] sm:$0xff] }
 0x188   : > { %v932_v55 = vld [vmem:[#allocation8 + $0xaa8] sm:$0xff]  ;;  %v931_v62 = vld [vmem:[#allocation8 + $0xaa0] sm:$0xff]  ;;  %2986 = vmatpush1.bf16.msra.mxu1 %v2985_v58 }
 0x189   : > { %v1056_v56 = vld [vmem:[#allocation8 + $0xe88] sm:$0xff]  ;;  %v2987_v60 = vpack.c.bf16 %v932_v55, %v928_v54  ;;  %v1055_v63 = vld [vmem:[#allocation8 + $0xe80] sm:$0xff]  ;;  %3048 = vmatprep.subr.bf16.mxu0 %v3047_v52  ;;  %v2989_v6 = vpack.c.bf16 %v931_v62, %v927_v61 }
 0x18a   : > { %v1060_v57 = vld [vmem:[#allocation8 + $0xea8] sm:$0xff]  ;;  %v1059_v1 = vld [vmem:[#allocation8 + $0xea0] sm:$0xff]  ;;  %3050 = vmatpush1.bf16.msra.mxu0 %v3049_v59 }
 0x18b   : > { %v3051_v0 = vpack.c.bf16 %v1060_v57, %v1056_v56  ;;  %v936_v2 = vld [vmem:[#allocation8 + $0xac8] sm:$0xff]  ;;  %v935_v7 = vld [vmem:[#allocation8 + $0xac0] sm:$0xff]  ;;  %2988 = vmatprep.subr.bf16.mxu1 %v2987_v60  ;;  %v3053_v8 = vpack.c.bf16 %v1059_v1, %v1055_v63  ;;  %v854_v1 = vld [vmem:[#allocation8 + $0x838] sm:$0xff] }
 0x18c   : > { %v940_v3 = vld [vmem:[#allocation8 + $0xae8] sm:$0xff]  ;;  %v939_v10 = vld [vmem:[#allocation8 + $0xae0] sm:$0xff]  ;;  %2990 = vmatpush1.bf16.msra.mxu1 %v2989_v6 }
 0x18d   : > { %v1064_v4 = vld [vmem:[#allocation8 + $0xec8] sm:$0xff]  ;;  %v2991_v9 = vpack.c.bf16 %v940_v3, %v936_v2  ;;  %v1063_v11 = vld [vmem:[#allocation8 + $0xec0] sm:$0xff]  ;;  %3052 = vmatprep.subr.bf16.mxu0 %v3051_v0  ;;  %v2993_v20 = vpack.c.bf16 %v939_v10, %v935_v7  ;;  %v850_v0 = vld [vmem:[#allocation8 + $0x818] sm:$0xff] }
 0x18e   : > { %v1068_v5 = vld [vmem:[#allocation8 + $0xee8] sm:$0xff]  ;;  %v1067_v12 = vld [vmem:[#allocation8 + $0xee0] sm:$0xff]  ;;  %3054 = vmatpush1.bf16.msra.mxu0 %v3053_v8  ;;  %v3075_v6 = vpack.c.bf16 %v854_v1, %v850_v0  ;;  %v849_v7 = vld [vmem:[#allocation8 + $0x810] sm:$0xff] }
 0x18f   : > { %v3055_v13 = vpack.c.bf16 %v1068_v5, %v1064_v4  ;;  %v944_v14 = vld [vmem:[#allocation8 + $0xb08] sm:$0xff]  ;;  %2992 = vmatprep.subr.bf16.mxu1 %v2991_v9  ;;  %v3057_v21 = vpack.c.bf16 %v1067_v12, %v1063_v11  ;;  %v943_v23 = vld [vmem:[#allocation8 + $0xb00] sm:$0xff]  ;;  %v853_v8 = vld [vmem:[#allocation8 + $0x830] sm:$0xff] }
 0x190   : > { %v948_v15 = vld [vmem:[#allocation8 + $0xb28] sm:$0xff]  ;;  %v947_v24 = vld [vmem:[#allocation8 + $0xb20] sm:$0xff]  ;;  %2994 = vmatpush1.bf16.msra.mxu1 %v2993_v20  ;;  %v858_v12 = vld [vmem:[#allocation8 + $0x858] sm:$0xff]  ;;  %v3077_v20 = vpack.c.bf16 %v853_v8, %v849_v7 }
 0x191   : > { %v4910_v16 = vld [vmem:[%s4885_s24 + $0x8] sm:$0xff]  ;;  %v2995_v22 = vpack.c.bf16 %v948_v15, %v944_v14  ;;  %v1071_v25 = vld [vmem:[#allocation8 + $0xf00] sm:$0xff]  ;;  %3056 = vmatprep.subr.bf16.mxu0 %v3055_v13  ;;  %v2997_v32 = vpack.c.bf16 %v947_v24, %v943_v23  ;;  %v862_v13 = vld [vmem:[#allocation8 + $0x878] sm:$0xff] }
 0x192   : > { %v1072_v17 = vld [vmem:[#allocation8 + $0xf08] sm:$0xff]  ;;  %1167 = vmatprep.mubr.f32.mxu1 %v4910_v16  ;;  %v1075_v27 = vld [vmem:[#allocation8 + $0xf20] sm:$0xff]  ;;  %3058 = vmatpush1.bf16.msra.mxu0 %v3057_v21  ;;  %v857_v23 = vld [vmem:[#allocation8 + $0x850] sm:$0xff] }
 0x193   : > { %v1076_v18 = vld [vmem:[#allocation8 + $0xf28] sm:$0xff]  ;;  %2996 = vmatprep.subr.bf16.mxu1 %v2995_v22  ;;  %v3061_v33 = vpack.c.bf16 %v1075_v27, %v1071_v25  ;;  %v951_v35 = vld [vmem:[#allocation8 + $0xb40] sm:$0xff]  ;;  %v3079_v22 = vpack.c.bf16 %v862_v13, %v858_v12  ;;  %v861_v24 = vld [vmem:[#allocation8 + $0x870] sm:$0xff] }
 0x194   : > { %v3059_v26 = vpack.c.bf16 %v1076_v18, %v1072_v17  ;;  %v952_v28 = vld [vmem:[#allocation8 + $0xb48] sm:$0xff]  ;;  %v955_v36 = vld [vmem:[#allocation8 + $0xb60] sm:$0xff]  ;;  %2998 = vmatpush1.bf16.msra.mxu1 %v2997_v32  ;;  %v844_v18 = vld [vmem:[%s4885_s24 + $0x10] sm:$0xff]  ;;  %v3081_v32 = vpack.c.bf16 %v861_v24, %v857_v23 }
 0x195   : > { %v956_v29 = vld [vmem:[#allocation8 + $0xb68] sm:$0xff]  ;;  %v1079_v37 = vld [vmem:[#allocation8 + $0xf40] sm:$0xff]  ;;  %v3001_v44 = vpack.c.bf16 %v955_v36, %v951_v35  ;;  %v865_v35 = vld [vmem:[#allocation8 + $0x890] sm:$0xff] }
 0x196   : > { %v1080_v30 = vld [vmem:[#allocation8 + $0xf48] sm:$0xff]  ;;  %v2999_v34 = vpack.c.bf16 %v956_v29, %v952_v28  ;;  %3060 = vmatprep.subr.bf16.mxu0 %v3059_v26  ;;  %v1083_v39 = vld [vmem:[#allocation8 + $0xf60] sm:$0xff]  ;;  %v866_v28 = vld [vmem:[#allocation8 + $0x898] sm:$0xff] }
 0x197   : > { %v1084_v31 = vld [vmem:[#allocation8 + $0xf68] sm:$0xff]  ;;  %3062 = vmatpush1.bf16.msra.mxu0 %v3061_v33  ;;  %v3065_v45 = vpack.c.bf16 %v1083_v39, %v1079_v37  ;;  %v959_v47 = vld [vmem:[#allocation8 + $0xb80] sm:$0xff]  ;;  %v870_v29 = vld [vmem:[#allocation8 + $0x8b8] sm:$0xff] }
 0x198   : > { %v3063_v38 = vpack.c.bf16 %v1084_v31, %v1080_v30  ;;  %v960_v40 = vld [vmem:[#allocation8 + $0xb88] sm:$0xff]  ;;  %3000 = vmatprep.subr.bf16.mxu1 %v2999_v34  ;;  %v963_v48 = vld [vmem:[#allocation8 + $0xba0] sm:$0xff]  ;;  %v3083_v34 = vpack.c.bf16 %v870_v29, %v866_v28  ;;  %v869_v36 = vld [vmem:[#allocation8 + $0x8b0] sm:$0xff] }
 0x199   : > { %v964_v41 = vld [vmem:[#allocation8 + $0xba8] sm:$0xff]  ;;  %v1087_v49 = vld [vmem:[#allocation8 + $0xf80] sm:$0xff]  ;;  %3002 = vmatpush1.bf16.msra.mxu1 %v3001_v44  ;;  %v3005_v56 = vpack.c.bf16 %v963_v48, %v959_v47  ;;  %v3085_v44 = vpack.c.bf16 %v869_v36, %v865_v35  ;;  %v873_v47 = vld [vmem:[#allocation8 + $0x8d0] sm:$0xff] }
 0x19a   : > { %v1088_v42 = vld [vmem:[#allocation8 + $0xf88] sm:$0xff]  ;;  %v3003_v46 = vpack.c.bf16 %v964_v41, %v960_v40  ;;  %3064 = vmatprep.subr.bf16.mxu0 %v3063_v38  ;;  %v1091_v51 = vld [vmem:[#allocation8 + $0xfa0] sm:$0xff]  ;;  %v874_v40 = vld [vmem:[#allocation8 + $0x8d8] sm:$0xff] }
 0x19b   : > { %v1092_v43 = vld [vmem:[#allocation8 + $0xfa8] sm:$0xff]  ;;  %3066 = vmatpush1.bf16.msra.mxu0 %v3065_v45  ;;  %v3069_v57 = vpack.c.bf16 %v1091_v51, %v1087_v49  ;;  %v967_v59 = vld [vmem:[#allocation8 + $0xbc0] sm:$0xff]  ;;  %v878_v41 = vld [vmem:[#allocation8 + $0x8f8] sm:$0xff] }
 0x19c   : > { %v3067_v50 = vpack.c.bf16 %v1092_v43, %v1088_v42  ;;  %v968_v52 = vld [vmem:[#allocation8 + $0xbc8] sm:$0xff]  ;;  %3004 = vmatprep.subr.bf16.mxu1 %v3003_v46  ;;  %v971_v60 = vld [vmem:[#allocation8 + $0xbe0] sm:$0xff]  ;;  %v3087_v46 = vpack.c.bf16 %v878_v41, %v874_v40  ;;  %v877_v48 = vld [vmem:[#allocation8 + $0x8f0] sm:$0xff] }
 0x19d   : > { %v972_v53 = vld [vmem:[#allocation8 + $0xbe8] sm:$0xff]  ;;  %v1095_v61 = vld [vmem:[#allocation8 + $0xfc0] sm:$0xff]  ;;  %3006 = vmatpush1.bf16.msra.mxu1 %v3005_v56  ;;  %v3009_v4 = vpack.c.bf16 %v971_v60, %v967_v59  ;;  %v885_v59 = vld [vmem:[#allocation8 + $0x930] sm:$0xff] }
 0x19e   : > { %v1096_v54 = vld [vmem:[#allocation8 + $0xfc8] sm:$0xff]  ;;  %v3007_v58 = vpack.c.bf16 %v972_v53, %v968_v52  ;;  %3068 = vmatprep.subr.bf16.mxu0 %v3067_v50  ;;  %v1099_v63 = vld [vmem:[#allocation8 + $0xfe0] sm:$0xff]  ;;  %v882_v52 = vld [vmem:[#allocation8 + $0x918] sm:$0xff] }
 0x19f   : > { %v1100_v55 = vld [vmem:[#allocation8 + $0xfe8] sm:$0xff]  ;;  %3070 = vmatpush1.bf16.msra.mxu0 %v3069_v57  ;;  %v3073_v5 = vpack.c.bf16 %v1099_v63, %v1095_v61  ;;  %v586_v9 = vld [vmem:[#allocation8] sm:$0xff]  ;;  %v886_v53 = vld [vmem:[#allocation8 + $0x938] sm:$0xff] }
 0x1a0   : > { %v3071_v62 = vpack.c.bf16 %v1100_v55, %v1096_v54  ;;  %v587_v2 = vld [vmem:[#allocation8 + $0x8] sm:$0xff]  ;;  %3008 = vmatprep.subr.bf16.mxu1 %v3007_v58  ;;  %v590_v11 = vld [vmem:[#allocation8 + $0x20] sm:$0xff]  ;;  %v3091_v57 = vpack.c.bf16 %v886_v53, %v882_v52  ;;  %v881_v58 = vld [vmem:[#allocation8 + $0x910] sm:$0xff] }
 0x1a1   : > { %v591_v3 = vld [vmem:[#allocation8 + $0x28] sm:$0xff]  ;;  %3010 = vmatpush1.bf16.msra.mxu1 %v3009_v4  ;;  %v4918_v17 = vld [vmem:[%s4885_s24] sm:$0xff]  ;;  %v3205_v21 = vpack.c.bf16 %v590_v11, %v586_v9  ;;  %v890_v63 = vld [vmem:[#allocation8 + $0x958] sm:$0xff] }
 0x1a2   : > { %3072 = vmatprep.subr.bf16.mxu0 %v3071_v62  ;;  %v3203_v10 = vpack.c.bf16 %v591_v3, %v587_v2  ;;  %v595_v14 = vld [vmem:[#allocation8 + $0x48] sm:$0xff]  ;;  %3076 = vmatprep.subr.bf16.mxu1 %v3075_v6  ;;  %v594_v25 = vld [vmem:[#allocation8 + $0x40] sm:$0xff]  ;;  %v894_v0 = vld [vmem:[#allocation8 + $0x978] sm:$0xff]  ;;  %v3093_v3 = vpack.c.bf16 %v885_v59, %v881_v58 }
 0x1a3   : > { %v599_v15 = vld [vmem:[#allocation8 + $0x68] sm:$0xff]  ;;  %3074 = vmatpush1.bf16.msra.mxu0 %v3073_v5  ;;  %v598_v27 = vld [vmem:[#allocation8 + $0x60] sm:$0xff]  ;;  %v3095_v5 = vpack.c.bf16 %v894_v0, %v890_v63  ;;  %v889_v6 = vld [vmem:[#allocation8 + $0x950] sm:$0xff] }
 0x1a4   : > { %3204 = vmatprep.subr.bf16.mxu0 %v3203_v10  ;;  %v3207_v26 = vpack.c.bf16 %v599_v15, %v595_v14  ;;  %1168 = vmatmul.mubr.f32.vlgmr.msra.gmra.mrb[0].mxu1 %v4918_v17  ;;  %v603_v30 = vld [vmem:[#allocation8 + $0x88] sm:$0xff]  ;;  %v3209_v33 = vpack.c.bf16 %v598_v27, %v594_v25  ;;  %v602_v37 = vld [vmem:[#allocation8 + $0x80] sm:$0xff]  ;;  %v893_v7 = vld [vmem:[#allocation8 + $0x970] sm:$0xff] }
 0x1a5   : > { %v607_v31 = vld [vmem:[#allocation8 + $0xa8] sm:$0xff]  ;;  %3078 = vmatpush1.bf16.msra.mxu1 %v3077_v20  ;;  %v606_v39 = vld [vmem:[#allocation8 + $0xa0] sm:$0xff]  ;;  %1309 = vmatprep.mubr.f32.mxu1 %v4910_v16  ;;  %v3089_v16 = vpack.c.bf16 %v877_v48, %v873_v47  ;;  %v898_v11 = vld [vmem:[#allocation8 + $0x998] sm:$0xff]  ;;  %v3097_v15 = vpack.c.bf16 %v893_v7, %v889_v6 }
 0x1a6   : > { %1239 = vmatmul.mubr.f32.vlgmr.msra.gmra.mrb[0].mxu0 %v844_v18  ;;  %3080 = vmatprep.subr.bf16.mxu1 %v3079_v22  ;;  %v3211_v38 = vpack.c.bf16 %v607_v31, %v603_v30  ;;  %v611_v42 = vld [vmem:[#allocation8 + $0xc8] sm:$0xff]  ;;  %v3213_v45 = vpack.c.bf16 %v606_v39, %v602_v37  ;;  %v610_v49 = vld [vmem:[#allocation8 + $0xc0] sm:$0xff]  ;;  %v902_v12 = vld [vmem:[#allocation8 + $0x9b8] sm:$0xff] }
 0x1a7   : > { %3206 = vmatpush1.bf16.msra.mxu0 %v3205_v21  ;;  %v615_v43 = vld [vmem:[#allocation8 + $0xe8] sm:$0xff]  ;;  %v614_v51 = vld [vmem:[#allocation8 + $0xe0] sm:$0xff]  ;;  %v3099_v20 = vpack.c.bf16 %v902_v12, %v898_v11  ;;  %v897_v21 = vld [vmem:[#allocation8 + $0x990] sm:$0xff] }
 0x1a8   : > { %3208 = vmatprep.subr.bf16.mxu0 %v3207_v26  ;;  %v3215_v50 = vpack.c.bf16 %v615_v43, %v611_v42  ;;  %v619_v54 = vld [vmem:[#allocation8 + $0x108] sm:$0xff]  ;;  %v3217_v56 = vpack.c.bf16 %v614_v51, %v610_v49  ;;  %v618_v60 = vld [vmem:[#allocation8 + $0x100] sm:$0xff]  ;;  %v901_v22 = vld [vmem:[#allocation8 + $0x9b0] sm:$0xff] }
 0x1a9   : > { %3082 = vmatpush1.bf16.msra.mxu1 %v3081_v32  ;;  %v623_v55 = vld [vmem:[#allocation8 + $0x128] sm:$0xff]  ;;  %v622_v62 = vld [vmem:[#allocation8 + $0x120] sm:$0xff]  ;;  %v906_v26 = vld [vmem:[#allocation8 + $0x9d8] sm:$0xff]  ;;  %v3101_v31 = vpack.c.bf16 %v901_v22, %v897_v21 }
 0x1aa   : > { %3084 = vmatprep.subr.bf16.mxu1 %v3083_v34  ;;  %v3219_v61 = vpack.c.bf16 %v623_v55, %v619_v54  ;;  %v627_v1 = vld [vmem:[#allocation8 + $0x148] sm:$0xff]  ;;  %v3221_v4 = vpack.c.bf16 %v622_v62, %v618_v60  ;;  %v626_v8 = vld [vmem:[#allocation8 + $0x140] sm:$0xff]  ;;  %v910_v27 = vld [vmem:[#allocation8 + $0x9f8] sm:$0xff] }
 0x1ab   : > { %3210 = vmatpush1.bf16.msra.mxu0 %v3209_v33  ;;  %v631_v2 = vld [vmem:[#allocation8 + $0x168] sm:$0xff]  ;;  %v630_v10 = vld [vmem:[#allocation8 + $0x160] sm:$0xff]  ;;  %v3103_v33 = vpack.c.bf16 %v910_v27, %v906_v26  ;;  %v905_v34 = vld [vmem:[#allocation8 + $0x9d0] sm:$0xff] }
 0x1ac   : > { %3212 = vmatprep.subr.bf16.mxu0 %v3211_v38  ;;  %v3223_v9 = vpack.c.bf16 %v631_v2, %v627_v1  ;;  %v635_v13 = vld [vmem:[#allocation8 + $0x188] sm:$0xff]  ;;  %v3225_v18 = vpack.c.bf16 %v630_v10, %v626_v8  ;;  %v634_v23 = vld [vmem:[#allocation8 + $0x180] sm:$0xff]  ;;  %v909_v35 = vld [vmem:[#allocation8 + $0x9f0] sm:$0xff] }
 0x1ad   : > { %3086 = vmatpush1.bf16.msra.mxu1 %v3085_v44  ;;  %v639_v14 = vld [vmem:[#allocation8 + $0x1a8] sm:$0xff]  ;;  %v638_v25 = vld [vmem:[#allocation8 + $0x1a0] sm:$0xff]  ;;  %v914_v39 = vld [vmem:[#allocation8 + $0xa18] sm:$0xff]  ;;  %v3105_v43 = vpack.c.bf16 %v909_v35, %v905_v34 }
 0x1ae   : > { %3088 = vmatprep.subr.bf16.mxu1 %v3087_v46  ;;  %v3227_v24 = vpack.c.bf16 %v639_v14, %v635_v13  ;;  %v643_v28 = vld [vmem:[#allocation8 + $0x1c8] sm:$0xff]  ;;  %v3229_v32 = vpack.c.bf16 %v638_v25, %v634_v23  ;;  %v642_v36 = vld [vmem:[#allocation8 + $0x1c0] sm:$0xff]  ;;  %v918_v40 = vld [vmem:[#allocation8 + $0xa38] sm:$0xff] }
 0x1af   : > { %3214 = vmatpush1.bf16.msra.mxu0 %v3213_v45  ;;  %v647_v29 = vld [vmem:[#allocation8 + $0x1e8] sm:$0xff]  ;;  %v646_v38 = vld [vmem:[#allocation8 + $0x1e0] sm:$0xff]  ;;  %v3107_v45 = vpack.c.bf16 %v918_v40, %v914_v39  ;;  %v913_v46 = vld [vmem:[#allocation8 + $0xa10] sm:$0xff] }
 0x1b0   : > { %3216 = vmatprep.subr.bf16.mxu0 %v3215_v50  ;;  %v4924_v30 = vld [vmem:[%s4878_s13 + $0x8] sm:$0xff]  ;;  %v3231_v37 = vpack.c.bf16 %v647_v29, %v643_v28  ;;  %v3233_v44 = vpack.c.bf16 %v646_v38, %v642_v36  ;;  %v917_v47 = vld [vmem:[#allocation8 + $0xa30] sm:$0xff]  ;;  %v650_v48 = vld [vmem:[#allocation8 + $0x200] sm:$0xff] }
 0x1b1   : > { %3090 = vmatpush1.bf16.msra.mxu1 %v3089_v16  ;;  %1451 = vmatprep.mubr.f32.mxu0 %v4924_v30  ;;  %v651_v41 = vld [vmem:[#allocation8 + $0x208] sm:$0xff]  ;;  %v654_v50 = vld [vmem:[#allocation8 + $0x220] sm:$0xff]  ;;  %v922_v51 = vld [vmem:[#allocation8 + $0xa58] sm:$0xff]  ;;  %v3109_v55 = vpack.c.bf16 %v917_v47, %v913_v46 }
 0x1b2   : > { %3092 = vmatprep.subr.bf16.mxu1 %v3091_v57  ;;  %v655_v42 = vld [vmem:[#allocation8 + $0x228] sm:$0xff]  ;;  %v926_v52 = vld [vmem:[#allocation8 + $0xa78] sm:$0xff]  ;;  %v3237_v16 = vpack.c.bf16 %v654_v50, %v650_v48  ;;  %v921_v57 = vld [vmem:[#allocation8 + $0xa50] sm:$0xff] }
 0x1b3   : > { %3218 = vmatpush1.bf16.msra.mxu0 %v3217_v56  ;;  %v3235_v49 = vpack.c.bf16 %v655_v42, %v651_v41  ;;  %v659_v53 = vld [vmem:[#allocation8 + $0x248] sm:$0xff]  ;;  %v3111_v56 = vpack.c.bf16 %v926_v52, %v922_v51  ;;  %v925_v58 = vld [vmem:[#allocation8 + $0xa70] sm:$0xff]  ;;  %v658_v59 = vld [vmem:[#allocation8 + $0x240] sm:$0xff] }
 0x1b4   : > { %3220 = vmatprep.subr.bf16.mxu0 %v3219_v61  ;;  %v663_v54 = vld [vmem:[#allocation8 + $0x268] sm:$0xff]  ;;  %v662_v61 = vld [vmem:[#allocation8 + $0x260] sm:$0xff]  ;;  %v930_v62 = vld [vmem:[#allocation8 + $0xa98] sm:$0xff]  ;;  %v3113_v2 = vpack.c.bf16 %v925_v58, %v921_v57 }
 0x1b5   : > { %3094 = vmatpush1.bf16.msra.mxu1 %v3093_v3  ;;  %v3239_v60 = vpack.c.bf16 %v663_v54, %v659_v53  ;;  %v934_v63 = vld [vmem:[#allocation8 + $0xab8] sm:$0xff]  ;;  %v667_v0 = vld [vmem:[#allocation8 + $0x288] sm:$0xff]  ;;  %v3241_v3 = vpack.c.bf16 %v662_v61, %v658_v59  ;;  %v933_v6 = vld [vmem:[#allocation8 + $0xab0] sm:$0xff] }
 0x1b6   : > { %3096 = vmatprep.subr.bf16.mxu1 %v3095_v5  ;;  %v671_v1 = vld [vmem:[#allocation8 + $0x2a8] sm:$0xff]  ;;  %v929_v5 = vld [vmem:[#allocation8 + $0xa90] sm:$0xff]  ;;  %v666_v7 = vld [vmem:[#allocation8 + $0x280] sm:$0xff] }
 0x1b7   : > { %3222 = vmatpush1.bf16.msra.mxu0 %v3221_v4  ;;  %v3115_v4 = vpack.c.bf16 %v934_v63, %v930_v62  ;;  %v3243_v8 = vpack.c.bf16 %v671_v1, %v667_v0  ;;  %v938_v10 = vld [vmem:[#allocation8 + $0xad8] sm:$0xff]  ;;  %v675_v12 = vld [vmem:[#allocation8 + $0x2c8] sm:$0xff]  ;;  %v3117_v14 = vpack.c.bf16 %v933_v6, %v929_v5  ;;  %v941_v21 = vld [vmem:[#allocation8 + $0xaf0] sm:$0xff] }
 0x1b8   : > { %3224 = vmatprep.subr.bf16.mxu0 %v3223_v9  ;;  %v670_v9 = vld [vmem:[#allocation8 + $0x2a0] sm:$0xff]  ;;  %v942_v11 = vld [vmem:[#allocation8 + $0xaf8] sm:$0xff]  ;;  %v679_v13 = vld [vmem:[#allocation8 + $0x2e8] sm:$0xff] }
 0x1b9   : > { %3098 = vmatpush1.bf16.msra.mxu1 %v3097_v15  ;;  %v3245_v15 = vpack.c.bf16 %v670_v9, %v666_v7  ;;  %v674_v22 = vld [vmem:[#allocation8 + $0x2c0] sm:$0xff]  ;;  %v3247_v23 = vpack.c.bf16 %v679_v13, %v675_v12  ;;  %v946_v25 = vld [vmem:[#allocation8 + $0xb18] sm:$0xff]  ;;  %v683_v27 = vld [vmem:[#allocation8 + $0x308] sm:$0xff] }
 0x1ba   : > { %3100 = vmatprep.subr.bf16.mxu1 %v3099_v20  ;;  %v937_v20 = vld [vmem:[#allocation8 + $0xad0] sm:$0xff]  ;;  %v950_v26 = vld [vmem:[#allocation8 + $0xb38] sm:$0xff]  ;;  %v687_v28 = vld [vmem:[#allocation8 + $0x328] sm:$0xff] }
 0x1bb   : > { %3226 = vmatpush1.bf16.msra.mxu0 %v3225_v18  ;;  %v3119_v18 = vpack.c.bf16 %v942_v11, %v938_v10  ;;  %v3121_v29 = vpack.c.bf16 %v941_v21, %v937_v20  ;;  %v949_v34 = vld [vmem:[#allocation8 + $0xb30] sm:$0xff]  ;;  %v682_v35 = vld [vmem:[#allocation8 + $0x300] sm:$0xff]  ;;  %v3251_v36 = vpack.c.bf16 %v687_v28, %v683_v27  ;;  %v954_v38 = vld [vmem:[#allocation8 + $0xb58] sm:$0xff] }
 0x1bc   : > { %3228 = vmatprep.subr.bf16.mxu0 %v3227_v24  ;;  %v678_v24 = vld [vmem:[#allocation8 + $0x2e0] sm:$0xff]  ;;  %v958_v39 = vld [vmem:[#allocation8 + $0xb78] sm:$0xff]  ;;  %v691_v40 = vld [vmem:[#allocation8 + $0x348] sm:$0xff] }
 0x1bd   : > { %3102 = vmatpush1.bf16.msra.mxu1 %v3101_v31  ;;  %v3249_v31 = vpack.c.bf16 %v678_v24, %v674_v22  ;;  %v695_v41 = vld [vmem:[#allocation8 + $0x368] sm:$0xff]  ;;  %v957_v46 = vld [vmem:[#allocation8 + $0xb70] sm:$0xff]  ;;  %v690_v47 = vld [vmem:[#allocation8 + $0x340] sm:$0xff] }
 0x1be   : > { %3104 = vmatprep.subr.bf16.mxu1 %v3103_v33  ;;  %v945_v33 = vld [vmem:[#allocation8 + $0xb10] sm:$0xff]  ;;  %v3255_v48 = vpack.c.bf16 %v695_v41, %v691_v40  ;;  %v962_v50 = vld [vmem:[#allocation8 + $0xb98] sm:$0xff]  ;;  %v699_v52 = vld [vmem:[#allocation8 + $0x388] sm:$0xff] }
 0x1bf   : > { %3230 = vmatpush1.bf16.msra.mxu0 %v3229_v32  ;;  %v3123_v32 = vpack.c.bf16 %v950_v26, %v946_v25  ;;  %v3125_v42 = vpack.c.bf16 %v949_v34, %v945_v33  ;;  %v966_v51 = vld [vmem:[#allocation8 + $0xbb8] sm:$0xff]  ;;  %v703_v53 = vld [vmem:[#allocation8 + $0x3a8] sm:$0xff]  ;;  %v965_v57 = vld [vmem:[#allocation8 + $0xbb0] sm:$0xff] }
 0x1c0   : > { %3232 = vmatprep.subr.bf16.mxu0 %v3231_v37  ;;  %v686_v37 = vld [vmem:[#allocation8 + $0x320] sm:$0xff]  ;;  %v3259_v59 = vpack.c.bf16 %v703_v53, %v699_v52  ;;  %v970_v61 = vld [vmem:[#allocation8 + $0xbd8] sm:$0xff]  ;;  %v707_v63 = vld [vmem:[#allocation8 + $0x3c8] sm:$0xff] }
 0x1c1   : > { %3106 = vmatpush1.bf16.msra.mxu1 %v3105_v43  ;;  %v3253_v43 = vpack.c.bf16 %v686_v37, %v682_v35  ;;  %v698_v58 = vld [vmem:[#allocation8 + $0x380] sm:$0xff]  ;;  %v974_v62 = vld [vmem:[#allocation8 + $0xbf8] sm:$0xff]  ;;  %v711_v0 = vld [vmem:[#allocation8 + $0x3e8] sm:$0xff] }
 0x1c2   : > { %3108 = vmatprep.subr.bf16.mxu1 %v3107_v45  ;;  %v953_v45 = vld [vmem:[#allocation8 + $0xb50] sm:$0xff]  ;;  %v706_v6 = vld [vmem:[#allocation8 + $0x3c0] sm:$0xff]  ;;  %v3263_v7 = vpack.c.bf16 %v711_v0, %v707_v63  ;;  %v978_v9 = vld [vmem:[#allocation8 + $0xc18] sm:$0xff] }
 0x1c3   : > { %3234 = vmatpush1.bf16.msra.mxu0 %v3233_v44  ;;  %v3127_v44 = vpack.c.bf16 %v958_v39, %v954_v38  ;;  %v3129_v54 = vpack.c.bf16 %v957_v46, %v953_v45  ;;  %v973_v5 = vld [vmem:[#allocation8 + $0xbf0] sm:$0xff]  ;;  %v982_v10 = vld [vmem:[#allocation8 + $0xc38] sm:$0xff]  ;;  %v715_v11 = vld [vmem:[#allocation8 + $0x408] sm:$0xff] }
 0x1c4   : > { %3236 = vmatprep.subr.bf16.mxu0 %v3235_v49  ;;  %v694_v49 = vld [vmem:[#allocation8 + $0x360] sm:$0xff]  ;;  %v719_v12 = vld [vmem:[#allocation8 + $0x428] sm:$0xff]  ;;  %v981_v20 = vld [vmem:[#allocation8 + $0xc30] sm:$0xff] }
 0x1c5   : > { %3110 = vmatpush1.bf16.msra.mxu1 %v3109_v55  ;;  %v3257_v55 = vpack.c.bf16 %v694_v49, %v690_v47  ;;  %v714_v21 = vld [vmem:[#allocation8 + $0x400] sm:$0xff]  ;;  %v3267_v22 = vpack.c.bf16 %v719_v12, %v715_v11  ;;  %v986_v24 = vld [vmem:[#allocation8 + $0xc58] sm:$0xff]  ;;  %v723_v26 = vld [vmem:[#allocation8 + $0x448] sm:$0xff] }
 0x1c6   : > { %3112 = vmatprep.subr.bf16.mxu1 %v3111_v56  ;;  %v961_v56 = vld [vmem:[#allocation8 + $0xb90] sm:$0xff]  ;;  %v990_v25 = vld [vmem:[#allocation8 + $0xc78] sm:$0xff]  ;;  %v727_v27 = vld [vmem:[#allocation8 + $0x468] sm:$0xff] }
 0x1c7   : > { %3238 = vmatpush1.bf16.msra.mxu0 %v3237_v16  ;;  %v3131_v16 = vpack.c.bf16 %v966_v51, %v962_v50  ;;  %v3133_v1 = vpack.c.bf16 %v965_v57, %v961_v56  ;;  %v985_v33 = vld [vmem:[#allocation8 + $0xc50] sm:$0xff]  ;;  %v722_v35 = vld [vmem:[#allocation8 + $0x440] sm:$0xff]  ;;  %v994_v38 = vld [vmem:[#allocation8 + $0xc98] sm:$0xff] }
 0x1c8   : > { %3240 = vmatprep.subr.bf16.mxu0 %v3239_v60  ;;  %v702_v60 = vld [vmem:[#allocation8 + $0x3a0] sm:$0xff]  ;;  %v989_v34 = vld [vmem:[#allocation8 + $0xc70] sm:$0xff]  ;;  %v998_v39 = vld [vmem:[#allocation8 + $0xcb8] sm:$0xff] }
 0x1c9   : > { %3114 = vmatpush1.bf16.msra.mxu1 %v3113_v2  ;;  %v3261_v2 = vpack.c.bf16 %v702_v60, %v698_v58  ;;  %v726_v37 = vld [vmem:[#allocation8 + $0x460] sm:$0xff]  ;;  %v731_v40 = vld [vmem:[#allocation8 + $0x488] sm:$0xff]  ;;  %v3147_v45 = vpack.c.bf16 %v998_v39, %v994_v38  ;;  %v993_v46 = vld [vmem:[#allocation8 + $0xc90] sm:$0xff] }
 0x1ca   : > { %3116 = vmatprep.subr.bf16.mxu1 %v3115_v4  ;;  %v969_v4 = vld [vmem:[#allocation8 + $0xbd0] sm:$0xff]  ;;  %v735_v41 = vld [vmem:[#allocation8 + $0x4a8] sm:$0xff]  ;;  %v734_v50 = vld [vmem:[#allocation8 + $0x4a0] sm:$0xff] }
 0x1cb   : > { %3242 = vmatpush1.bf16.msra.mxu0 %v3241_v3  ;;  %v3135_v3 = vpack.c.bf16 %v974_v62, %v970_v61  ;;  %v3137_v13 = vpack.c.bf16 %v973_v5, %v969_v4  ;;  %v997_v47 = vld [vmem:[#allocation8 + $0xcb0] sm:$0xff]  ;;  %v3275_v49 = vpack.c.bf16 %v735_v41, %v731_v40  ;;  %v1002_v51 = vld [vmem:[#allocation8 + $0xcd8] sm:$0xff]  ;;  %v743_v53 = vld [vmem:[#allocation8 + $0x4e8] sm:$0xff] }
 0x1cc   : > { %3244 = vmatprep.subr.bf16.mxu0 %v3243_v8  ;;  %v710_v8 = vld [vmem:[#allocation8 + $0x3e0] sm:$0xff]  ;;  %v1006_v52 = vld [vmem:[#allocation8 + $0xcf8] sm:$0xff]  ;;  %v1001_v56 = vld [vmem:[#allocation8 + $0xcd0] sm:$0xff] }
 0x1cd   : > { %3118 = vmatpush1.bf16.msra.mxu1 %v3117_v14  ;;  %v3265_v14 = vpack.c.bf16 %v710_v8, %v706_v6  ;;  %v1005_v57 = vld [vmem:[#allocation8 + $0xcf0] sm:$0xff]  ;;  %v738_v58 = vld [vmem:[#allocation8 + $0x4c0] sm:$0xff]  ;;  %v1010_v61 = vld [vmem:[#allocation8 + $0xd18] sm:$0xff] }
 0x1ce   : > { %3120 = vmatprep.subr.bf16.mxu1 %v3119_v18  ;;  %v977_v18 = vld [vmem:[#allocation8 + $0xc10] sm:$0xff]  ;;  %v742_v60 = vld [vmem:[#allocation8 + $0x4e0] sm:$0xff]  ;;  %v1014_v62 = vld [vmem:[#allocation8 + $0xd38] sm:$0xff] }
 0x1cf   : > { %3246 = vmatpush1.bf16.msra.mxu0 %v3245_v15  ;;  %v3139_v15 = vpack.c.bf16 %v982_v10, %v978_v9  ;;  %v3141_v28 = vpack.c.bf16 %v981_v20, %v977_v18  ;;  %v747_v63 = vld [vmem:[#allocation8 + $0x508] sm:$0xff]  ;;  %v1013_v4 = vld [vmem:[#allocation8 + $0xd30] sm:$0xff]  ;;  %v746_v5 = vld [vmem:[#allocation8 + $0x500] sm:$0xff] }
 0x1d0   : > { %3248 = vmatprep.subr.bf16.mxu0 %v3247_v23  ;;  %v718_v23 = vld [vmem:[#allocation8 + $0x420] sm:$0xff]  ;;  %v751_v0 = vld [vmem:[#allocation8 + $0x528] sm:$0xff]  ;;  %v1018_v8 = vld [vmem:[#allocation8 + $0xd58] sm:$0xff] }
 0x1d1   : > { %3122 = vmatpush1.bf16.msra.mxu1 %v3121_v29  ;;  %v582_v29 = vld [vmem:[%s4878_s13] sm:$0xff]  ;;  %v3283_v6 = vpack.c.bf16 %v751_v0, %v747_v63  ;;  %v1022_v9 = vld [vmem:[#allocation8 + $0xd78] sm:$0xff]  ;;  %v755_v10 = vld [vmem:[#allocation8 + $0x548] sm:$0xff] }
 0x1d2   : > { %3124 = vmatprep.subr.bf16.mxu1 %v3123_v32  ;;  %v3143_v32 = vpack.c.bf16 %v990_v25, %v986_v24  ;;  %v759_v11 = vld [vmem:[#allocation8 + $0x568] sm:$0xff]  ;;  %v1021_v18 = vld [vmem:[#allocation8 + $0xd70] sm:$0xff]  ;;  %v754_v20 = vld [vmem:[#allocation8 + $0x540] sm:$0xff] }
 0x1d3   : > { %3250 = vmatpush1.bf16.msra.mxu0 %v3249_v31  ;;  %v3269_v31 = vpack.c.bf16 %v718_v23, %v714_v21  ;;  %v3287_v21 = vpack.c.bf16 %v759_v11, %v755_v10  ;;  %v1026_v23 = vld [vmem:[#allocation8 + $0xd98] sm:$0xff]  ;;  %v763_v25 = vld [vmem:[#allocation8 + $0x588] sm:$0xff] }
 0x1d4   : > { %3252 = vmatprep.subr.bf16.mxu0 %v3251_v36  ;;  %v3271_v36 = vpack.c.bf16 %v727_v27, %v723_v26  ;;  %v1030_v24 = vld [vmem:[#allocation8 + $0xdb8] sm:$0xff]  ;;  %v767_v26 = vld [vmem:[#allocation8 + $0x5a8] sm:$0xff] }
 0x1d5   : > { %3126 = vmatpush1.bf16.msra.mxu1 %v3125_v42  ;;  %v3145_v42 = vpack.c.bf16 %v989_v34, %v985_v33  ;;  %v762_v33 = vld [vmem:[#allocation8 + $0x580] sm:$0xff]  ;;  %v3291_v34 = vpack.c.bf16 %v767_v26, %v763_v25  ;;  %v771_v38 = vld [vmem:[#allocation8 + $0x5c8] sm:$0xff] }
 0x1d6   : > { %3128 = vmatprep.subr.bf16.mxu1 %v3127_v44  ;;  %v3273_v44 = vpack.c.bf16 %v726_v37, %v722_v35  ;;  %v766_v35 = vld [vmem:[#allocation8 + $0x5a0] sm:$0xff]  ;;  %v1038_v37 = vld [vmem:[#allocation8 + $0xdf8] sm:$0xff]  ;;  %v775_v39 = vld [vmem:[#allocation8 + $0x5e8] sm:$0xff] }
 0x1d7   : > { %3254 = vmatpush1.bf16.msra.mxu0 %v3253_v43  ;;  %v585_v43 = vld [vmem:[%s4878_s13 + $0x18] sm:$0xff]  ;;  %v3293_v41 = vpack.c.bf16 %v766_v35, %v762_v33  ;;  %v811_v35 = vld [vmem:[#allocation8 + $0x708] sm:$0xff] }
 0x1d8   : > { %3256 = vmatprep.subr.bf16.mxu0 %v3255_v48  ;;  %v730_v48 = vld [vmem:[#allocation8 + $0x480] sm:$0xff]  ;;  %v1074_v33 = vld [vmem:[#allocation8 + $0xf18] sm:$0xff] }
 0x1d9   : > { %3130 = vmatpush1.bf16.msra.mxu1 %v3129_v54  ;;  %v3149_v54 = vpack.c.bf16 %v997_v47, %v993_v46  ;;  %v3295_v46 = vpack.c.bf16 %v775_v39, %v771_v38  ;;  %v774_v47 = vld [vmem:[#allocation8 + $0x5e0] sm:$0xff] }
 0x1da   : > { %3132 = vmatprep.subr.bf16.mxu1 %v3131_v16  ;;  %v3151_v16 = vpack.c.bf16 %v1006_v52, %v1002_v51  ;;  %v783_v51 = vld [vmem:[#allocation8 + $0x628] sm:$0xff] }
 0x1db   : > { %3258 = vmatpush1.bf16.msra.mxu0 %v3257_v55  ;;  %v3277_v55 = vpack.c.bf16 %v734_v50, %v730_v48  ;;  %v1042_v48 = vld [vmem:[#allocation8 + $0xe18] sm:$0xff]  ;;  %v779_v50 = vld [vmem:[#allocation8 + $0x608] sm:$0xff] }
 0x1dc   : > { %3260 = vmatprep.subr.bf16.mxu0 %v3259_v59 }
 0x1dd   : > { %3134 = vmatpush1.bf16.msra.mxu1 %v3133_v1  ;;  %v3281_v1 = vpack.c.bf16 %v742_v60, %v738_v58  ;;  %v1050_v58 = vld [vmem:[#allocation8 + $0xe58] sm:$0xff]  ;;  %v787_v60 = vld [vmem:[#allocation8 + $0x648] sm:$0xff] }
 0x1de   : > { %3136 = vmatprep.subr.bf16.mxu1 %v3135_v3  ;;  %v1009_v3 = vld [vmem:[#allocation8 + $0xd10] sm:$0xff] }
 0x1df   : > { %3262 = vmatpush1.bf16.msra.mxu0 %v3261_v2  ;;  %v3155_v2 = vpack.c.bf16 %v1014_v62, %v1010_v61  ;;  %v3157_v12 = vpack.c.bf16 %v1013_v4, %v1009_v3  ;;  %v791_v61 = vld [vmem:[#allocation8 + $0x668] sm:$0xff]  ;;  %v790_v4 = vld [vmem:[#allocation8 + $0x660] sm:$0xff] }
 0x1e0   : > { %3264 = vmatprep.subr.bf16.mxu0 %v3263_v7  ;;  %v750_v7 = vld [vmem:[#allocation8 + $0x520] sm:$0xff]  ;;  %v3303_v3 = vpack.c.bf16 %v791_v61, %v787_v60 }
 0x1e1   : > { %3138 = vmatpush1.bf16.msra.mxu1 %v3137_v13  ;;  %v3285_v13 = vpack.c.bf16 %v750_v7, %v746_v5  ;;  %v1058_v5 = vld [vmem:[#allocation8 + $0xe98] sm:$0xff]  ;;  %v795_v7 = vld [vmem:[#allocation8 + $0x688] sm:$0xff] }
 0x1e2   : > { %3140 = vmatprep.subr.bf16.mxu1 %v3139_v15  ;;  %v1017_v15 = vld [vmem:[#allocation8 + $0xd50] sm:$0xff] }
 0x1e3   : > { %3266 = vmatpush1.bf16.msra.mxu0 %v3265_v14  ;;  %v3159_v14 = vpack.c.bf16 %v1022_v9, %v1018_v8  ;;  %v3161_v27 = vpack.c.bf16 %v1021_v18, %v1017_v15  ;;  %v799_v8 = vld [vmem:[#allocation8 + $0x6a8] sm:$0xff]  ;;  %v798_v18 = vld [vmem:[#allocation8 + $0x6a0] sm:$0xff] }
 0x1e4   : > { %3268 = vmatprep.subr.bf16.mxu0 %v3267_v22  ;;  %1310 = vmatmul.mubr.f32.vlgmr.msra.gmra.mrb[2].mxu1 %v4918_v17  ;;  %v739_v17 = vld [vmem:[#allocation8 + $0x4c8] sm:$0xff]  ;;  %v758_v22 = vld [vmem:[#allocation8 + $0x560] sm:$0xff]  ;;  %v3307_v15 = vpack.c.bf16 %v799_v8, %v795_v7 }
 0x1e5   : > { %3142 = vmatpush1.bf16.msra.mxu1 %v3141_v28  ;;  %1380 = vmatprep.mubr.f32.mxu1 %v4914_v19  ;;  %v3279_v59 = vpack.c.bf16 %v743_v53, %v739_v17  ;;  %v3153_v19 = vpack.c.bf16 %v1005_v57, %v1001_v56  ;;  %v3289_v28 = vpack.c.bf16 %v758_v22, %v754_v20  ;;  %v782_v57 = vld [vmem:[#allocation8 + $0x620] sm:$0xff]  ;;  %v1066_v20 = vld [vmem:[#allocation8 + $0xed8] sm:$0xff]  ;;  %v803_v22 = vld [vmem:[#allocation8 + $0x6c8] sm:$0xff] }
 0x1e6   : > { %1452 = vmatmul.mubr.f32.vlgmr.msra.gmra.mrb[0].mxu0 %v582_v29  ;;  %3144 = vmatprep.subr.bf16.mxu1 %v3143_v32  ;;  %v3163_v29 = vpack.c.bf16 %v1030_v24, %v1026_v23  ;;  %v1029_v32 = vld [vmem:[#allocation8 + $0xdb0] sm:$0xff]  ;;  %v3299_v56 = vpack.c.bf16 %v783_v51, %v779_v50  ;;  %v807_v23 = vld [vmem:[#allocation8 + $0x6e8] sm:$0xff] }
 0x1e7   : > { %3270 = vmatpush1.bf16.msra.mxu0 %v3269_v31  ;;  %1522 = vmatprep.mubr.f32.mxu0 %v585_v43  ;;  %v1025_v31 = vld [vmem:[#allocation8 + $0xd90] sm:$0xff] }
 0x1e8   : > { %3272 = vmatprep.subr.bf16.mxu0 %v3271_v36  ;;  %v1034_v36 = vld [vmem:[#allocation8 + $0xdd8] sm:$0xff]  ;;  %v3165_v40 = vpack.c.bf16 %v1029_v32, %v1025_v31  ;;  %v1033_v43 = vld [vmem:[#allocation8 + $0xdd0] sm:$0xff]  ;;  %v3311_v31 = vpack.c.bf16 %v807_v23, %v803_v22  ;;  %v806_v32 = vld [vmem:[#allocation8 + $0x6e0] sm:$0xff] }
 0x1e9   : > { %3146 = vmatpush1.bf16.msra.mxu1 %v3145_v42  ;;  %v3167_v42 = vpack.c.bf16 %v1038_v37, %v1034_v36  ;;  %v815_v36 = vld [vmem:[#allocation8 + $0x728] sm:$0xff] }
 0x1ea   : > { %3148 = vmatprep.subr.bf16.mxu1 %v3147_v45  ;;  %v770_v45 = vld [vmem:[#allocation8 + $0x5c0] sm:$0xff] }
 0x1eb   : > { %3274 = vmatpush1.bf16.msra.mxu0 %v3273_v44  ;;  %v1037_v44 = vld [vmem:[#allocation8 + $0xdf0] sm:$0xff]  ;;  %v3297_v17 = vpack.c.bf16 %v774_v47, %v770_v45  ;;  %v1082_v45 = vld [vmem:[#allocation8 + $0xf58] sm:$0xff]  ;;  %v819_v47 = vld [vmem:[#allocation8 + $0x748] sm:$0xff] }
 0x1ec   : > { %3276 = vmatprep.subr.bf16.mxu0 %v3275_v49  ;;  %v1046_v49 = vld [vmem:[#allocation8 + $0xe38] sm:$0xff]  ;;  %v3169_v52 = vpack.c.bf16 %v1037_v44, %v1033_v43  ;;  %v3315_v43 = vpack.c.bf16 %v815_v36, %v811_v35  ;;  %v814_v44 = vld [vmem:[#allocation8 + $0x720] sm:$0xff] }
 0x1ed   : > { %3150 = vmatpush1.bf16.msra.mxu1 %v3149_v54  ;;  %v3171_v53 = vpack.c.bf16 %v1046_v49, %v1042_v48  ;;  %v1041_v54 = vld [vmem:[#allocation8 + $0xe10] sm:$0xff]  ;;  %v823_v48 = vld [vmem:[#allocation8 + $0x768] sm:$0xff] }
 0x1ee   : > { %3152 = vmatprep.subr.bf16.mxu1 %v3151_v16  ;;  %v778_v16 = vld [vmem:[#allocation8 + $0x600] sm:$0xff] }
 0x1ef   : > { %3278 = vmatpush1.bf16.msra.mxu0 %v3277_v55  ;;  %v1045_v55 = vld [vmem:[#allocation8 + $0xe30] sm:$0xff]  ;;  %v3301_v63 = vpack.c.bf16 %v782_v57, %v778_v16  ;;  %v1090_v16 = vld [vmem:[#allocation8 + $0xf98] sm:$0xff]  ;;  %v827_v57 = vld [vmem:[#allocation8 + $0x788] sm:$0xff] }
 0x1f0   : > { %3280 = vmatprep.subr.bf16.mxu0 %v3279_v59  ;;  %v1054_v59 = vld [vmem:[#allocation8 + $0xe78] sm:$0xff]  ;;  %v3173_v62 = vpack.c.bf16 %v1045_v55, %v1041_v54  ;;  %v3319_v54 = vpack.c.bf16 %v823_v48, %v819_v47  ;;  %v822_v55 = vld [vmem:[#allocation8 + $0x760] sm:$0xff]  ;;  %v1697_v47 = vld [vmem:[#allocation8 + $0x10a8] sm:$0xff] }
 0x1f1   : > { %3154 = vmatpush1.bf16.msra.mxu1 %v3153_v19  ;;  %v3175_v0 = vpack.c.bf16 %v1054_v59, %v1050_v58  ;;  %v1049_v19 = vld [vmem:[#allocation8 + $0xe50] sm:$0xff]  ;;  %v831_v58 = vld [vmem:[#allocation8 + $0x7a8] sm:$0xff] }
 0x1f2   : > { %3156 = vmatprep.subr.bf16.mxu1 %v3155_v2  ;;  %v786_v2 = vld [vmem:[#allocation8 + $0x640] sm:$0xff] }
 0x1f3   : > { %3282 = vmatpush1.bf16.msra.mxu0 %v3281_v1  ;;  %v1053_v1 = vld [vmem:[#allocation8 + $0xe70] sm:$0xff]  ;;  %v3305_v10 = vpack.c.bf16 %v790_v4, %v786_v2  ;;  %v1098_v2 = vld [vmem:[#allocation8 + $0xfd8] sm:$0xff]  ;;  %v835_v4 = vld [vmem:[#allocation8 + $0x7c8] sm:$0xff] }
 0x1f4   : > { %3284 = vmatprep.subr.bf16.mxu0 %v3283_v6  ;;  %v1062_v6 = vld [vmem:[#allocation8 + $0xeb8] sm:$0xff]  ;;  %v3177_v9 = vpack.c.bf16 %v1053_v1, %v1049_v19  ;;  %v3323_v19 = vpack.c.bf16 %v831_v58, %v827_v57  ;;  %v830_v1 = vld [vmem:[#allocation8 + $0x7a0] sm:$0xff]  ;;  %v1701_v57 = vld [vmem:[#allocation8 + $0x10c8] sm:$0xff] }
 0x1f5   : > { %3158 = vmatpush1.bf16.msra.mxu1 %v3157_v12  ;;  %v3179_v11 = vpack.c.bf16 %v1062_v6, %v1058_v5  ;;  %v1057_v12 = vld [vmem:[#allocation8 + $0xe90] sm:$0xff]  ;;  %v839_v5 = vld [vmem:[#allocation8 + $0x7e8] sm:$0xff] }
 0x1f6   : > { %3160 = vmatprep.subr.bf16.mxu1 %v3159_v14  ;;  %v794_v14 = vld [vmem:[#allocation8 + $0x680] sm:$0xff]  ;;  %v1705_v58 = vld [vmem:[#allocation8 + $0x10e8] sm:$0xff] }
 0x1f7   : > { %3286 = vmatpush1.bf16.msra.mxu0 %v3285_v13  ;;  %v1061_v13 = vld [vmem:[#allocation8 + $0xeb0] sm:$0xff]  ;;  %v3309_v25 = vpack.c.bf16 %v798_v18, %v794_v14  ;;  %v589_v14 = vld [vmem:[#allocation8 + $0x18] sm:$0xff]  ;;  %v1677_v18 = vld [vmem:[#allocation8 + $0x1008] sm:$0xff] }
 0x1f8   : > { %3288 = vmatprep.subr.bf16.mxu0 %v3287_v21  ;;  %v1070_v21 = vld [vmem:[#allocation8 + $0xef8] sm:$0xff]  ;;  %v3181_v24 = vpack.c.bf16 %v1061_v13, %v1057_v12  ;;  %v3327_v12 = vpack.c.bf16 %v839_v5, %v835_v4  ;;  %v838_v13 = vld [vmem:[#allocation8 + $0x7e0] sm:$0xff]  ;;  %v1709_v4 = vld [vmem:[#allocation8 + $0x1108] sm:$0xff] }
 0x1f9   : > { %3162 = vmatpush1.bf16.msra.mxu1 %v3161_v27  ;;  %v3183_v26 = vpack.c.bf16 %v1070_v21, %v1066_v20  ;;  %v1065_v27 = vld [vmem:[#allocation8 + $0xed0] sm:$0xff]  ;;  %v1681_v20 = vld [vmem:[#allocation8 + $0x1028] sm:$0xff] }
 0x1fa   : > { %3164 = vmatprep.subr.bf16.mxu1 %v3163_v29  ;;  %v802_v29 = vld [vmem:[#allocation8 + $0x6c0] sm:$0xff]  ;;  %v1713_v5 = vld [vmem:[#allocation8 + $0x1128] sm:$0xff] }
 0x1fb   : > { %3290 = vmatpush1.bf16.msra.mxu0 %v3289_v28  ;;  %v1069_v28 = vld [vmem:[#allocation8 + $0xef0] sm:$0xff]  ;;  %v3313_v38 = vpack.c.bf16 %v806_v32, %v802_v29  ;;  %v597_v29 = vld [vmem:[#allocation8 + $0x58] sm:$0xff]  ;;  %v1685_v32 = vld [vmem:[#allocation8 + $0x1048] sm:$0xff] }
 0x1fc   : > { %3292 = vmatprep.subr.bf16.mxu0 %v3291_v34  ;;  %v1078_v34 = vld [vmem:[#allocation8 + $0xf38] sm:$0xff]  ;;  %v3185_v37 = vpack.c.bf16 %v1069_v28, %v1065_v27  ;;  %v3459_v27 = vpack.c.bf16 %v1681_v20, %v1677_v18  ;;  %v1680_v28 = vld [vmem:[#allocation8 + $0x1020] sm:$0xff]  ;;  %v1721_v18 = vld [vmem:[#allocation8 + $0x1168] sm:$0xff] }
 0x1fd   : > { %3166 = vmatpush1.bf16.msra.mxu1 %v3165_v40  ;;  %v3187_v39 = vpack.c.bf16 %v1078_v34, %v1074_v33  ;;  %v1073_v40 = vld [vmem:[#allocation8 + $0xf10] sm:$0xff]  ;;  %v1689_v33 = vld [vmem:[#allocation8 + $0x1068] sm:$0xff] }
 0x1fe   : > { %3168 = vmatprep.subr.bf16.mxu1 %v3167_v42  ;;  %v810_v42 = vld [vmem:[#allocation8 + $0x700] sm:$0xff]  ;;  %v584_v34 = vld [vmem:[%s4878_s13 + $0x10] sm:$0xff] }
 0x1ff   : > { %3294 = vmatpush1.bf16.msra.mxu0 %v3293_v41  ;;  %v1077_v41 = vld [vmem:[#allocation8 + $0xf30] sm:$0xff]  ;;  %v3317_v50 = vpack.c.bf16 %v814_v44, %v810_v42  ;;  %v1688_v42 = vld [vmem:[#allocation8 + $0x1060] sm:$0xff]  ;;  %v609_v44 = vld [vmem:[#allocation8 + $0xb8] sm:$0xff] }
 0x200   : > { %3296 = vmatprep.subr.bf16.mxu0 %v3295_v46  ;;  %v1086_v46 = vld [vmem:[#allocation8 + $0xf78] sm:$0xff]  ;;  %v3189_v49 = vpack.c.bf16 %v1077_v41, %v1073_v40  ;;  %v1684_v40 = vld [vmem:[#allocation8 + $0x1040] sm:$0xff]  ;;  %v3463_v41 = vpack.c.bf16 %v1689_v33, %v1685_v32  ;;  %v1729_v32 = vld [vmem:[#allocation8 + $0x11a8] sm:$0xff] }
 0x201   : > { %3170 = vmatpush1.bf16.msra.mxu1 %v3169_v52  ;;  %v3191_v51 = vpack.c.bf16 %v1086_v46, %v1082_v45  ;;  %v1081_v52 = vld [vmem:[#allocation8 + $0xf50] sm:$0xff]  ;;  %v1693_v46 = vld [vmem:[#allocation8 + $0x1088] sm:$0xff] }
 0x202   : > { %3172 = vmatprep.subr.bf16.mxu1 %v3171_v53  ;;  %v818_v53 = vld [vmem:[#allocation8 + $0x740] sm:$0xff]  ;;  %v4042_v45 = vld [vmem:[%s4885_s24 + $0x10] sm:$0xff] }
 0x203   : > { %3298 = vmatpush1.bf16.msra.mxu0 %v3297_v17  ;;  %v1085_v17 = vld [vmem:[#allocation8 + $0xf70] sm:$0xff]  ;;  %v3321_v60 = vpack.c.bf16 %v822_v55, %v818_v53  ;;  %v1692_v53 = vld [vmem:[#allocation8 + $0x1080] sm:$0xff] }
 0x204   : > { %3300 = vmatprep.subr.bf16.mxu0 %v3299_v56  ;;  %v1094_v56 = vld [vmem:[#allocation8 + $0xfb8] sm:$0xff]  ;;  %v3193_v59 = vpack.c.bf16 %v1085_v17, %v1081_v52  ;;  %v604_v52 = vld [vmem:[#allocation8 + $0x90] sm:$0xff]  ;;  %v1696_v55 = vld [vmem:[#allocation8 + $0x10a0] sm:$0xff] }
 0x205   : > { %3174 = vmatpush1.bf16.msra.mxu1 %v3173_v62  ;;  %v3195_v61 = vpack.c.bf16 %v1094_v56, %v1090_v16  ;;  %v1089_v62 = vld [vmem:[#allocation8 + $0xf90] sm:$0xff]  ;;  %v613_v16 = vld [vmem:[#allocation8 + $0xd8] sm:$0xff] }
 0x206   : > { %3176 = vmatprep.subr.bf16.mxu1 %v3175_v0  ;;  %v826_v0 = vld [vmem:[#allocation8 + $0x780] sm:$0xff]  ;;  %v608_v17 = vld [vmem:[#allocation8 + $0xb0] sm:$0xff]  ;;  %v617_v56 = vld [vmem:[#allocation8 + $0xf8] sm:$0xff] }
 0x207   : > { %3302 = vmatpush1.bf16.msra.mxu0 %v3301_v63  ;;  %v1093_v63 = vld [vmem:[#allocation8 + $0xfb0] sm:$0xff]  ;;  %v3325_v7 = vpack.c.bf16 %v830_v1, %v826_v0  ;;  %v1700_v0 = vld [vmem:[#allocation8 + $0x10c0] sm:$0xff] }
 0x208   : > { %3304 = vmatprep.subr.bf16.mxu0 %v3303_v3  ;;  %v1102_v3 = vld [vmem:[#allocation8 + $0xff8] sm:$0xff]  ;;  %v3197_v6 = vpack.c.bf16 %v1093_v63, %v1089_v62  ;;  %v612_v62 = vld [vmem:[#allocation8 + $0xd0] sm:$0xff]  ;;  %v1704_v1 = vld [vmem:[#allocation8 + $0x10e0] sm:$0xff] }
 0x209   : > { %3178 = vmatpush1.bf16.msra.mxu1 %v3177_v9  ;;  %v3199_v8 = vpack.c.bf16 %v1102_v3, %v1098_v2  ;;  %v1097_v9 = vld [vmem:[#allocation8 + $0xfd0] sm:$0xff]  ;;  %v621_v2 = vld [vmem:[#allocation8 + $0x118] sm:$0xff] }
 0x20a   : > { %3180 = vmatprep.subr.bf16.mxu1 %v3179_v11  ;;  %v834_v11 = vld [vmem:[#allocation8 + $0x7c0] sm:$0xff]  ;;  %v616_v63 = vld [vmem:[#allocation8 + $0xf0] sm:$0xff]  ;;  %v625_v3 = vld [vmem:[#allocation8 + $0x138] sm:$0xff] }
 0x20b   : > { %3306 = vmatpush1.bf16.msra.mxu0 %v3305_v10  ;;  %v1101_v10 = vld [vmem:[#allocation8 + $0xff0] sm:$0xff]  ;;  %v3329_v22 = vpack.c.bf16 %v838_v13, %v834_v11  ;;  %v3475_v11 = vpack.c.bf16 %v1713_v5, %v1709_v4  ;;  %v629_v13 = vld [vmem:[#allocation8 + $0x158] sm:$0xff] }
 0x20c   : > { %3308 = vmatprep.subr.bf16.mxu0 %v3307_v15  ;;  %v593_v15 = vld [vmem:[#allocation8 + $0x38] sm:$0xff]  ;;  %v3201_v21 = vpack.c.bf16 %v1101_v10, %v1097_v9  ;;  %v624_v9 = vld [vmem:[#allocation8 + $0x130] sm:$0xff]  ;;  %v1708_v10 = vld [vmem:[#allocation8 + $0x1100] sm:$0xff] }
 0x20d   : > { %3182 = vmatpush1.bf16.msra.mxu1 %v3181_v24  ;;  %v3331_v23 = vpack.c.bf16 %v593_v15, %v589_v14  ;;  %v588_v24 = vld [vmem:[#allocation8 + $0x10] sm:$0xff]  ;;  %v633_v14 = vld [vmem:[#allocation8 + $0x178] sm:$0xff]  ;;  %v1717_v15 = vld [vmem:[#allocation8 + $0x1148] sm:$0xff] }
 0x20e   : > { %3184 = vmatprep.subr.bf16.mxu1 %v3183_v26  ;;  %v1676_v26 = vld [vmem:[#allocation8 + $0x1000] sm:$0xff]  ;;  %v660_v5 = vld [vmem:[#allocation8 + $0x250] sm:$0xff] }
 0x20f   : > { %3310 = vmatpush1.bf16.msra.mxu0 %v3309_v25  ;;  %v592_v25 = vld [vmem:[#allocation8 + $0x30] sm:$0xff]  ;;  %v3461_v36 = vpack.c.bf16 %v1680_v28, %v1676_v26  ;;  %v3479_v26 = vpack.c.bf16 %v1721_v18, %v1717_v15  ;;  %v637_v28 = vld [vmem:[#allocation8 + $0x198] sm:$0xff] }
 0x210   : > { %3312 = vmatprep.subr.bf16.mxu0 %v3311_v31  ;;  %v601_v31 = vld [vmem:[#allocation8 + $0x78] sm:$0xff]  ;;  %v3333_v35 = vpack.c.bf16 %v592_v25, %v588_v24  ;;  %v632_v24 = vld [vmem:[#allocation8 + $0x170] sm:$0xff]  ;;  %v1716_v25 = vld [vmem:[#allocation8 + $0x1140] sm:$0xff] }
 0x211   : > { %3186 = vmatpush1.bf16.msra.mxu1 %v3185_v37  ;;  %v3335_v37 = vpack.c.bf16 %v601_v31, %v597_v29  ;;  %v641_v29 = vld [vmem:[#allocation8 + $0x1b8] sm:$0xff]  ;;  %v1725_v31 = vld [vmem:[#allocation8 + $0x1188] sm:$0xff]  ;;  %v668_v18 = vld [vmem:[#allocation8 + $0x290] sm:$0xff] }
 0x212   : > { %3188 = vmatprep.subr.bf16.mxu1 %v3187_v39  ;;  %v600_v39 = vld [vmem:[#allocation8 + $0x70] sm:$0xff] }
 0x213   : > { %3314 = vmatpush1.bf16.msra.mxu0 %v3313_v38  ;;  %v596_v38 = vld [vmem:[#allocation8 + $0x50] sm:$0xff] }
 0x214   : > { %3316 = vmatprep.subr.bf16.mxu0 %v3315_v43  ;;  %v605_v43 = vld [vmem:[#allocation8 + $0x98] sm:$0xff]  ;;  %v3337_v48 = vpack.c.bf16 %v600_v39, %v596_v38  ;;  %v1724_v38 = vld [vmem:[#allocation8 + $0x1180] sm:$0xff]  ;;  %v3483_v39 = vpack.c.bf16 %v1729_v32, %v1725_v31  ;;  %v676_v32 = vld [vmem:[#allocation8 + $0x2d0] sm:$0xff] }
 0x215   : > { %3190 = vmatpush1.bf16.msra.mxu1 %v3189_v49  ;;  %v1672_v49 = vld [vmem:[%s4891_s30 + $0x8] sm:$0xff] }
 0x216   : > { %3192 = vmatprep.subr.bf16.mxu1 %v3191_v51  ;;  %v3339_v51 = vpack.c.bf16 %v609_v44, %v605_v43  ;;  %v1733_v43 = vld [vmem:[#allocation8 + $0x11c8] sm:$0xff] }
 0x217   : > { %3318 = vmatpush1.bf16.msra.mxu0 %v3317_v50  ;;  %v3465_v50 = vpack.c.bf16 %v1688_v42, %v1684_v40  ;;  %v1728_v40 = vld [vmem:[#allocation8 + $0x11a0] sm:$0xff]  ;;  %v649_v42 = vld [vmem:[#allocation8 + $0x1f8] sm:$0xff]  ;;  %v1737_v44 = vld [vmem:[#allocation8 + $0x11e8] sm:$0xff] }
 0x218   : > { %3320 = vmatprep.subr.bf16.mxu0 %v3319_v54  ;;  %v3467_v54 = vpack.c.bf16 %v1697_v47, %v1693_v46  ;;  %v3485_v46 = vpack.c.bf16 %v1728_v40, %v1724_v38  ;;  %v689_v38 = vld [vmem:[#allocation8 + $0x338] sm:$0xff]  ;;  %v1777_v40 = vld [vmem:[#allocation8 + $0x1328] sm:$0xff] }
 0x219   : > { %3194 = vmatpush1.bf16.msra.mxu1 %v3193_v59  ;;  %v3341_v59 = vpack.c.bf16 %v608_v17, %v604_v52  ;;  %v1736_v52 = vld [vmem:[#allocation8 + $0x11e0] sm:$0xff]  ;;  %v653_v17 = vld [vmem:[#allocation8 + $0x218] sm:$0xff] }
 0x21a   : > { %3196 = vmatprep.subr.bf16.mxu1 %v3195_v61  ;;  %v3343_v61 = vpack.c.bf16 %v617_v56, %v613_v16 }
 0x21b   : > { %3322 = vmatpush1.bf16.msra.mxu0 %v3321_v60  ;;  %v3469_v60 = vpack.c.bf16 %v1696_v55, %v1692_v53  ;;  %v657_v53 = vld [vmem:[#allocation8 + $0x238] sm:$0xff]  ;;  %v1745_v55 = vld [vmem:[#allocation8 + $0x1228] sm:$0xff] }
 0x21c   : > { %3324 = vmatprep.subr.bf16.mxu0 %v3323_v19  ;;  %v3471_v19 = vpack.c.bf16 %v1705_v58, %v1701_v57  ;;  %v3363_v57 = vpack.c.bf16 %v657_v53, %v653_v17  ;;  %v652_v58 = vld [vmem:[#allocation8 + $0x210] sm:$0xff] }
 0x21d   : > { %3198 = vmatpush1.bf16.msra.mxu1 %v3197_v6  ;;  %v3473_v6 = vpack.c.bf16 %v1704_v1, %v1700_v0  ;;  %v665_v0 = vld [vmem:[#allocation8 + $0x278] sm:$0xff]  ;;  %v1753_v1 = vld [vmem:[#allocation8 + $0x1268] sm:$0xff] }
 0x21e   : > { %3200 = vmatprep.subr.bf16.mxu1 %v3199_v8  ;;  %v620_v8 = vld [vmem:[#allocation8 + $0x110] sm:$0xff] }
 0x21f   : > { %3326 = vmatpush1.bf16.msra.mxu0 %v3325_v7  ;;  %v3347_v7 = vpack.c.bf16 %v625_v3, %v621_v2  ;;  %v3349_v20 = vpack.c.bf16 %v624_v9, %v620_v8  ;;  %v1752_v8 = vld [vmem:[#allocation8 + $0x1260] sm:$0xff]  ;;  %v669_v9 = vld [vmem:[#allocation8 + $0x298] sm:$0xff] }
 0x220   : > { %3328 = vmatprep.subr.bf16.mxu0 %v3327_v12  ;;  %v1712_v12 = vld [vmem:[#allocation8 + $0x1120] sm:$0xff] }
 0x221   : > { %3202 = vmatpush1.bf16.msra.mxu1 %v3201_v21  ;;  %v3477_v21 = vpack.c.bf16 %v1712_v12, %v1708_v10  ;;  %v673_v10 = vld [vmem:[#allocation8 + $0x2b8] sm:$0xff]  ;;  %v1761_v12 = vld [vmem:[#allocation8 + $0x12a8] sm:$0xff] }
 0x222   : > { %3332 = vmatprep.subr.bf16.mxu1 %v3331_v23  ;;  %v628_v23 = vld [vmem:[#allocation8 + $0x150] sm:$0xff]  ;;  %v3371_v15 = vpack.c.bf16 %v673_v10, %v669_v9 }
 0x223   : > { %3330 = vmatpush1.bf16.msra.mxu0 %v3329_v22  ;;  %v3351_v22 = vpack.c.bf16 %v633_v14, %v629_v13  ;;  %v3353_v33 = vpack.c.bf16 %v632_v24, %v628_v23  ;;  %v1760_v23 = vld [vmem:[#allocation8 + $0x12a0] sm:$0xff]  ;;  %v677_v24 = vld [vmem:[#allocation8 + $0x2d8] sm:$0xff] }
 0x224   : > { %3460 = vmatprep.subr.bf16.mxu0 %v3459_v27  ;;  %1381 = vmatmul.mubr.f32.vlgmr.msra.gmra.mrb[2].mxu1 %v4042_v45  ;;  %v1720_v27 = vld [vmem:[#allocation8 + $0x1160] sm:$0xff] }
 0x225   : > { %3334 = vmatpush1.bf16.msra.mxu1 %v3333_v35  ;;  %1593 = vmatprep.mubr.f32.mxu1 %v4924_v30  ;;  %v3345_v30 = vpack.c.bf16 %v616_v63, %v612_v62  ;;  %v3355_v35 = vpack.c.bf16 %v641_v29, %v637_v28  ;;  %v1744_v62 = vld [vmem:[#allocation8 + $0x1220] sm:$0xff]  ;;  %v661_v63 = vld [vmem:[#allocation8 + $0x258] sm:$0xff] }
 0x226   : > { %1523 = vmatmul.mubr.f32.vlgmr.msra.gmra.mrb[0].mxu0 %v584_v34  ;;  %3336 = vmatprep.subr.bf16.mxu1 %v3335_v37  ;;  %v3481_v34 = vpack.c.bf16 %v1720_v27, %v1716_v25  ;;  %v640_v37 = vld [vmem:[#allocation8 + $0x1b0] sm:$0xff]  ;;  %v3367_v4 = vpack.c.bf16 %v665_v0, %v661_v63  ;;  %v681_v25 = vld [vmem:[#allocation8 + $0x2f8] sm:$0xff]  ;;  %v1769_v27 = vld [vmem:[#allocation8 + $0x12e8] sm:$0xff] }
 0x227   : > { %3462 = vmatpush1.bf16.msra.mxu0 %v3461_v36  ;;  %1996 = vmatprep.mubr.f32.mxu0 %v1672_v49  ;;  %v636_v36 = vld [vmem:[#allocation8 + $0x190] sm:$0xff]  ;;  %v3375_v31 = vpack.c.bf16 %v681_v25, %v677_v24 }
 0x228   : > { %3464 = vmatprep.subr.bf16.mxu0 %v3463_v41  ;;  %v645_v41 = vld [vmem:[#allocation8 + $0x1d8] sm:$0xff]  ;;  %v3357_v45 = vpack.c.bf16 %v640_v37, %v636_v36  ;;  %v648_v49 = vld [vmem:[#allocation8 + $0x1f0] sm:$0xff]  ;;  %v1768_v36 = vld [vmem:[#allocation8 + $0x12e0] sm:$0xff] }
 0x229   : > { %3338 = vmatpush1.bf16.msra.mxu1 %v3337_v48  ;;  %v3359_v47 = vpack.c.bf16 %v649_v42, %v645_v41  ;;  %v644_v48 = vld [vmem:[#allocation8 + $0x1d0] sm:$0xff]  ;;  %v685_v37 = vld [vmem:[#allocation8 + $0x318] sm:$0xff] }
 0x22a   : > { %3340 = vmatprep.subr.bf16.mxu1 %v3339_v51  ;;  %v3487_v51 = vpack.c.bf16 %v1737_v44, %v1733_v43  ;;  %v3361_v16 = vpack.c.bf16 %v648_v49, %v644_v48  ;;  %v3379_v43 = vpack.c.bf16 %v689_v38, %v685_v37  ;;  %v684_v44 = vld [vmem:[#allocation8 + $0x310] sm:$0xff]  ;;  %v1776_v48 = vld [vmem:[#allocation8 + $0x1320] sm:$0xff]  ;;  %v693_v49 = vld [vmem:[#allocation8 + $0x358] sm:$0xff] }
 0x22b   : > { %3466 = vmatpush1.bf16.msra.mxu0 %v3465_v50  ;;  %v1732_v50 = vld [vmem:[#allocation8 + $0x11c0] sm:$0xff] }
 0x22c   : > { %3468 = vmatprep.subr.bf16.mxu0 %v3467_v54  ;;  %v1741_v54 = vld [vmem:[#allocation8 + $0x1208] sm:$0xff]  ;;  %v3489_v56 = vpack.c.bf16 %v1736_v52, %v1732_v50  ;;  %v697_v50 = vld [vmem:[#allocation8 + $0x378] sm:$0xff]  ;;  %v1671_v38 = vld [vmem:[%s4891_s30] sm:$0xff] }
 0x22d   : > { %3342 = vmatpush1.bf16.msra.mxu1 %v3341_v59  ;;  %v656_v59 = vld [vmem:[#allocation8 + $0x230] sm:$0xff]  ;;  %v1785_v52 = vld [vmem:[#allocation8 + $0x1368] sm:$0xff] }
 0x22e   : > { %3344 = vmatprep.subr.bf16.mxu1 %v3343_v61  ;;  %v3491_v61 = vpack.c.bf16 %v1745_v55, %v1741_v54  ;;  %v3365_v2 = vpack.c.bf16 %v656_v59, %v652_v58  ;;  %v3383_v54 = vpack.c.bf16 %v697_v50, %v693_v49  ;;  %v692_v55 = vld [vmem:[#allocation8 + $0x350] sm:$0xff]  ;;  %v1784_v58 = vld [vmem:[#allocation8 + $0x1360] sm:$0xff]  ;;  %v701_v59 = vld [vmem:[#allocation8 + $0x398] sm:$0xff] }
 0x22f   : > { %3470 = vmatpush1.bf16.msra.mxu0 %v3469_v60  ;;  %v1740_v60 = vld [vmem:[#allocation8 + $0x1200] sm:$0xff]  ;;  %v1821_v49 = vld [vmem:[#allocation8 + $0x1488] sm:$0xff] }
 0x230   : > { %3472 = vmatprep.subr.bf16.mxu0 %v3471_v19  ;;  %v1749_v19 = vld [vmem:[#allocation8 + $0x1248] sm:$0xff]  ;;  %v3493_v3 = vpack.c.bf16 %v1744_v62, %v1740_v60  ;;  %v705_v60 = vld [vmem:[#allocation8 + $0x3b8] sm:$0xff] }
 0x231   : > { %3346 = vmatpush1.bf16.msra.mxu1 %v3345_v30  ;;  %v664_v30 = vld [vmem:[#allocation8 + $0x270] sm:$0xff]  ;;  %v1793_v62 = vld [vmem:[#allocation8 + $0x13a8] sm:$0xff] }
 0x232   : > { %3348 = vmatprep.subr.bf16.mxu1 %v3347_v7  ;;  %v3495_v7 = vpack.c.bf16 %v1753_v1, %v1749_v19  ;;  %v3369_v13 = vpack.c.bf16 %v664_v30, %v660_v5  ;;  %v3387_v19 = vpack.c.bf16 %v705_v60, %v701_v59  ;;  %v700_v1 = vld [vmem:[#allocation8 + $0x390] sm:$0xff]  ;;  %v1792_v5 = vld [vmem:[#allocation8 + $0x13a0] sm:$0xff]  ;;  %v709_v30 = vld [vmem:[#allocation8 + $0x3d8] sm:$0xff] }
 0x233   : > { %3474 = vmatpush1.bf16.msra.mxu0 %v3473_v6  ;;  %v1748_v6 = vld [vmem:[#allocation8 + $0x1240] sm:$0xff]  ;;  %v1825_v50 = vld [vmem:[#allocation8 + $0x14a8] sm:$0xff]  ;;  %v745_v59 = vld [vmem:[#allocation8 + $0x4f8] sm:$0xff] }
 0x234   : > { %3476 = vmatprep.subr.bf16.mxu0 %v3475_v11  ;;  %v1757_v11 = vld [vmem:[#allocation8 + $0x1288] sm:$0xff]  ;;  %v3497_v14 = vpack.c.bf16 %v1752_v8, %v1748_v6  ;;  %v713_v6 = vld [vmem:[#allocation8 + $0x3f8] sm:$0xff] }
 0x235   : > { %3350 = vmatpush1.bf16.msra.mxu1 %v3349_v20  ;;  %v672_v20 = vld [vmem:[#allocation8 + $0x2b0] sm:$0xff]  ;;  %v1801_v8 = vld [vmem:[#allocation8 + $0x13e8] sm:$0xff] }
 0x236   : > { %3352 = vmatprep.subr.bf16.mxu1 %v3351_v22  ;;  %v3499_v22 = vpack.c.bf16 %v1761_v12, %v1757_v11  ;;  %v3373_v28 = vpack.c.bf16 %v672_v20, %v668_v18  ;;  %v3391_v11 = vpack.c.bf16 %v713_v6, %v709_v30  ;;  %v708_v12 = vld [vmem:[#allocation8 + $0x3d0] sm:$0xff]  ;;  %v1800_v18 = vld [vmem:[#allocation8 + $0x13e0] sm:$0xff]  ;;  %v717_v20 = vld [vmem:[#allocation8 + $0x418] sm:$0xff] }
 0x237   : > { %3478 = vmatpush1.bf16.msra.mxu0 %v3477_v21  ;;  %v1756_v21 = vld [vmem:[#allocation8 + $0x1280] sm:$0xff]  ;;  %v1829_v60 = vld [vmem:[#allocation8 + $0x14c8] sm:$0xff]  ;;  %v749_v30 = vld [vmem:[#allocation8 + $0x518] sm:$0xff] }
 0x238   : > { %3480 = vmatprep.subr.bf16.mxu0 %v3479_v26  ;;  %v1765_v26 = vld [vmem:[#allocation8 + $0x12c8] sm:$0xff]  ;;  %v3501_v29 = vpack.c.bf16 %v1760_v23, %v1756_v21  ;;  %v721_v21 = vld [vmem:[#allocation8 + $0x438] sm:$0xff] }
 0x239   : > { %3354 = vmatpush1.bf16.msra.mxu1 %v3353_v33  ;;  %v680_v33 = vld [vmem:[#allocation8 + $0x2f0] sm:$0xff]  ;;  %v1809_v23 = vld [vmem:[#allocation8 + $0x1428] sm:$0xff]  ;;  %v753_v6 = vld [vmem:[#allocation8 + $0x538] sm:$0xff] }
 0x23a   : > { %3356 = vmatprep.subr.bf16.mxu1 %v3355_v35  ;;  %v3503_v35 = vpack.c.bf16 %v1769_v27, %v1765_v26  ;;  %v3377_v41 = vpack.c.bf16 %v680_v33, %v676_v32  ;;  %v3395_v26 = vpack.c.bf16 %v721_v21, %v717_v20  ;;  %v716_v27 = vld [vmem:[#allocation8 + $0x410] sm:$0xff]  ;;  %v1808_v32 = vld [vmem:[#allocation8 + $0x1420] sm:$0xff]  ;;  %v725_v33 = vld [vmem:[#allocation8 + $0x458] sm:$0xff] }
 0x23b   : > { %3482 = vmatpush1.bf16.msra.mxu0 %v3481_v34  ;;  %v1764_v34 = vld [vmem:[#allocation8 + $0x12c0] sm:$0xff]  ;;  %v757_v20 = vld [vmem:[#allocation8 + $0x558] sm:$0xff] }
 0x23c   : > { %3484 = vmatprep.subr.bf16.mxu0 %v3483_v39  ;;  %v1773_v39 = vld [vmem:[#allocation8 + $0x1308] sm:$0xff]  ;;  %v3505_v42 = vpack.c.bf16 %v1768_v36, %v1764_v34  ;;  %v729_v34 = vld [vmem:[#allocation8 + $0x478] sm:$0xff] }
 0x23d   : > { %3358 = vmatpush1.bf16.msra.mxu1 %v3357_v45  ;;  %v688_v45 = vld [vmem:[#allocation8 + $0x330] sm:$0xff]  ;;  %v1817_v36 = vld [vmem:[#allocation8 + $0x1468] sm:$0xff]  ;;  %v761_v21 = vld [vmem:[#allocation8 + $0x578] sm:$0xff] }
 0x23e   : > { %3360 = vmatprep.subr.bf16.mxu1 %v3359_v47  ;;  %v3507_v47 = vpack.c.bf16 %v1777_v40, %v1773_v39  ;;  %v3381_v17 = vpack.c.bf16 %v688_v45, %v684_v44  ;;  %v3399_v40 = vpack.c.bf16 %v729_v34, %v725_v33  ;;  %v1816_v45 = vld [vmem:[#allocation8 + $0x1460] sm:$0xff]  ;;  %v765_v33 = vld [vmem:[#allocation8 + $0x598] sm:$0xff] }
 0x23f   : > { %3486 = vmatpush1.bf16.msra.mxu0 %v3485_v46  ;;  %v1772_v46 = vld [vmem:[#allocation8 + $0x1300] sm:$0xff]  ;;  %v769_v34 = vld [vmem:[#allocation8 + $0x5b8] sm:$0xff] }
 0x240   : > { %3488 = vmatprep.subr.bf16.mxu0 %v3487_v51  ;;  %v1781_v51 = vld [vmem:[#allocation8 + $0x1348] sm:$0xff]  ;;  %v3509_v53 = vpack.c.bf16 %v1776_v48, %v1772_v46  ;;  %v733_v46 = vld [vmem:[#allocation8 + $0x498] sm:$0xff]  ;;  %v4043_v48 = vld [vmem:[%s4878_s13] sm:$0xff] }
 0x241   : > { %3362 = vmatpush1.bf16.msra.mxu1 %v3361_v16  ;;  %v696_v16 = vld [vmem:[#allocation8 + $0x370] sm:$0xff] }
 0x242   : > { %3364 = vmatprep.subr.bf16.mxu1 %v3363_v57  ;;  %v3511_v57 = vpack.c.bf16 %v1785_v52, %v1781_v51  ;;  %v3385_v63 = vpack.c.bf16 %v696_v16, %v692_v55  ;;  %v4938_v51 = vld [vmem:[%s4891_s30 + $0x18] sm:$0xff]  ;;  %v736_v55 = vld [vmem:[#allocation8 + $0x4b0] sm:$0xff]  ;;  %v1820_v16 = vld [vmem:[#allocation8 + $0x1480] sm:$0xff] }
 0x243   : > { %3490 = vmatpush1.bf16.msra.mxu0 %v3489_v56  ;;  %v1780_v56 = vld [vmem:[#allocation8 + $0x1340] sm:$0xff] }
 0x244   : > { %3492 = vmatprep.subr.bf16.mxu0 %v3491_v61  ;;  %v1789_v61 = vld [vmem:[#allocation8 + $0x1388] sm:$0xff]  ;;  %v3513_v0 = vpack.c.bf16 %v1784_v58, %v1780_v56  ;;  %v3531_v56 = vpack.c.bf16 %v1825_v50, %v1821_v49  ;;  %v741_v58 = vld [vmem:[#allocation8 + $0x4d8] sm:$0xff] }
 0x245   : > { %3366 = vmatpush1.bf16.msra.mxu1 %v3365_v2  ;;  %v704_v2 = vld [vmem:[#allocation8 + $0x3b0] sm:$0xff]  ;;  %v1861_v49 = vld [vmem:[#allocation8 + $0x15c8] sm:$0xff] }
 0x246   : > { %3368 = vmatprep.subr.bf16.mxu1 %v3367_v4  ;;  %v3515_v4 = vpack.c.bf16 %v1793_v62, %v1789_v61  ;;  %v3389_v9 = vpack.c.bf16 %v704_v2, %v700_v1  ;;  %v1833_v61 = vld [vmem:[#allocation8 + $0x14e8] sm:$0xff]  ;;  %v4044_v62 = vld [vmem:[%s4878_s13 + $0x18] sm:$0xff]  ;;  %v740_v1 = vld [vmem:[#allocation8 + $0x4d0] sm:$0xff] }
 0x247   : > { %3494 = vmatpush1.bf16.msra.mxu0 %v3493_v3  ;;  %v1788_v3 = vld [vmem:[#allocation8 + $0x1380] sm:$0xff]  ;;  %v744_v2 = vld [vmem:[#allocation8 + $0x4f0] sm:$0xff]  ;;  %v1865_v50 = vld [vmem:[#allocation8 + $0x15e8] sm:$0xff] }
 0x248   : > { %3496 = vmatprep.subr.bf16.mxu0 %v3495_v7  ;;  %v1797_v7 = vld [vmem:[#allocation8 + $0x13c8] sm:$0xff]  ;;  %v3517_v10 = vpack.c.bf16 %v1792_v5, %v1788_v3  ;;  %v1828_v3 = vld [vmem:[#allocation8 + $0x14c0] sm:$0xff] }
 0x249   : > { %3370 = vmatpush1.bf16.msra.mxu1 %v3369_v13  ;;  %v712_v13 = vld [vmem:[#allocation8 + $0x3f0] sm:$0xff]  ;;  %v1832_v5 = vld [vmem:[#allocation8 + $0x14e0] sm:$0xff] }
 0x24a   : > { %3372 = vmatprep.subr.bf16.mxu1 %v3371_v15  ;;  %v3519_v15 = vpack.c.bf16 %v1801_v8, %v1797_v7  ;;  %v3393_v24 = vpack.c.bf16 %v712_v13, %v708_v12  ;;  %v1837_v7 = vld [vmem:[#allocation8 + $0x1508] sm:$0xff]  ;;  %v748_v12 = vld [vmem:[#allocation8 + $0x510] sm:$0xff] }
 0x24b   : > { %3498 = vmatpush1.bf16.msra.mxu0 %v3497_v14  ;;  %v1796_v14 = vld [vmem:[#allocation8 + $0x13c0] sm:$0xff]  ;;  %v1841_v8 = vld [vmem:[#allocation8 + $0x1528] sm:$0xff]  ;;  %v752_v13 = vld [vmem:[#allocation8 + $0x530] sm:$0xff] }
 0x24c   : > { %3500 = vmatprep.subr.bf16.mxu0 %v3499_v22  ;;  %v1805_v22 = vld [vmem:[#allocation8 + $0x1408] sm:$0xff]  ;;  %v3521_v25 = vpack.c.bf16 %v1800_v18, %v1796_v14  ;;  %v1836_v14 = vld [vmem:[#allocation8 + $0x1500] sm:$0xff] }
 0x24d   : > { %3374 = vmatpush1.bf16.msra.mxu1 %v3373_v28  ;;  %v720_v28 = vld [vmem:[#allocation8 + $0x430] sm:$0xff]  ;;  %v1840_v18 = vld [vmem:[#allocation8 + $0x1520] sm:$0xff] }
 0x24e   : > { %3376 = vmatprep.subr.bf16.mxu1 %v3375_v31  ;;  %v3523_v31 = vpack.c.bf16 %v1809_v23, %v1805_v22  ;;  %v3397_v37 = vpack.c.bf16 %v720_v28, %v716_v27  ;;  %v1845_v22 = vld [vmem:[#allocation8 + $0x1548] sm:$0xff]  ;;  %v756_v27 = vld [vmem:[#allocation8 + $0x550] sm:$0xff] }
 0x24f   : > { %3502 = vmatpush1.bf16.msra.mxu0 %v3501_v29  ;;  %v1804_v29 = vld [vmem:[#allocation8 + $0x1400] sm:$0xff]  ;;  %v1849_v23 = vld [vmem:[#allocation8 + $0x1568] sm:$0xff]  ;;  %v760_v28 = vld [vmem:[#allocation8 + $0x570] sm:$0xff] }
 0x250   : > { %3504 = vmatprep.subr.bf16.mxu0 %v3503_v35  ;;  %v1813_v35 = vld [vmem:[#allocation8 + $0x1448] sm:$0xff]  ;;  %v3525_v39 = vpack.c.bf16 %v1808_v32, %v1804_v29  ;;  %v1844_v29 = vld [vmem:[#allocation8 + $0x1540] sm:$0xff] }
 0x251   : > { %3378 = vmatpush1.bf16.msra.mxu1 %v3377_v41  ;;  %v724_v41 = vld [vmem:[#allocation8 + $0x450] sm:$0xff]  ;;  %v3527_v44 = vpack.c.bf16 %v1817_v36, %v1813_v35  ;;  %v1848_v32 = vld [vmem:[#allocation8 + $0x1560] sm:$0xff]  ;;  %v1853_v35 = vld [vmem:[#allocation8 + $0x1588] sm:$0xff] }
 0x252   : > { %3380 = vmatprep.subr.bf16.mxu1 %v3379_v43  ;;  %v1812_v43 = vld [vmem:[#allocation8 + $0x1440] sm:$0xff]  ;;  %v1857_v36 = vld [vmem:[#allocation8 + $0x15a8] sm:$0xff] }
 0x253   : > { %3506 = vmatpush1.bf16.msra.mxu0 %v3505_v42  ;;  %v728_v42 = vld [vmem:[#allocation8 + $0x470] sm:$0xff] }
 0x254   : > { %3508 = vmatprep.subr.bf16.mxu0 %v3507_v47  ;;  %v737_v47 = vld [vmem:[#allocation8 + $0x4b8] sm:$0xff]  ;;  %v3401_v52 = vpack.c.bf16 %v728_v42, %v724_v41  ;;  %v768_v41 = vld [vmem:[#allocation8 + $0x5b0] sm:$0xff]  ;;  %v1852_v42 = vld [vmem:[#allocation8 + $0x1580] sm:$0xff] }
 0x255   : > { %3382 = vmatpush1.bf16.msra.mxu1 %v3381_v17  ;;  %v3529_v17 = vpack.c.bf16 %v1816_v45, %v1812_v43  ;;  %v1856_v45 = vld [vmem:[#allocation8 + $0x15a0] sm:$0xff] }
 0x256   : > { %3384 = vmatprep.subr.bf16.mxu1 %v3383_v54  ;;  %v732_v54 = vld [vmem:[#allocation8 + $0x490] sm:$0xff] }
 0x257   : > { %3510 = vmatpush1.bf16.msra.mxu0 %v3509_v53  ;;  %v3403_v53 = vpack.c.bf16 %v737_v47, %v733_v46  ;;  %v773_v46 = vld [vmem:[#allocation8 + $0x5d8] sm:$0xff] }
 0x258   : > { %3512 = vmatprep.subr.bf16.mxu0 %v3511_v57  ;;  %v1824_v57 = vld [vmem:[#allocation8 + $0x14a0] sm:$0xff]  ;;  %v777_v47 = vld [vmem:[#allocation8 + $0x5f8] sm:$0xff] }
 0x259   : > { %3386 = vmatpush1.bf16.msra.mxu1 %v3385_v63  ;;  %v3405_v63 = vpack.c.bf16 %v736_v55, %v732_v54  ;;  %v772_v54 = vld [vmem:[#allocation8 + $0x5d0] sm:$0xff] }
 0x25a   : > { %3388 = vmatprep.subr.bf16.mxu1 %v3387_v19  ;;  %v3407_v19 = vpack.c.bf16 %v745_v59, %v741_v58  ;;  %v776_v55 = vld [vmem:[#allocation8 + $0x5f0] sm:$0xff]  ;;  %v781_v58 = vld [vmem:[#allocation8 + $0x618] sm:$0xff] }
 0x25b   : > { %3514 = vmatpush1.bf16.msra.mxu0 %v3513_v0  ;;  %v3533_v0 = vpack.c.bf16 %v1824_v57, %v1820_v16  ;;  %v1860_v16 = vld [vmem:[#allocation8 + $0x15c0] sm:$0xff]  ;;  %v785_v59 = vld [vmem:[#allocation8 + $0x638] sm:$0xff] }
 0x25c   : > { %3516 = vmatprep.subr.bf16.mxu0 %v3515_v4  ;;  %v3535_v4 = vpack.c.bf16 %v1833_v61, %v1829_v60  ;;  %v1864_v57 = vld [vmem:[#allocation8 + $0x15e0] sm:$0xff]  ;;  %v1869_v60 = vld [vmem:[#allocation8 + $0x1608] sm:$0xff] }
 0x25d   : > { %3390 = vmatpush1.bf16.msra.mxu1 %v3389_v9  ;;  %v3409_v9 = vpack.c.bf16 %v744_v2, %v740_v1  ;;  %v1873_v61 = vld [vmem:[#allocation8 + $0x1628] sm:$0xff]  ;;  %v784_v1 = vld [vmem:[#allocation8 + $0x630] sm:$0xff]  ;;  %v1868_v2 = vld [vmem:[#allocation8 + $0x1600] sm:$0xff] }
 0x25e   : > { %3392 = vmatprep.subr.bf16.mxu1 %v3391_v11  ;;  %v3411_v11 = vpack.c.bf16 %v753_v6, %v749_v30  ;;  %v793_v30 = vld [vmem:[#allocation8 + $0x678] sm:$0xff]  ;;  %v1877_v6 = vld [vmem:[#allocation8 + $0x1648] sm:$0xff] }
 0x25f   : > { %3518 = vmatpush1.bf16.msra.mxu0 %v3517_v10  ;;  %v3537_v10 = vpack.c.bf16 %v1832_v5, %v1828_v3  ;;  %v3555_v3 = vpack.c.bf16 %v1873_v61, %v1869_v60  ;;  %v789_v5 = vld [vmem:[#allocation8 + $0x658] sm:$0xff]  ;;  %v1913_v60 = vld [vmem:[#allocation8 + $0x1768] sm:$0xff] }
 0x260   : > { %3520 = vmatprep.subr.bf16.mxu0 %v3519_v15  ;;  %v3539_v15 = vpack.c.bf16 %v1841_v8, %v1837_v7  ;;  %v1881_v7 = vld [vmem:[#allocation8 + $0x1668] sm:$0xff] }
 0x261   : > { %3394 = vmatpush1.bf16.msra.mxu1 %v3393_v24  ;;  %v3413_v24 = vpack.c.bf16 %v752_v13, %v748_v12  ;;  %v792_v12 = vld [vmem:[#allocation8 + $0x670] sm:$0xff]  ;;  %v1876_v13 = vld [vmem:[#allocation8 + $0x1640] sm:$0xff] }
 0x262   : > { %3396 = vmatprep.subr.bf16.mxu1 %v3395_v26  ;;  %v3415_v26 = vpack.c.bf16 %v761_v21, %v757_v20  ;;  %v801_v20 = vld [vmem:[#allocation8 + $0x6b8] sm:$0xff]  ;;  %v1885_v21 = vld [vmem:[#allocation8 + $0x1688] sm:$0xff] }
 0x263   : > { %3522 = vmatpush1.bf16.msra.mxu0 %v3521_v25  ;;  %v3541_v25 = vpack.c.bf16 %v1840_v18, %v1836_v14  ;;  %v3559_v14 = vpack.c.bf16 %v1881_v7, %v1877_v6  ;;  %v797_v18 = vld [vmem:[#allocation8 + $0x698] sm:$0xff]  ;;  %v1921_v6 = vld [vmem:[#allocation8 + $0x17a8] sm:$0xff] }
 0x264   : > { %3524 = vmatprep.subr.bf16.mxu0 %v3523_v31  ;;  %1594 = vmatmul.mubr.f32.vlgmr.msra.gmra.mrb[2].mxu1 %v4043_v48  ;;  %v3543_v31 = vpack.c.bf16 %v1849_v23, %v1845_v22  ;;  %v1889_v22 = vld [vmem:[#allocation8 + $0x16a8] sm:$0xff] }
 0x265   : > { %3398 = vmatpush1.bf16.msra.mxu1 %v3397_v37  ;;  %1664 = vmatprep.mubr.f32.mxu1 %v4044_v62  ;;  %v3417_v37 = vpack.c.bf16 %v760_v28, %v756_v27  ;;  %v3425_v62 = vpack.c.bf16 %v776_v55, %v772_v54  ;;  %v800_v27 = vld [vmem:[#allocation8 + $0x6b0] sm:$0xff]  ;;  %v1884_v28 = vld [vmem:[#allocation8 + $0x1680] sm:$0xff] }
 0x266   : > { %1997 = vmatmul.mubr.f32.vlgmr.msra.gmra.mrb[0].mxu0 %v1671_v38  ;;  %3400 = vmatprep.subr.bf16.mxu1 %v3399_v40  ;;  %v3545_v38 = vpack.c.bf16 %v1848_v32, %v1844_v29  ;;  %v764_v40 = vld [vmem:[#allocation8 + $0x590] sm:$0xff]  ;;  %v3563_v29 = vpack.c.bf16 %v1889_v22, %v1885_v21  ;;  %v805_v32 = vld [vmem:[#allocation8 + $0x6d8] sm:$0xff]  ;;  %v1900_v55 = vld [vmem:[#allocation8 + $0x1700] sm:$0xff] }
 0x267   : > { %3526 = vmatpush1.bf16.msra.mxu0 %v3525_v39  ;;  %2067 = vmatprep.mubr.f32.mxu0 %v4938_v51  ;;  %v3419_v39 = vpack.c.bf16 %v769_v34, %v765_v33  ;;  %v809_v33 = vld [vmem:[#allocation8 + $0x6f8] sm:$0xff]  ;;  %v1893_v34 = vld [vmem:[#allocation8 + $0x16c8] sm:$0xff]  ;;  %v816_v54 = vld [vmem:[#allocation8 + $0x730] sm:$0xff] }
 0x268   : > { %3528 = vmatprep.subr.bf16.mxu0 %v3527_v44  ;;  %v3547_v44 = vpack.c.bf16 %v1857_v36, %v1853_v35  ;;  %v1897_v35 = vld [vmem:[#allocation8 + $0x16e8] sm:$0xff] }
 0x269   : > { %3402 = vmatpush1.bf16.msra.mxu1 %v3401_v52  ;;  %v3421_v52 = vpack.c.bf16 %v768_v41, %v764_v40  ;;  %v808_v40 = vld [vmem:[#allocation8 + $0x6f0] sm:$0xff]  ;;  %v1892_v41 = vld [vmem:[#allocation8 + $0x16c0] sm:$0xff]  ;;  %v1929_v21 = vld [vmem:[#allocation8 + $0x17e8] sm:$0xff] }
 0x26a   : > { %3404 = vmatprep.subr.bf16.mxu1 %v3403_v53  ;;  %v3423_v53 = vpack.c.bf16 %v777_v47, %v773_v46  ;;  %v817_v46 = vld [vmem:[#allocation8 + $0x738] sm:$0xff]  ;;  %v1901_v47 = vld [vmem:[#allocation8 + $0x1708] sm:$0xff] }
 0x26b   : > { %3530 = vmatpush1.bf16.msra.mxu0 %v3529_v17  ;;  %v3549_v17 = vpack.c.bf16 %v1856_v45, %v1852_v42  ;;  %v3567_v42 = vpack.c.bf16 %v1897_v35, %v1893_v34  ;;  %v813_v45 = vld [vmem:[#allocation8 + $0x718] sm:$0xff] }
 0x26c   : > { %3532 = vmatprep.subr.bf16.mxu0 %v3531_v56  ;;  %v3551_v56 = vpack.c.bf16 %v1865_v50, %v1861_v49  ;;  %v1905_v49 = vld [vmem:[#allocation8 + $0x1728] sm:$0xff] }
 0x26d   : > { %3406 = vmatpush1.bf16.msra.mxu1 %v3405_v63  ;;  %v3553_v63 = vpack.c.bf16 %v1864_v57, %v1860_v16  ;;  %v3571_v16 = vpack.c.bf16 %v1905_v49, %v1901_v47  ;;  %v821_v57 = vld [vmem:[#allocation8 + $0x758] sm:$0xff]  ;;  %v4045_v49 = vld [vmem:[%s4878_s13 + $0x10] sm:$0xff] }
 0x26e   : > { %3408 = vmatprep.subr.bf16.mxu1 %v3407_v19  ;;  %v780_v19 = vld [vmem:[#allocation8 + $0x610] sm:$0xff]  ;;  %v1699_v47 = vld [vmem:[#allocation8 + $0x10b8] sm:$0xff] }
 0x26f   : > { %3534 = vmatpush1.bf16.msra.mxu0 %v3533_v0  ;;  %v3427_v0 = vpack.c.bf16 %v785_v59, %v781_v58  ;;  %v3429_v8 = vpack.c.bf16 %v784_v1, %v780_v19  ;;  %v825_v58 = vld [vmem:[#allocation8 + $0x778] sm:$0xff]  ;;  %v1909_v59 = vld [vmem:[#allocation8 + $0x1748] sm:$0xff]  ;;  %v824_v19 = vld [vmem:[#allocation8 + $0x770] sm:$0xff] }
 0x270   : > { %3536 = vmatprep.subr.bf16.mxu0 %v3535_v4  ;;  %v1872_v4 = vld [vmem:[#allocation8 + $0x1620] sm:$0xff] }
 0x271   : > { %3410 = vmatpush1.bf16.msra.mxu1 %v3409_v9  ;;  %v3557_v9 = vpack.c.bf16 %v1872_v4, %v1868_v2  ;;  %v1908_v1 = vld [vmem:[#allocation8 + $0x1740] sm:$0xff]  ;;  %v3575_v2 = vpack.c.bf16 %v1913_v60, %v1909_v59  ;;  %v829_v4 = vld [vmem:[#allocation8 + $0x798] sm:$0xff]  ;;  %v4046_v60 = vld [vmem:[%s4891_s30 + $0x8] sm:$0xff] }
 0x272   : > { %3412 = vmatprep.subr.bf16.mxu1 %v3411_v11  ;;  %v788_v11 = vld [vmem:[#allocation8 + $0x650] sm:$0xff] }
 0x273   : > { %3538 = vmatpush1.bf16.msra.mxu0 %v3537_v10  ;;  %v3431_v10 = vpack.c.bf16 %v793_v30, %v789_v5  ;;  %v3433_v23 = vpack.c.bf16 %v792_v12, %v788_v11  ;;  %v833_v5 = vld [vmem:[#allocation8 + $0x7b8] sm:$0xff]  ;;  %v1917_v30 = vld [vmem:[#allocation8 + $0x1788] sm:$0xff]  ;;  %v832_v11 = vld [vmem:[#allocation8 + $0x7b0] sm:$0xff] }
 0x274   : > { %3540 = vmatprep.subr.bf16.mxu0 %v3539_v15  ;;  %v1880_v15 = vld [vmem:[#allocation8 + $0x1660] sm:$0xff] }
 0x275   : > { %3414 = vmatpush1.bf16.msra.mxu1 %v3413_v24  ;;  %v3561_v24 = vpack.c.bf16 %v1880_v15, %v1876_v13  ;;  %v1916_v12 = vld [vmem:[#allocation8 + $0x1780] sm:$0xff]  ;;  %v3579_v13 = vpack.c.bf16 %v1921_v6, %v1917_v30  ;;  %v837_v15 = vld [vmem:[#allocation8 + $0x7d8] sm:$0xff]  ;;  %v1702_v30 = vld [vmem:[#allocation8 + $0x10d0] sm:$0xff] }
 0x276   : > { %3416 = vmatprep.subr.bf16.mxu1 %v3415_v26  ;;  %v796_v26 = vld [vmem:[#allocation8 + $0x690] sm:$0xff] }
 0x277   : > { %3542 = vmatpush1.bf16.msra.mxu0 %v3541_v25  ;;  %v4942_v43 = vpop.f32.mrb[0].mxu1  ;;  %v3435_v25 = vpack.c.bf16 %v801_v20, %v797_v18  ;;  %v3437_v36 = vpack.c.bf16 %v800_v27, %v796_v26  ;;  %v841_v18 = vld [vmem:[#allocation8 + $0x7f8] sm:$0xff]  ;;  %v1925_v20 = vld [vmem:[#allocation8 + $0x17c8] sm:$0xff]  ;;  %v840_v26 = vld [vmem:[#allocation8 + $0x7f0] sm:$0xff] }
 0x278   : > { %3544 = vmatprep.subr.bf16.mxu0 %v3543_v31  ;;  %v4944_v48 = vpop.f32.mrb[1].mxu1  ;;  %v1888_v31 = vld [vmem:[#allocation8 + $0x16a0] sm:$0xff] }
 0x279   : > { %3418 = vmatpush1.bf16.msra.mxu1 %v3417_v37  ;;  %v3565_v37 = vpack.c.bf16 %v1888_v31, %v1884_v28  ;;  %v1924_v27 = vld [vmem:[#allocation8 + $0x17c0] sm:$0xff]  ;;  %v3583_v28 = vpack.c.bf16 %v1929_v21, %v1925_v20  ;;  %v1679_v31 = vld [vmem:[#allocation8 + $0x1018] sm:$0xff]  ;;  %v1710_v20 = vld [vmem:[#allocation8 + $0x1110] sm:$0xff] }
 0x27a   : > { %3420 = vmatprep.subr.bf16.mxu1 %v3419_v39  ;;  %v804_v39 = vld [vmem:[#allocation8 + $0x6d0] sm:$0xff] }
 0x27b   : > { %3546 = vmatpush1.bf16.msra.mxu0 %v3545_v38  ;;  %v3439_v38 = vpack.c.bf16 %v809_v33, %v805_v32  ;;  %v3441_v50 = vpack.c.bf16 %v808_v40, %v804_v39  ;;  %v1683_v32 = vld [vmem:[#allocation8 + $0x1038] sm:$0xff] }
 0x27c   : > { %3548 = vmatprep.subr.bf16.mxu0 %v3547_v44  ;;  %v1896_v44 = vld [vmem:[#allocation8 + $0x16e0] sm:$0xff]  ;;  %v3587_v35 = vpack.c.bf16 %v1683_v32, %v1679_v31  ;;  %v1691_v39 = vld [vmem:[#allocation8 + $0x1078] sm:$0xff] }
 0x27d   : > { %3422 = vmatpush1.bf16.msra.mxu1 %v3421_v52  ;;  %v3569_v52 = vpack.c.bf16 %v1896_v44, %v1892_v41  ;;  %v4947_v41 = vld [vmem:[%s4891_s30 + $0x10] sm:$0xff] }
 0x27e   : > { %3424 = vmatprep.subr.bf16.mxu1 %v3423_v53  ;;  %v812_v53 = vld [vmem:[#allocation8 + $0x710] sm:$0xff] }
 0x27f   : > { %3550 = vmatpush1.bf16.msra.mxu0 %v3549_v17  ;;  %v3443_v17 = vpack.c.bf16 %v817_v46, %v813_v45  ;;  %v3445_v61 = vpack.c.bf16 %v816_v54, %v812_v53  ;;  %v1686_v44 = vld [vmem:[#allocation8 + $0x1050] sm:$0xff]  ;;  %v1695_v46 = vld [vmem:[#allocation8 + $0x1098] sm:$0xff]  ;;  %v2246_v54 = vld [vmem:[#allocation11] sm:$0xff] }
 0x280   : > { %3552 = vmatprep.subr.bf16.mxu0 %v3551_v56  ;;  %v1904_v56 = vld [vmem:[#allocation8 + $0x1720] sm:$0xff]  ;;  %v1690_v45 = vld [vmem:[#allocation8 + $0x1070] sm:$0xff]  ;;  %v3595_v59 = vpack.c.bf16 %v1699_v47, %v1695_v46 }
 0x281   : > { %3426 = vmatpush1.bf16.msra.mxu1 %v3425_v62  ;;  %v3573_v62 = vpack.c.bf16 %v1904_v56, %v1900_v55  ;;  %v2249_v53 = vld [vmem:[#allocation11 + $0x18] sm:$0xff]  ;;  %v3593_v55 = vpack.c.bf16 %v1690_v45, %v1686_v44  ;;  %v2248_v56 = vld [vmem:[#allocation11 + $0x10] sm:$0xff] }
 0x282   : > { %3428 = vmatprep.subr.bf16.mxu1 %v3427_v0  ;;  %v820_v0 = vld [vmem:[#allocation8 + $0x750] sm:$0xff]  ;;  %v1731_v44 = vld [vmem:[#allocation8 + $0x11b8] sm:$0xff] }
 0x283   : > { %3554 = vmatpush1.bf16.msra.mxu0 %v3553_v63  ;;  %v3447_v63 = vpack.c.bf16 %v825_v58, %v821_v57  ;;  %v3449_v7 = vpack.c.bf16 %v824_v19, %v820_v0  ;;  %v2251_v57 = vld [vmem:[#allocation11 + $0x28] sm:$0xff]  ;;  %v2253_v58 = vld [vmem:[#allocation11 + $0x38] sm:$0xff]  ;;  %v2252_v0 = vld [vmem:[#allocation11 + $0x30] sm:$0xff] }
 0x284   : > { %3556 = vmatprep.subr.bf16.mxu0 %v3555_v3  ;;  %v1912_v3 = vld [vmem:[#allocation8 + $0x1760] sm:$0xff]  ;;  %v2255_v19 = vld [vmem:[#allocation11 + $0x48] sm:$0xff] }
 0x285   : > { %3430 = vmatpush1.bf16.msra.mxu1 %v3429_v8  ;;  %v3577_v8 = vpack.c.bf16 %v1912_v3, %v1908_v1  ;;  %v1703_v1 = vld [vmem:[#allocation8 + $0x10d8] sm:$0xff]  ;;  %v1726_v47 = vld [vmem:[#allocation8 + $0x1190] sm:$0xff] }
 0x286   : > { %3432 = vmatprep.subr.bf16.mxu1 %v3431_v10  ;;  %v828_v10 = vld [vmem:[#allocation8 + $0x790] sm:$0xff]  ;;  %v2257_v3 = vld [vmem:[#allocation11 + $0x58] sm:$0xff] }
 0x287   : > { %3558 = vmatpush1.bf16.msra.mxu0 %v3557_v9  ;;  %v3451_v9 = vpack.c.bf16 %v833_v5, %v829_v4  ;;  %v3453_v22 = vpack.c.bf16 %v832_v11, %v828_v10  ;;  %v3723_v6 = vpack.c.bf16 %v2257_v3, %v2255_v19  ;;  %v1706_v10 = vld [vmem:[#allocation8 + $0x10f0] sm:$0xff]  ;;  %v1747_v3 = vld [vmem:[#allocation8 + $0x1238] sm:$0xff] }
 0x288   : > { %3560 = vmatprep.subr.bf16.mxu0 %v3559_v14  ;;  %v1920_v14 = vld [vmem:[#allocation8 + $0x17a0] sm:$0xff]  ;;  %v2259_v11 = vld [vmem:[#allocation11 + $0x68] sm:$0xff] }
 0x289   : > { %3434 = vmatpush1.bf16.msra.mxu1 %v3433_v23  ;;  %v3581_v23 = vpack.c.bf16 %v1920_v14, %v1916_v12  ;;  %v2261_v12 = vld [vmem:[#allocation11 + $0x78] sm:$0xff]  ;;  %v2275_v19 = vld [vmem:[#allocation11 + $0xe8] sm:$0xff] }
 0x28a   : > { %3436 = vmatprep.subr.bf16.mxu1 %v3435_v25  ;;  %v836_v25 = vld [vmem:[#allocation8 + $0x7d0] sm:$0xff]  ;;  %v1715_v14 = vld [vmem:[#allocation8 + $0x1138] sm:$0xff]  ;;  %v3727_v21 = vpack.c.bf16 %v2261_v12, %v2259_v11 }
 0x28b   : > { %3562 = vmatpush1.bf16.msra.mxu0 %v3561_v24  ;;  %v3455_v24 = vpack.c.bf16 %v841_v18, %v837_v15  ;;  %v3457_v33 = vpack.c.bf16 %v840_v26, %v836_v25  ;;  %v3601_v18 = vpack.c.bf16 %v1706_v10, %v1702_v30  ;;  %v1714_v25 = vld [vmem:[#allocation8 + $0x1130] sm:$0xff]  ;;  %v2281_v12 = vld [vmem:[#allocation11 + $0x118] sm:$0xff] }
 0x28c   : > { %3564 = vmatprep.subr.bf16.mxu0 %v3563_v29  ;;  %v1928_v29 = vld [vmem:[#allocation8 + $0x17e0] sm:$0xff]  ;;  %v2263_v26 = vld [vmem:[#allocation11 + $0x88] sm:$0xff]  ;;  %v3605_v32 = vpack.c.bf16 %v1714_v25, %v1710_v20 }
 0x28d   : > { %3438 = vmatpush1.bf16.msra.mxu1 %v3437_v36  ;;  %v3585_v34 = vpack.c.bf16 %v1928_v29, %v1924_v27  ;;  %v1678_v36 = vld [vmem:[#allocation8 + $0x1010] sm:$0xff]  ;;  %v2265_v27 = vld [vmem:[#allocation11 + $0x98] sm:$0xff] }
 0x28e   : > { %3440 = vmatprep.subr.bf16.mxu1 %v3439_v38  ;;  %v1687_v38 = vld [vmem:[#allocation8 + $0x1058] sm:$0xff]  ;;  %v1742_v30 = vld [vmem:[#allocation8 + $0x1210] sm:$0xff] }
 0x28f   : > { %3566 = vmatpush1.bf16.msra.mxu0 %v3565_v37  ;;  %v1682_v37 = vld [vmem:[#allocation8 + $0x1030] sm:$0xff]  ;;  %v1723_v29 = vld [vmem:[#allocation8 + $0x1178] sm:$0xff] }
 0x290   : > { %3568 = vmatprep.subr.bf16.mxu0 %v3567_v42  ;;  %v3589_v40 = vpack.c.bf16 %v1682_v37, %v1678_v36  ;;  %v3591_v42 = vpack.c.bf16 %v1691_v39, %v1687_v38  ;;  %v2264_v36 = vld [vmem:[#allocation11 + $0x90] sm:$0xff]  ;;  %v2267_v39 = vld [vmem:[#allocation11 + $0xa8] sm:$0xff] }
 0x291   : > { %3442 = vmatpush1.bf16.msra.mxu1 %v3441_v50  ;;  %v1694_v50 = vld [vmem:[#allocation8 + $0x1090] sm:$0xff] }
 0x292   : > { %3444 = vmatprep.subr.bf16.mxu1 %v3443_v17  ;;  %v2247_v17 = vld [vmem:[#allocation11 + $0x8] sm:$0xff] }
 0x293   : > { %3570 = vmatpush1.bf16.msra.mxu0 %v3569_v52  ;;  %v1698_v52 = vld [vmem:[#allocation8 + $0x10b0] sm:$0xff] }
 0x294   : > { %3572 = vmatprep.subr.bf16.mxu0 %v3571_v16  ;;  %v3715_v16 = vpack.c.bf16 %v2249_v53, %v2247_v17  ;;  %v3597_v5 = vpack.c.bf16 %v1698_v52, %v1694_v50  ;;  %v1722_v38 = vld [vmem:[#allocation8 + $0x1170] sm:$0xff]  ;;  %v2266_v50 = vld [vmem:[#allocation11 + $0xa0] sm:$0xff] }
 0x295   : > { %3446 = vmatpush1.bf16.msra.mxu1 %v3445_v61  ;;  %v3717_v61 = vpack.c.bf16 %v2248_v56, %v2246_v54  ;;  %v2268_v52 = vld [vmem:[#allocation11 + $0xb0] sm:$0xff]  ;;  %v2271_v54 = vld [vmem:[#allocation11 + $0xc8] sm:$0xff] }
 0x296   : > { %3448 = vmatprep.subr.bf16.mxu1 %v3447_v63  ;;  %v2250_v63 = vld [vmem:[#allocation11 + $0x20] sm:$0xff]  ;;  %v1730_v53 = vld [vmem:[#allocation8 + $0x11b0] sm:$0xff]  ;;  %v1739_v56 = vld [vmem:[#allocation8 + $0x11f8] sm:$0xff] }
 0x297   : > { %3574 = vmatpush1.bf16.msra.mxu0 %v3573_v62  ;;  %v3719_v62 = vpack.c.bf16 %v2253_v58, %v2251_v57  ;;  %v3721_v4 = vpack.c.bf16 %v2252_v0, %v2250_v63  ;;  %v3737_v57 = vpack.c.bf16 %v2268_v52, %v2266_v50  ;;  %v3613_v58 = vpack.c.bf16 %v1730_v53, %v1726_v47  ;;  %v1738_v0 = vld [vmem:[#allocation8 + $0x11f0] sm:$0xff]  ;;  %v2286_v50 = vld [vmem:[#allocation11 + $0x140] sm:$0xff] }
 0x298   : > { %3576 = vmatprep.subr.bf16.mxu0 %v3575_v2  ;;  %v1707_v2 = vld [vmem:[#allocation8 + $0x10f8] sm:$0xff]  ;;  %v1746_v10 = vld [vmem:[#allocation8 + $0x1230] sm:$0xff] }
 0x299   : > { %3450 = vmatpush1.bf16.msra.mxu1 %v3449_v7  ;;  %v2254_v7 = vld [vmem:[#allocation11 + $0x40] sm:$0xff]  ;;  %v2279_v11 = vld [vmem:[#allocation11 + $0x108] sm:$0xff]  ;;  %v2288_v52 = vld [vmem:[#allocation11 + $0x150] sm:$0xff] }
 0x29a   : > { %3452 = vmatprep.subr.bf16.mxu1 %v3451_v9  ;;  %v3599_v9 = vpack.c.bf16 %v1707_v2, %v1703_v1  ;;  %v2277_v1 = vld [vmem:[#allocation11 + $0xf8] sm:$0xff]  ;;  %v1750_v20 = vld [vmem:[#allocation8 + $0x1250] sm:$0xff] }
 0x29b   : > { %3578 = vmatpush1.bf16.msra.mxu0 %v3577_v8  ;;  %v2256_v8 = vld [vmem:[#allocation11 + $0x50] sm:$0xff] }
 0x29c   : > { %3580 = vmatprep.subr.bf16.mxu0 %v3579_v13  ;;  %v1711_v13 = vld [vmem:[#allocation8 + $0x1118] sm:$0xff]  ;;  %v3725_v15 = vpack.c.bf16 %v2256_v8, %v2254_v7  ;;  %v2274_v7 = vld [vmem:[#allocation11 + $0xe0] sm:$0xff]  ;;  %v1754_v25 = vld [vmem:[#allocation8 + $0x1270] sm:$0xff] }
 0x29d   : > { %3454 = vmatpush1.bf16.msra.mxu1 %v3453_v22  ;;  %v2258_v22 = vld [vmem:[#allocation11 + $0x60] sm:$0xff]  ;;  %v1743_v2 = vld [vmem:[#allocation8 + $0x1218] sm:$0xff]  ;;  %v1766_v47 = vld [vmem:[#allocation8 + $0x12d0] sm:$0xff] }
 0x29e   : > { %3456 = vmatprep.subr.bf16.mxu1 %v3455_v24  ;;  %v3603_v24 = vpack.c.bf16 %v1715_v14, %v1711_v13  ;;  %v2276_v8 = vld [vmem:[#allocation11 + $0xf0] sm:$0xff] }
 0x29f   : > { %3582 = vmatpush1.bf16.msra.mxu0 %v3581_v23  ;;  %v2260_v23 = vld [vmem:[#allocation11 + $0x70] sm:$0xff] }
 0x2a0   : > { %3584 = vmatprep.subr.bf16.mxu0 %v3583_v28  ;;  %v1719_v28 = vld [vmem:[#allocation8 + $0x1158] sm:$0xff]  ;;  %v3729_v31 = vpack.c.bf16 %v2260_v23, %v2258_v22  ;;  %v2278_v22 = vld [vmem:[#allocation11 + $0x100] sm:$0xff]  ;;  %v1770_v53 = vld [vmem:[#allocation8 + $0x12f0] sm:$0xff] }
 0x2a1   : > { %3458 = vmatpush1.bf16.msra.mxu1 %v3457_v33  ;;  %v1718_v33 = vld [vmem:[#allocation8 + $0x1150] sm:$0xff]  ;;  %v3607_v37 = vpack.c.bf16 %v1723_v29, %v1719_v28  ;;  %v1751_v13 = vld [vmem:[#allocation8 + $0x1258] sm:$0xff] }
 0x2a2   : > { %3588 = vmatprep.subr.bf16.mxu1 %v3587_v35  ;;  %v2262_v35 = vld [vmem:[#allocation11 + $0x80] sm:$0xff]  ;;  %v3609_v46 = vpack.c.bf16 %v1722_v38, %v1718_v33  ;;  %v1755_v14 = vld [vmem:[#allocation8 + $0x1278] sm:$0xff]  ;;  %v1758_v33 = vld [vmem:[#allocation8 + $0x1290] sm:$0xff] }
 0x2a3   : > { %3586 = vmatpush1.bf16.msra.mxu0 %v3585_v34  ;;  %v3731_v34 = vpack.c.bf16 %v2265_v27, %v2263_v26  ;;  %v3733_v45 = vpack.c.bf16 %v2264_v36, %v2262_v35  ;;  %v2280_v23 = vld [vmem:[#allocation11 + $0x110] sm:$0xff]  ;;  %v2283_v26 = vld [vmem:[#allocation11 + $0x128] sm:$0xff]  ;;  %v2285_v27 = vld [vmem:[#allocation11 + $0x138] sm:$0xff] }
 0x2a4   : > { %1665 = vmatmul.mubr.f32.vlgmr.msra.gmra.mrb[2].mxu1 %v4045_v49  ;;  %3716 = vmatprep.subr.bf16.mxu0 %v3715_v16  ;;  %v1735_v16 = vld [vmem:[#allocation8 + $0x11d8] sm:$0xff]  ;;  %v2282_v35 = vld [vmem:[#allocation11 + $0x120] sm:$0xff]  ;;  %v1762_v38 = vld [vmem:[#allocation8 + $0x12b0] sm:$0xff] }
 0x2a5   : > { %3590 = vmatpush1.bf16.msra.mxu1 %v3589_v40  ;;  %2138 = vmatprep.mubr.f32.mxu1 %v4046_v60  ;;  %v2269_v40 = vld [vmem:[#allocation11 + $0xb8] sm:$0xff]  ;;  %v3615_v63 = vpack.c.bf16 %v1739_v56, %v1735_v16  ;;  %v2284_v36 = vld [vmem:[#allocation11 + $0x130] sm:$0xff] }
 0x2a6   : > { %2068 = vmatmul.mubr.f32.vlgmr.msra.gmra.mrb[0].mxu0 %v4947_v41  ;;  %3592 = vmatprep.subr.bf16.mxu1 %v3591_v42  ;;  %v1727_v42 = vld [vmem:[#allocation8 + $0x1198] sm:$0xff]  ;;  %v3735_v49 = vpack.c.bf16 %v2269_v40, %v2267_v39  ;;  %v2287_v39 = vld [vmem:[#allocation11 + $0x148] sm:$0xff] }
 0x2a7   : > { %3718 = vmatpush1.bf16.msra.mxu0 %v3717_v61  ;;  %v3611_v17 = vpack.c.bf16 %v1731_v44, %v1727_v42  ;;  %v2270_v61 = vld [vmem:[#allocation11 + $0xc0] sm:$0xff]  ;;  %v1759_v28 = vld [vmem:[#allocation8 + $0x1298] sm:$0xff] }
 0x2a8   : > { %3720 = vmatprep.subr.bf16.mxu0 %v3719_v62  ;;  %v2272_v62 = vld [vmem:[#allocation11 + $0xd0] sm:$0xff]  ;;  %v2289_v40 = vld [vmem:[#allocation11 + $0x158] sm:$0xff] }
 0x2a9   : > { %3594 = vmatpush1.bf16.msra.mxu1 %v3593_v55  ;;  %v2273_v55 = vld [vmem:[#allocation11 + $0xd8] sm:$0xff] }
 0x2aa   : > { %3596 = vmatprep.subr.bf16.mxu1 %v3595_v59  ;;  %v1734_v59 = vld [vmem:[#allocation8 + $0x11d0] sm:$0xff]  ;;  %v3739_v60 = vpack.c.bf16 %v2273_v55, %v2271_v54  ;;  %v1763_v29 = vld [vmem:[#allocation8 + $0x12b8] sm:$0xff] }
 0x2ab   : > { %3722 = vmatpush1.bf16.msra.mxu0 %v3721_v4  ;;  %v3741_v4 = vpack.c.bf16 %v2272_v62, %v2270_v61  ;;  %v1767_v42 = vld [vmem:[#allocation8 + $0x12d8] sm:$0xff]  ;;  %v2291_v54 = vld [vmem:[#allocation11 + $0x168] sm:$0xff]  ;;  %v2290_v61 = vld [vmem:[#allocation11 + $0x160] sm:$0xff] }
 0x2ac   : > { %3724 = vmatprep.subr.bf16.mxu0 %v3723_v6  ;;  %v3743_v6 = vpack.c.bf16 %v2277_v1, %v2275_v19  ;;  %v1771_v44 = vld [vmem:[#allocation8 + $0x12f8] sm:$0xff]  ;;  %v2295_v19 = vld [vmem:[#allocation11 + $0x188] sm:$0xff] }
 0x2ad   : > { %3598 = vmatpush1.bf16.msra.mxu1 %v3597_v5  ;;  %v3617_v5 = vpack.c.bf16 %v1738_v0, %v1734_v59  ;;  %v2293_v55 = vld [vmem:[#allocation11 + $0x178] sm:$0xff]  ;;  %v1774_v59 = vld [vmem:[#allocation8 + $0x1310] sm:$0xff] }
 0x2ae   : > { %3600 = vmatprep.subr.bf16.mxu1 %v3599_v9  ;;  %v3619_v9 = vpack.c.bf16 %v1747_v3, %v1743_v2  ;;  %v1775_v16 = vld [vmem:[#allocation8 + $0x1318] sm:$0xff]  ;;  %v1778_v0 = vld [vmem:[#allocation8 + $0x1330] sm:$0xff] }
 0x2af   : > { %3726 = vmatpush1.bf16.msra.mxu0 %v3725_v15  ;;  %v3745_v15 = vpack.c.bf16 %v2276_v8, %v2274_v7  ;;  %v1779_v56 = vld [vmem:[#allocation8 + $0x1338] sm:$0xff]  ;;  %v2294_v7 = vld [vmem:[#allocation11 + $0x180] sm:$0xff] }
 0x2b0   : > { %3728 = vmatprep.subr.bf16.mxu0 %v3727_v21  ;;  %v3747_v21 = vpack.c.bf16 %v2281_v12, %v2279_v11  ;;  %v2292_v62 = vld [vmem:[#allocation11 + $0x170] sm:$0xff]  ;;  %v2297_v1 = vld [vmem:[#allocation11 + $0x198] sm:$0xff]  ;;  %v2299_v11 = vld [vmem:[#allocation11 + $0x1a8] sm:$0xff] }
 0x2b1   : > { %3602 = vmatpush1.bf16.msra.mxu1 %v3601_v18  ;;  %v3621_v18 = vpack.c.bf16 %v1746_v10, %v1742_v30  ;;  %v1783_v2 = vld [vmem:[#allocation8 + $0x1358] sm:$0xff]  ;;  %v1782_v30 = vld [vmem:[#allocation8 + $0x1350] sm:$0xff] }
 0x2b2   : > { %3604 = vmatprep.subr.bf16.mxu1 %v3603_v24  ;;  %v3623_v24 = vpack.c.bf16 %v1755_v14, %v1751_v13  ;;  %v1787_v3 = vld [vmem:[#allocation8 + $0x1378] sm:$0xff]  ;;  %v1786_v10 = vld [vmem:[#allocation8 + $0x1370] sm:$0xff] }
 0x2b3   : > { %3730 = vmatpush1.bf16.msra.mxu0 %v3729_v31  ;;  %v3749_v31 = vpack.c.bf16 %v2280_v23, %v2278_v22  ;;  %v2296_v8 = vld [vmem:[#allocation11 + $0x190] sm:$0xff]  ;;  %v2301_v12 = vld [vmem:[#allocation11 + $0x1b8] sm:$0xff]  ;;  %v2298_v22 = vld [vmem:[#allocation11 + $0x1a0] sm:$0xff] }
 0x2b4   : > { %3732 = vmatprep.subr.bf16.mxu0 %v3731_v34  ;;  %v3751_v34 = vpack.c.bf16 %v2285_v27, %v2283_v26  ;;  %v1791_v13 = vld [vmem:[#allocation8 + $0x1398] sm:$0xff]  ;;  %v2303_v26 = vld [vmem:[#allocation11 + $0x1c8] sm:$0xff] }
 0x2b5   : > { %3606 = vmatpush1.bf16.msra.mxu1 %v3605_v32  ;;  %v3625_v32 = vpack.c.bf16 %v1754_v25, %v1750_v20  ;;  %v1795_v14 = vld [vmem:[#allocation8 + $0x13b8] sm:$0xff]  ;;  %v1790_v20 = vld [vmem:[#allocation8 + $0x1390] sm:$0xff] }
 0x2b6   : > { %3608 = vmatprep.subr.bf16.mxu1 %v3607_v37  ;;  %v3627_v37 = vpack.c.bf16 %v1763_v29, %v1759_v28  ;;  %v2300_v23 = vld [vmem:[#allocation11 + $0x1b0] sm:$0xff]  ;;  %v2305_v27 = vld [vmem:[#allocation11 + $0x1d8] sm:$0xff] }
 0x2b7   : > { %3734 = vmatpush1.bf16.msra.mxu0 %v3733_v45  ;;  %v3753_v45 = vpack.c.bf16 %v2284_v36, %v2282_v35  ;;  %v1794_v25 = vld [vmem:[#allocation8 + $0x13b0] sm:$0xff]  ;;  %v1799_v28 = vld [vmem:[#allocation8 + $0x13d8] sm:$0xff] }
 0x2b8   : > { %3736 = vmatprep.subr.bf16.mxu0 %v3735_v49  ;;  %v3755_v49 = vpack.c.bf16 %v2289_v40, %v2287_v39  ;;  %v1803_v29 = vld [vmem:[#allocation8 + $0x13f8] sm:$0xff]  ;;  %v1798_v35 = vld [vmem:[#allocation8 + $0x13d0] sm:$0xff] }
 0x2b9   : > { %3610 = vmatpush1.bf16.msra.mxu1 %v3609_v46  ;;  %v3629_v46 = vpack.c.bf16 %v1762_v38, %v1758_v33  ;;  %v3771_v33 = vpack.c.bf16 %v2305_v27, %v2303_v26  ;;  %v1802_v36 = vld [vmem:[#allocation8 + $0x13f0] sm:$0xff]  ;;  %v1811_v38 = vld [vmem:[#allocation8 + $0x1438] sm:$0xff]  ;;  %v2306_v27 = vld [vmem:[#allocation11 + $0x1e0] sm:$0xff] }
 0x2ba   : > { %3612 = vmatprep.subr.bf16.mxu1 %v3611_v17  ;;  %v3631_v17 = vpack.c.bf16 %v1771_v44, %v1767_v42  ;;  %v3649_v39 = vpack.c.bf16 %v1802_v36, %v1798_v35  ;;  %v1806_v42 = vld [vmem:[#allocation8 + $0x1410] sm:$0xff]  ;;  %v1875_v35 = vld [vmem:[#allocation8 + $0x1638] sm:$0xff] }
 0x2bb   : > { %3738 = vmatpush1.bf16.msra.mxu0 %v3737_v57  ;;  %v3757_v57 = vpack.c.bf16 %v2288_v52, %v2286_v50  ;;  %v1810_v44 = vld [vmem:[#allocation8 + $0x1430] sm:$0xff] }
 0x2bc   : > { %3740 = vmatprep.subr.bf16.mxu0 %v3739_v60  ;;  %v3759_v60 = vpack.c.bf16 %v2293_v55, %v2291_v54  ;;  %v1814_v50 = vld [vmem:[#allocation8 + $0x1450] sm:$0xff]  ;;  %v4047_v54 = vld [vmem:[%s4891_s30] sm:$0xff] }
 0x2bd   : > { %3614 = vmatpush1.bf16.msra.mxu1 %v3613_v58  ;;  %v3633_v58 = vpack.c.bf16 %v1770_v53, %v1766_v47  ;;  %v3653_v47 = vpack.c.bf16 %v1810_v44, %v1806_v42  ;;  %v1818_v52 = vld [vmem:[#allocation8 + $0x1470] sm:$0xff]  ;;  %v1827_v53 = vld [vmem:[#allocation8 + $0x14b8] sm:$0xff] }
 0x2be   : > { %3616 = vmatprep.subr.bf16.mxu1 %v3615_v63  ;;  %v3635_v63 = vpack.c.bf16 %v1779_v56, %v1775_v16  ;;  %v3657_v55 = vpack.c.bf16 %v1818_v52, %v1814_v50  ;;  %v1822_v56 = vld [vmem:[#allocation8 + $0x1490] sm:$0xff]  ;;  %v1883_v42 = vld [vmem:[#allocation8 + $0x1678] sm:$0xff] }
 0x2bf   : > { %3742 = vmatpush1.bf16.msra.mxu0 %v3741_v4  ;;  %v3761_v4 = vpack.c.bf16 %v2292_v62, %v2290_v61  ;;  %v1830_v62 = vld [vmem:[#allocation8 + $0x14d0] sm:$0xff] }
 0x2c0   : > { %3744 = vmatprep.subr.bf16.mxu0 %v3743_v6  ;;  %v3763_v6 = vpack.c.bf16 %v2297_v1, %v2295_v19  ;;  %v1843_v19 = vld [vmem:[#allocation8 + $0x1538] sm:$0xff]  ;;  %v2311_v44 = vld [vmem:[#allocation11 + $0x208] sm:$0xff] }
 0x2c1   : > { %3618 = vmatpush1.bf16.msra.mxu1 %v3617_v5  ;;  %v3637_v5 = vpack.c.bf16 %v1778_v0, %v1774_v59  ;;  %v1835_v59 = vld [vmem:[#allocation8 + $0x14f8] sm:$0xff]  ;;  %v1878_v50 = vld [vmem:[#allocation8 + $0x1650] sm:$0xff] }
 0x2c2   : > { %3620 = vmatprep.subr.bf16.mxu1 %v3619_v9  ;;  %v3639_v9 = vpack.c.bf16 %v1787_v3, %v1783_v2  ;;  %v1839_v0 = vld [vmem:[#allocation8 + $0x1518] sm:$0xff]  ;;  %v1838_v3 = vld [vmem:[#allocation8 + $0x1510] sm:$0xff] }
 0x2c3   : > { %3746 = vmatpush1.bf16.msra.mxu0 %v3745_v15  ;;  %v3765_v15 = vpack.c.bf16 %v2296_v8, %v2294_v7  ;;  %v3667_v2 = vpack.c.bf16 %v1843_v19, %v1839_v0  ;;  %v1846_v7 = vld [vmem:[#allocation8 + $0x1550] sm:$0xff]  ;;  %v1907_v0 = vld [vmem:[#allocation8 + $0x1738] sm:$0xff] }
 0x2c4   : > { %3748 = vmatprep.subr.bf16.mxu0 %v3747_v21  ;;  %v3767_v21 = vpack.c.bf16 %v2301_v12, %v2299_v11  ;;  %v1850_v8 = vld [vmem:[#allocation8 + $0x1570] sm:$0xff]  ;;  %v2302_v12 = vld [vmem:[#allocation11 + $0x1c0] sm:$0xff] }
 0x2c5   : > { %3622 = vmatpush1.bf16.msra.mxu1 %v3621_v18  ;;  %v3641_v18 = vpack.c.bf16 %v1786_v10, %v1782_v30  ;;  %v1859_v10 = vld [vmem:[#allocation8 + $0x15b8] sm:$0xff]  ;;  %v3673_v11 = vpack.c.bf16 %v1850_v8, %v1846_v7  ;;  %v1882_v52 = vld [vmem:[#allocation8 + $0x1670] sm:$0xff] }
 0x2c6   : > { %3624 = vmatprep.subr.bf16.mxu1 %v3623_v24  ;;  %v3643_v24 = vpack.c.bf16 %v1795_v14, %v1791_v13  ;;  %v2304_v13 = vld [vmem:[#allocation11 + $0x1d0] sm:$0xff] }
 0x2c7   : > { %3750 = vmatpush1.bf16.msra.mxu0 %v3749_v31  ;;  %v3769_v31 = vpack.c.bf16 %v2300_v23, %v2298_v22  ;;  %v1867_v22 = vld [vmem:[#allocation8 + $0x15f8] sm:$0xff]  ;;  %v2307_v23 = vld [vmem:[#allocation11 + $0x1e8] sm:$0xff] }
 0x2c8   : > { %3752 = vmatprep.subr.bf16.mxu0 %v3751_v34  ;;  %v3647_v34 = vpack.c.bf16 %v1803_v29, %v1799_v28  ;;  %v2308_v28 = vld [vmem:[#allocation11 + $0x1f0] sm:$0xff] }
 0x2c9   : > { %3626 = vmatpush1.bf16.msra.mxu1 %v3625_v32  ;;  %v3645_v32 = vpack.c.bf16 %v1794_v25, %v1790_v20  ;;  %v3773_v20 = vpack.c.bf16 %v2304_v13, %v2302_v12  ;;  %v1914_v7 = vld [vmem:[#allocation8 + $0x1770] sm:$0xff]  ;;  %v1919_v8 = vld [vmem:[#allocation8 + $0x1798] sm:$0xff] }
 0x2ca   : > { %3628 = vmatprep.subr.bf16.mxu1 %v3627_v37  ;;  %v1807_v37 = vld [vmem:[#allocation8 + $0x1418] sm:$0xff]  ;;  %v1918_v12 = vld [vmem:[#allocation8 + $0x1790] sm:$0xff] }
 0x2cb   : > { %3754 = vmatpush1.bf16.msra.mxu0 %v3753_v45  ;;  %v3651_v40 = vpack.c.bf16 %v1811_v38, %v1807_v37  ;;  %v1815_v45 = vld [vmem:[#allocation8 + $0x1458] sm:$0xff]  ;;  %v1870_v38 = vld [vmem:[#allocation8 + $0x1610] sm:$0xff] }
 0x2cc   : > { %3756 = vmatprep.subr.bf16.mxu0 %v3755_v49  ;;  %v1922_v13 = vld [vmem:[#allocation8 + $0x17b0] sm:$0xff] }
 0x2cd   : > { %3630 = vmatpush1.bf16.msra.mxu1 %v3629_v46  ;;  %v1819_v46 = vld [vmem:[#allocation8 + $0x1478] sm:$0xff] }
 0x2ce   : > { %3632 = vmatprep.subr.bf16.mxu1 %v3631_v17  ;;  %v3655_v49 = vpack.c.bf16 %v1819_v46, %v1815_v45  ;;  %v1823_v17 = vld [vmem:[#allocation8 + $0x1498] sm:$0xff] }
 0x2cf   : > { %3758 = vmatpush1.bf16.msra.mxu0 %v3757_v57  ;;  %v3659_v16 = vpack.c.bf16 %v1827_v53, %v1823_v17  ;;  %v1826_v57 = vld [vmem:[#allocation8 + $0x14b0] sm:$0xff]  ;;  %v2313_v45 = vld [vmem:[#allocation11 + $0x218] sm:$0xff] }
 0x2d0   : > { %3760 = vmatprep.subr.bf16.mxu0 %v3759_v60  ;;  %v3661_v60 = vpack.c.bf16 %v1826_v57, %v1822_v56  ;;  %v3779_v46 = vpack.c.bf16 %v2313_v45, %v2311_v44  ;;  %v1887_v17 = vld [vmem:[#allocation8 + $0x1698] sm:$0xff]  ;;  %v1890_v56 = vld [vmem:[#allocation8 + $0x16b0] sm:$0xff] }
 0x2d1   : > { %3634 = vmatpush1.bf16.msra.mxu1 %v3633_v58  ;;  %v1831_v58 = vld [vmem:[#allocation8 + $0x14d8] sm:$0xff]  ;;  %v2319_v45 = vld [vmem:[#allocation11 + $0x248] sm:$0xff] }
 0x2d2   : > { %3636 = vmatprep.subr.bf16.mxu1 %v3635_v63  ;;  %v3663_v61 = vpack.c.bf16 %v1835_v59, %v1831_v58  ;;  %v1834_v63 = vld [vmem:[#allocation8 + $0x14f0] sm:$0xff]  ;;  %v1891_v53 = vld [vmem:[#allocation8 + $0x16b8] sm:$0xff] }
 0x2d3   : > { %3762 = vmatpush1.bf16.msra.mxu0 %v3761_v4  ;;  %v3665_v1 = vpack.c.bf16 %v1834_v63, %v1830_v62  ;;  %v1847_v4 = vld [vmem:[#allocation8 + $0x1558] sm:$0xff]  ;;  %v1898_v62 = vld [vmem:[#allocation8 + $0x16f0] sm:$0xff] }
 0x2d4   : > { %3764 = vmatprep.subr.bf16.mxu0 %v3763_v6  ;;  %v1895_v57 = vld [vmem:[#allocation8 + $0x16d8] sm:$0xff] }
 0x2d5   : > { %3638 = vmatpush1.bf16.msra.mxu1 %v3637_v5  ;;  %v1851_v5 = vld [vmem:[#allocation8 + $0x1578] sm:$0xff] }
 0x2d6   : > { %3640 = vmatprep.subr.bf16.mxu1 %v3639_v9  ;;  %v3671_v6 = vpack.c.bf16 %v1851_v5, %v1847_v4  ;;  %v1855_v9 = vld [vmem:[#allocation8 + $0x1598] sm:$0xff] }
 0x2d7   : > { %3766 = vmatpush1.bf16.msra.mxu0 %v3765_v15  ;;  %v3675_v14 = vpack.c.bf16 %v1859_v10, %v1855_v9  ;;  %v1854_v15 = vld [vmem:[#allocation8 + $0x1590] sm:$0xff]  ;;  %v1899_v58 = vld [vmem:[#allocation8 + $0x16f8] sm:$0xff] }
 0x2d8   : > { %3768 = vmatprep.subr.bf16.mxu0 %v3767_v21  ;;  %v1863_v21 = vld [vmem:[#allocation8 + $0x15d8] sm:$0xff] }
 0x2d9   : > { %3642 = vmatpush1.bf16.msra.mxu1 %v3641_v18  ;;  %v1858_v18 = vld [vmem:[#allocation8 + $0x15b0] sm:$0xff]  ;;  %v3679_v29 = vpack.c.bf16 %v1867_v22, %v1863_v21  ;;  %v1903_v63 = vld [vmem:[#allocation8 + $0x1718] sm:$0xff] }
 0x2da   : > { %3644 = vmatprep.subr.bf16.mxu1 %v3643_v24  ;;  %v2309_v24 = vld [vmem:[#allocation11 + $0x1f8] sm:$0xff]  ;;  %v3677_v25 = vpack.c.bf16 %v1858_v18, %v1854_v15  ;;  %v3709_v18 = vpack.c.bf16 %v1922_v13, %v1918_v12  ;;  %v1926_v21 = vld [vmem:[#allocation8 + $0x17d0] sm:$0xff] }
 0x2db   : > { %3770 = vmatpush1.bf16.msra.mxu0 %v3769_v31  ;;  %v3775_v26 = vpack.c.bf16 %v2309_v24, %v2307_v23  ;;  %v1862_v31 = vld [vmem:[#allocation8 + $0x15d0] sm:$0xff]  ;;  %v1915_v4 = vld [vmem:[#allocation8 + $0x1778] sm:$0xff]  ;;  %v2222_v24 = vlaneseq  ;;  %v2565_v13 = vld [vmem:[#allocation17 + $0x38] sm:$0xff] }
 0x2dc   : > { %3772 = vmatprep.subr.bf16.mxu0 %v3771_v33  ;;  %v3777_v33 = vpack.c.bf16 %v2308_v28, %v2306_v27  ;;  %v1923_v9 = vld [vmem:[#allocation8 + $0x17b8] sm:$0xff]  ;;  %v1930_v22 = vld [vmem:[#allocation8 + $0x17f0] sm:$0xff]  ;;  %v4960_v27 = vld [vmem:[#allocation10] sm:$0xf] }
 0x2dd   : > { %3646 = vmatpush1.bf16.msra.mxu1 %v3645_v32  ;;  %v1866_v32 = vld [vmem:[#allocation8 + $0x15f0] sm:$0xff]  ;;  %v1931_v15 = vld [vmem:[#allocation8 + $0x17f8] sm:$0xff]  ;;  %v3713_v23 = vpack.c.bf16 %v1930_v22, %v1926_v21  ;;  %v2326_v21 = vld [vmem:[#allocation11 + $0x280] sm:$0xff] }
 0x2de   : > { %3648 = vmatprep.subr.bf16.mxu1 %v3647_v34  ;;  %v1871_v34 = vld [vmem:[#allocation8 + $0x1618] sm:$0xff]  ;;  %v3681_v36 = vpack.c.bf16 %v1866_v32, %v1862_v31 }
 0x2df   : > { %3774 = vmatpush1.bf16.msra.mxu0 %v3773_v20  ;;  %v3683_v37 = vpack.c.bf16 %v1875_v35, %v1871_v34  ;;  %v2310_v34 = vld [vmem:[#allocation11 + $0x200] sm:$0xff]  ;;  %v2312_v35 = vld [vmem:[#allocation11 + $0x210] sm:$0xff] }
 0x2e0   : > { %3776 = vmatprep.subr.bf16.mxu0 %v3775_v26  ;;  %v3781_v44 = vpack.c.bf16 %v2312_v35, %v2310_v34  ;;  %v2564_v12 = vld [vmem:[#allocation17 + $0x30] sm:$0xff]  ;;  %v2585_v35 = vld [vmem:[#allocation17 + $0xd8] sm:$0xff] }
 0x2e1   : > { %3650 = vmatpush1.bf16.msra.mxu1 %v3649_v39  ;;  %v1874_v39 = vld [vmem:[#allocation8 + $0x1630] sm:$0xff]  ;;  %v2584_v34 = vld [vmem:[#allocation17 + $0xd0] sm:$0xff] }
 0x2e2   : > { %3652 = vmatprep.subr.bf16.mxu1 %v3651_v40  ;;  %v1879_v40 = vld [vmem:[#allocation8 + $0x1658] sm:$0xff] }
 0x2e3   : > { %3778 = vmatpush1.bf16.msra.mxu0 %v3777_v33  ;;  %v2328_v22 = vld [vmem:[#allocation11 + $0x290] sm:$0xff] }
 0x2e4   : > { %2139 = vmatmul.mubr.f32.vlgmr.msra.gmra.mrb[2].mxu1 %v4047_v54  ;;  %3780 = vmatprep.subr.bf16.mxu0 %v3779_v46  ;;  %v3689_v54 = vpack.c.bf16 %v1882_v52, %v1878_v50  ;;  %v2321_v46 = vld [vmem:[#allocation11 + $0x258] sm:$0xff]  ;;  %v2558_v50 = vld [vmem:[#allocation17] sm:$0xff] }
 0x2e5   : > { %3654 = vmatpush1.bf16.msra.mxu1 %v3653_v47  ;;  %2209 = vmatprep.mubr.f32.mxu1 %v4938_v51  ;;  %v1842_v51 = vld [vmem:[#allocation8 + $0x1530] sm:$0xff]  ;;  %v3685_v47 = vpack.c.bf16 %v1874_v39, %v1870_v38  ;;  %v2317_v38 = vld [vmem:[#allocation11 + $0x238] sm:$0xff]  ;;  %v2314_v39 = vld [vmem:[#allocation11 + $0x220] sm:$0xff] }
 0x2e6   : > { %3656 = vmatprep.subr.bf16.mxu1 %v3655_v49  ;;  %v3669_v30 = vpack.c.bf16 %v1842_v51, %v1838_v3  ;;  %v3687_v49 = vpack.c.bf16 %v1883_v42, %v1879_v40  ;;  %v1906_v3 = vld [vmem:[#allocation8 + $0x1730] sm:$0xff]  ;;  %v1911_v51 = vld [vmem:[#allocation8 + $0x1758] sm:$0xff] }
 0x2e7   : > { %v2316_v40 = vld [vmem:[#allocation11 + $0x230] sm:$0xff] }
 0x2e9   : > { %3658 = vmatpush1.bf16.msra.mxu1 %v3657_v55  ;;  %v3691_v55 = vpack.c.bf16 %v1891_v53, %v1887_v17  ;;  %v2559_v53 = vld [vmem:[#allocation17 + $0x8] sm:$0xff] }
 0x2ea   : > { %3660 = vmatprep.subr.bf16.mxu1 %v3659_v16  ;;  %v1886_v16 = vld [vmem:[#allocation8 + $0x1690] sm:$0xff] }
 0x2eb   : > { %v3693_v59 = vpack.c.bf16 %v1890_v56, %v1886_v16  ;;  %v3845_v16 = vpack.c.bf16 %v2559_v53, %v2558_v50  ;;  %v2560_v56 = vld [vmem:[#allocation17 + $0x10] sm:$0xff] }
 0x2ec   : > { %v2336_v50 = vld [vmem:[#allocation11 + $0x2d0] sm:$0xff] }
 0x2ed   : > { %3662 = vmatpush1.bf16.msra.mxu1 %v3661_v60  ;;  %v3695_v60 = vpack.c.bf16 %v1899_v58, %v1895_v57  ;;  %v2561_v57 = vld [vmem:[#allocation17 + $0x18] sm:$0xff]  ;;  %v2578_v58 = vld [vmem:[#allocation17 + $0xa0] sm:$0xff] }
 0x2ee   : > { %3664 = vmatprep.subr.bf16.mxu1 %v3663_v61  ;;  %v1894_v61 = vld [vmem:[#allocation8 + $0x16d0] sm:$0xff] }
 0x2ef   : > { %v3697_v19 = vpack.c.bf16 %v1898_v62, %v1894_v61  ;;  %v2318_v61 = vld [vmem:[#allocation11 + $0x240] sm:$0xff]  ;;  %v2320_v62 = vld [vmem:[#allocation11 + $0x250] sm:$0xff] }
 0x2f1   : > { %3666 = vmatpush1.bf16.msra.mxu1 %v3665_v1  ;;  %v3699_v1 = vpack.c.bf16 %v1907_v0, %v1903_v63  ;;  %v3849_v63 = vpack.c.bf16 %v2561_v57, %v2560_v56  ;;  %v3787_v0 = vpack.c.bf16 %v2321_v46, %v2319_v45  ;;  %v2337_v45 = vld [vmem:[#allocation11 + $0x2d8] sm:$0xff] }
 0x2f2   : > { %3668 = vmatprep.subr.bf16.mxu1 %v3667_v2  ;;  %v1902_v2 = vld [vmem:[#allocation8 + $0x1710] sm:$0xff] }
 0x2f3   : > { %v3701_v5 = vpack.c.bf16 %v1906_v3, %v1902_v2  ;;  %v2562_v2 = vld [vmem:[#allocation17 + $0x20] sm:$0xff]  ;;  %v2563_v3 = vld [vmem:[#allocation17 + $0x28] sm:$0xff] }
 0x2f5   : > { %3670 = vmatpush1.bf16.msra.mxu1 %v3669_v30  ;;  %v3703_v30 = vpack.c.bf16 %v1915_v4, %v1911_v51  ;;  %v2325_v51 = vld [vmem:[#allocation11 + $0x278] sm:$0xff] }
 0x2f6   : > { %3672 = vmatprep.subr.bf16.mxu1 %v3671_v6  ;;  %v1910_v6 = vld [vmem:[#allocation8 + $0x1750] sm:$0xff]  ;;  %v2580_v4 = vld [vmem:[#allocation17 + $0xb0] sm:$0xff] }
 0x2f7   : > { %v3705_v10 = vpack.c.bf16 %v1914_v7, %v1910_v6  ;;  %v2322_v6 = vld [vmem:[#allocation11 + $0x260] sm:$0xff]  ;;  %v2324_v7 = vld [vmem:[#allocation11 + $0x270] sm:$0xff] }
 0x2f9   : > { %3674 = vmatpush1.bf16.msra.mxu1 %v3673_v11  ;;  %v3707_v11 = vpack.c.bf16 %v1923_v9, %v1919_v8  ;;  %v3853_v8 = vpack.c.bf16 %v2563_v3, %v2562_v2  ;;  %v2353_v2 = vld [vmem:[#allocation11 + $0x358] sm:$0xff] }
 0x2fa   : > { %3676 = vmatprep.subr.bf16.mxu1 %v3675_v14  ;;  %v1927_v14 = vld [vmem:[#allocation8 + $0x17d8] sm:$0xff] }
 0x2fb   : > { %v3711_v20 = vpack.c.bf16 %v1931_v15, %v1927_v14  ;;  %v2329_v14 = vld [vmem:[#allocation11 + $0x298] sm:$0xff]  ;;  %v2582_v15 = vld [vmem:[#allocation17 + $0xc0] sm:$0xff] }
 0x2fd   : > { %3678 = vmatpush1.bf16.msra.mxu1 %v3677_v25  ;;  %v4955_v25 = vshrl.u32 %v2222_v24, 7 }
 0x2fe   : > { %3680 = vmatprep.subr.bf16.mxu1 %v3679_v29 }
 0x2ff   : > { %v4958_v26 = vsub.s32 1, %v4955_v25  ;;  %v4963_v28 = vsub.s32 0, %v4955_v25 }
 0x301   : > { %3682 = vmatpush1.bf16.msra.mxu1 %v3681_v36  ;;  %v2229_v31 = vrot.slane %v4960_v27, %v4958_v26 }
 0x302   : > { %3684 = vmatprep.subr.bf16.mxu1 %v3683_v37  ;;  %v2315_v37 = vld [vmem:[#allocation11 + $0x228] sm:$0xff] }
 0x303   : > { %v3783_v52 = vpack.c.bf16 %v2317_v38, %v2315_v37 }
 0x305   : > { %3686 = vmatpush1.bf16.msra.mxu1 %v3685_v47  ;;  %v2574_v47 = vld [vmem:[#allocation17 + $0x80] sm:$0xff] }
 0x306   : > { %3688 = vmatprep.subr.bf16.mxu1 %v3687_v49  ;;  %v2575_v49 = vld [vmem:[#allocation17 + $0x88] sm:$0xff] }
 0x307   : > { %v3843_v17 = vpack.c.bf16 %v2575_v49, %v2574_v47  ;;  %v2334_v49 = vld [vmem:[#allocation11 + $0x2c0] sm:$0xff] }
 0x309   : > { %3690 = vmatpush1.bf16.msra.mxu1 %v3689_v54  ;;  %v2576_v54 = vld [vmem:[#allocation17 + $0x90] sm:$0xff] }
 0x30a   : > { %3692 = vmatprep.subr.bf16.mxu1 %v3691_v55  ;;  %v2577_v55 = vld [vmem:[#allocation17 + $0x98] sm:$0xff] }
 0x30d   : > { %3694 = vmatpush1.bf16.msra.mxu1 %v3693_v59  ;;  %v2579_v59 = vld [vmem:[#allocation17 + $0xa8] sm:$0xff] }
 0x30e   : > { %3696 = vmatprep.subr.bf16.mxu1 %v3695_v60  ;;  %v3785_v60 = vpack.c.bf16 %v2316_v40, %v2314_v39  ;;  %v2330_v39 = vld [vmem:[#allocation11 + $0x2a0] sm:$0xff]  ;;  %v2332_v40 = vld [vmem:[#allocation11 + $0x2b0] sm:$0xff] }
 0x30f   : > { %v3801_v46 = vpack.c.bf16 %v2332_v40, %v2330_v39  ;;  %v2370_v40 = vld [vmem:[#allocation11 + $0x3e0] sm:$0xff] }
 0x311   : > { %3698 = vmatpush1.bf16.msra.mxu1 %v3697_v19  ;;  %v2323_v19 = vld [vmem:[#allocation11 + $0x268] sm:$0xff] }
 0x312   : > { %3700 = vmatprep.subr.bf16.mxu1 %v3699_v1  ;;  %v3851_v1 = vpack.c.bf16 %v2579_v59, %v2578_v58  ;;  %v3791_v9 = vpack.c.bf16 %v2325_v51, %v2323_v19  ;;  %v2342_v58 = vld [vmem:[#allocation11 + $0x300] sm:$0xff]  ;;  %v2344_v59 = vld [vmem:[#allocation11 + $0x310] sm:$0xff] }
 0x313   : > { %v2348_v19 = vld [vmem:[#allocation11 + $0x330] sm:$0xff] }
 0x315   : > { %3702 = vmatpush1.bf16.msra.mxu1 %v3701_v5  ;;  %v2581_v5 = vld [vmem:[#allocation17 + $0xb8] sm:$0xff] }
 0x316   : > { %3704 = vmatprep.subr.bf16.mxu1 %v3703_v30  ;;  %v3789_v30 = vpack.c.bf16 %v2320_v62, %v2318_v61  ;;  %v2349_v61 = vld [vmem:[#allocation11 + $0x338] sm:$0xff]  ;;  %v3813_v62 = vpack.c.bf16 %v2344_v59, %v2342_v58  ;;  %v2571_v58 = vld [vmem:[#allocation17 + $0x68] sm:$0xff] }
 0x317   : > { %v2588_v59 = vld [vmem:[#allocation17 + $0xf0] sm:$0xff] }
 0x319   : > { %3706 = vmatpush1.bf16.msra.mxu1 %v3705_v10  ;;  %v2327_v10 = vld [vmem:[#allocation11 + $0x288] sm:$0xff] }
 0x31a   : > { %3708 = vmatprep.subr.bf16.mxu1 %v3707_v11  ;;  %v3855_v11 = vpack.c.bf16 %v2581_v5, %v2580_v4  ;;  %v3795_v24 = vpack.c.bf16 %v2329_v14, %v2327_v10  ;;  %v2350_v4 = vld [vmem:[#allocation11 + $0x340] sm:$0xff]  ;;  %v2352_v5 = vld [vmem:[#allocation11 + $0x350] sm:$0xff] }
 0x31b   : > { %v2356_v10 = vld [vmem:[#allocation11 + $0x370] sm:$0xff] }
 0x31d   : > { %3710 = vmatpush1.bf16.msra.mxu1 %v3709_v18  ;;  %v2583_v18 = vld [vmem:[#allocation17 + $0xc8] sm:$0xff] }
 0x31e   : > { %3712 = vmatprep.subr.bf16.mxu1 %v3711_v20  ;;  %v3793_v20 = vpack.c.bf16 %v2324_v7, %v2322_v6  ;;  %v2357_v6 = vld [vmem:[#allocation11 + $0x378] sm:$0xff]  ;;  %v3821_v7 = vpack.c.bf16 %v2352_v5, %v2350_v4 }
 0x321   : > { %3714 = vmatpush1.bf16.msra.mxu1 %v3713_v23  ;;  %v3857_v23 = vpack.c.bf16 %v2565_v13, %v2564_v12  ;;  %v2361_v12 = vld [vmem:[#allocation11 + $0x398] sm:$0xff] }
 0x322   : > { %3844 = vmatprep.subr.bf16.mxu1 %v3843_v17  ;;  %v3805_v17 = vpack.c.bf16 %v2336_v50, %v2334_v49 }
 0x324   : > { %2210 = vmatmul.mubr.f32.vlgmr.msra.gmra.mrb[2].mxu1 %v4947_v41  ;;  %v2225_v41 = vrot.slane %v4960_v27, %v4963_v28 }
 0x325   : > { %3846 = vmatpush3.bf16.msra.mxu1 %v3845_v16  ;;  %v2343_v16 = vld [vmem:[#allocation11 + $0x308] sm:$0xff] }
 0x379   : > { %v2069_v29 = vpop.f32.mrb[0].mxu0 }
 0x37a   : > { %v3875_v32 = vadd.f32 %v2069_v29, %v4942_v43  ;;  %v2071_v33 = vpop.f32.mrb[1].mxu0  ;;  %v2331_v29 = vld [vmem:[#allocation11 + $0x2a8] sm:$0xff] }
 0x37b   : > { %v3876_v36 = vadd.f32 %v2071_v33, %v4944_v48  ;;  %v3847_v48 = vpack.c.bf16 %v2577_v55, %v2576_v54  ;;  %v2333_v33 = vld [vmem:[#allocation11 + $0x2b8] sm:$0xff]  ;;  %v2338_v54 = vld [vmem:[#allocation11 + $0x2e0] sm:$0xff]  ;;  %v2340_v55 = vld [vmem:[#allocation11 + $0x2f0] sm:$0xff] }
 0x37c   : > { %v2242_v43 = vadd.f32 %v3875_v32, %v2225_v41  ;;  %v2566_v32 = vld [vmem:[#allocation17 + $0x40] sm:$0xff]  ;;  %v2567_v41 = vld [vmem:[#allocation17 + $0x48] sm:$0xff]  ;;  %v3799_v38 = vpack.c.bf16 %v2333_v33, %v2331_v29  ;;  %v3809_v56 = vpack.c.bf16 %v2340_v55, %v2338_v54  ;;  %v2569_v54 = vld [vmem:[#allocation17 + $0x58] sm:$0xff] }
 0x37d   : > { %v2243_v42 = vadd.f32 %v3876_v36, %v2229_v31  ;;  %3848 = vmatprep.subr.bf16.mxu1 %v3847_v48  ;;  %v3859_v31 = vpack.c.bf16 %v2583_v18, %v2582_v15  ;;  %v3797_v36 = vpack.c.bf16 %v2328_v22, %v2326_v21  ;;  %v3861_v37 = vpack.c.bf16 %v2567_v41, %v2566_v32  ;;  %v2345_v48 = vld [vmem:[#allocation11 + $0x318] sm:$0xff]  ;;  %v2358_v15 = vld [vmem:[#allocation11 + $0x380] sm:$0xff]  ;;  %v2360_v18 = vld [vmem:[#allocation11 + $0x390] sm:$0xff] }
 0x37e   : > { %3850 = vmatpush3.bf16.msra.mxu1 %v3849_v63  ;;  %v3811_v57 = vpack.c.bf16 %v2345_v48, %v2343_v16  ;;  %v2365_v21 = vld [vmem:[#allocation11 + $0x3b8] sm:$0xff]  ;;  %v3829_v22 = vpack.c.bf16 %v2360_v18, %v2358_v15  ;;  %v2364_v29 = vld [vmem:[#allocation11 + $0x3b0] sm:$0xff]  ;;  %v2586_v16 = vld [vmem:[#allocation17 + $0xe0] sm:$0xff] }
 0x37f   : > { %2450 = vmatprep.mubr.f32.mxu0 %v2243_v42  ;;  %3852 = vmatprep.subr.bf16.mxu1 %v3851_v1  ;;  %v3863_v42 = vpack.c.bf16 %v2585_v35, %v2584_v34  ;;  %v2351_v1 = vld [vmem:[#allocation11 + $0x348] sm:$0xff]  ;;  %v2369_v32 = vld [vmem:[#allocation11 + $0x3d8] sm:$0xff]  ;;  %v2366_v34 = vld [vmem:[#allocation11 + $0x3c0] sm:$0xff] }
 0x380   : > { %2451 = vmatmul.mubr.f32.vlgmr.msra.gmra.mrb[2].mxu0 %v2242_v43  ;;  %v2339_v43 = vld [vmem:[#allocation11 + $0x2e8] sm:$0xff]  ;;  %v3819_v51 = vpack.c.bf16 %v2353_v2, %v2351_v1  ;;  %v2368_v35 = vld [vmem:[#allocation11 + $0x3d0] sm:$0xff]  ;;  %v2542_v2 = vld [vmem:[#allocation16] sm:$0x3] }
 0x381   : > { %3782 = vmatpush1.bf16.msra.mxu0 %v3781_v44  ;;  %v2335_v44 = vld [vmem:[#allocation11 + $0x2c8] sm:$0xff] }
 0x382   : > { %3784 = vmatprep.subr.bf16.mxu0 %v3783_v52  ;;  %3854 = vmatpush3.bf16.msra.mxu1 %v3853_v8  ;;  %v3803_v47 = vpack.c.bf16 %v2337_v45, %v2335_v44  ;;  %v2341_v52 = vld [vmem:[#allocation11 + $0x2f8] sm:$0xff]  ;;  %v2236_v45 = vsub.s32 3, %v4955_v25  ;;  %v2587_v48 = vld [vmem:[#allocation17 + $0xe8] sm:$0xff] }
 0x383   : > { %3856 = vmatprep.subr.bf16.mxu1 %v3855_v11  ;;  %v3807_v53 = vpack.c.bf16 %v2341_v52, %v2339_v43  ;;  %v2359_v11 = vld [vmem:[#allocation11 + $0x388] sm:$0xff] }
 0x384   : > { %v3827_v14 = vpack.c.bf16 %v2361_v12, %v2359_v11 }
 0x385   : > { %3786 = vmatpush1.bf16.msra.mxu0 %v3785_v60  ;;  %v2347_v60 = vld [vmem:[#allocation11 + $0x328] sm:$0xff] }
 0x386   : > { %3788 = vmatprep.subr.bf16.mxu0 %v3787_v0  ;;  %3858 = vmatpush3.bf16.msra.mxu1 %v3857_v23  ;;  %v3815_v63 = vpack.c.bf16 %v2349_v61, %v2347_v60  ;;  %v2346_v0 = vld [vmem:[#allocation11 + $0x320] sm:$0xff]  ;;  %v2572_v61 = vld [vmem:[#allocation17 + $0x70] sm:$0xff] }
 0x387   : > { %3860 = vmatprep.subr.bf16.mxu1 %v3859_v31  ;;  %v3817_v3 = vpack.c.bf16 %v2348_v19, %v2346_v0  ;;  %v2367_v31 = vld [vmem:[#allocation11 + $0x3c8] sm:$0xff]  ;;  %v2374_v0 = vld [vmem:[#allocation13] sm:$0x3]  ;;  %v2528_v19 = vld [vmem:[#allocation14] sm:$0x3] }
 0x388   : > { %v3835_v33 = vpack.c.bf16 %v2369_v32, %v2367_v31  ;;  %v2379_v1 = vrot.slane %v2374_v0, %v4963_v28  ;;  %v2537_v5 = vrot.slane %v2528_v19, %v4958_v26 }
 0x389   : > { %3790 = vmatpush1.bf16.msra.mxu0 %v3789_v30  ;;  %v2355_v30 = vld [vmem:[#allocation11 + $0x368] sm:$0xff] }
 0x38a   : > { %3792 = vmatprep.subr.bf16.mxu0 %v3791_v9  ;;  %3862 = vmatpush3.bf16.msra.mxu1 %v3861_v37  ;;  %v3823_v8 = vpack.c.bf16 %v2357_v6, %v2355_v30  ;;  %v2354_v9 = vld [vmem:[#allocation11 + $0x360] sm:$0xff]  ;;  %v2373_v37 = vld [vmem:[#allocation11 + $0x3f8] sm:$0xff]  ;;  %v2547_v6 = vrot.slane %v2542_v2, %v4963_v28 }
 0x38b   : > { %3864 = vmatprep.subr.bf16.mxu1 %v3863_v42  ;;  %v3825_v13 = vpack.c.bf16 %v2356_v10, %v2354_v9  ;;  %v2372_v42 = vld [vmem:[#allocation11 + $0x3f0] sm:$0xff]  ;;  %v2551_v9 = vrot.slane %v2542_v2, %v4958_v26 }
 0x38c   : > { %v3841_v44 = vpack.c.bf16 %v2372_v42, %v2370_v40 }
 0x38d   : > { %3794 = vmatpush1.bf16.msra.mxu0 %v3793_v20  ;;  %v2363_v20 = vld [vmem:[#allocation11 + $0x3a8] sm:$0xff] }
 0x38e   : > { %3796 = vmatprep.subr.bf16.mxu0 %v3795_v24  ;;  %v3831_v23 = vpack.c.bf16 %v2365_v21, %v2363_v20  ;;  %v2362_v24 = vld [vmem:[#allocation11 + $0x3a0] sm:$0xff] }
 0x38f   : > { %v3833_v41 = vpack.c.bf16 %v2364_v29, %v2362_v24  ;;  %v2904_v20 = vld [vmem:[#allocation19] ss:$0 sm:$0xff] }
 0x391   : > { %3798 = vmatpush1.bf16.msra.mxu0 %v3797_v36  ;;  %v2371_v36 = vld [vmem:[#allocation11 + $0x3e8] sm:$0xff] }
 0x392   : > { %3800 = vmatprep.subr.bf16.mxu0 %v3799_v38  ;;  %v3837_v38 = vpack.c.bf16 %v2368_v35, %v2366_v34  ;;  %v3839_v39 = vpack.c.bf16 %v2373_v37, %v2371_v36 }
 0x395   : > { %3802 = vmatpush1.bf16.msra.mxu0 %v3801_v46  ;;  %v2232_v46 = vsub.s32 2, %v4955_v25 }
 0x396   : > { %3804 = vmatprep.subr.bf16.mxu0 %v3803_v47  ;;  %v2237_v47 = vrot.slane %v4960_v27, %v2236_v45 }
 0x397   : > { %v2233_v49 = vrot.slane %v4960_v27, %v2232_v46  ;;  %v2589_v27 = vld [vmem:[#allocation17 + $0xf8] sm:$0xff] }
 0x398   : > { %v3871_v60 = vpack.c.bf16 %v2589_v27, %v2588_v59 }
 0x399   : > { %3806 = vmatpush1.bf16.msra.mxu0 %v3805_v17 }
 0x39a   : > { %3808 = vmatprep.subr.bf16.mxu0 %v3807_v53  ;;  %v2568_v53 = vld [vmem:[#allocation17 + $0x50] sm:$0xff] }
 0x39b   : > { %v3865_v55 = vpack.c.bf16 %v2569_v54, %v2568_v53 }
 0x39d   : > { %3810 = vmatpush1.bf16.msra.mxu0 %v3809_v56  ;;  %3866 = vmatpush3.bf16.msra.mxu1 %v3865_v55  ;;  %v3867_v56 = vpack.c.bf16 %v2587_v48, %v2586_v16 }
 0x39e   : > { %3812 = vmatprep.subr.bf16.mxu0 %v3811_v57  ;;  %v2570_v57 = vld [vmem:[#allocation17 + $0x60] sm:$0xff] }
 0x39f   : > { %v3869_v25 = vpack.c.bf16 %v2571_v58, %v2570_v57  ;;  %3868 = vmatprep.subr.bf16.mxu1 %v3867_v56 }
 0x3a1   : > { %3814 = vmatpush1.bf16.msra.mxu0 %v3813_v62  ;;  %3870 = vmatpush3.bf16.msra.mxu1 %v3869_v25  ;;  %v2573_v62 = vld [vmem:[#allocation17 + $0x78] sm:$0xff] }
 0x3a2   : > { %3816 = vmatprep.subr.bf16.mxu0 %v3815_v63  ;;  %v3873_v63 = vpack.c.bf16 %v2573_v62, %v2572_v61  ;;  %3872 = vmatprep.subr.bf16.mxu1 %v3871_v60 }
 0x3a5   : > { %3818 = vmatpush1.bf16.msra.mxu0 %v3817_v3  ;;  %3874 = vmatpush3.bf16.msra.mxu1 %v3873_v63  ;;  %v2383_v3 = vrot.slane %v2374_v0, %v4958_v26 }
 0x3a6   : > { %3820 = vmatprep.subr.bf16.mxu0 %v3819_v51  ;;  %v2533_v51 = vrot.slane %v2528_v19, %v4963_v28 }
 0x3a9   : > { %3822 = vmatpush1.bf16.msra.mxu0 %v3821_v7 }
 0x3aa   : > { %3824 = vmatprep.subr.bf16.mxu0 %v3823_v8 }
 0x3ad   : > { %3826 = vmatpush1.bf16.msra.mxu0 %v3825_v13 }
 0x3ae   : > { %3828 = vmatprep.subr.bf16.mxu0 %v3827_v14 }
 0x3b1   : > { %3830 = vmatpush1.bf16.msra.mxu0 %v3829_v22 }
 0x3b2   : > { %3832 = vmatprep.subr.bf16.mxu0 %v3831_v23 }
 0x3b5   : > { %3834 = vmatpush1.bf16.msra.mxu0 %v3833_v41 }
 0x3b6   : > { %3836 = vmatprep.subr.bf16.mxu0 %v3835_v33 }
 0x3b9   : > { %3838 = vmatpush1.bf16.msra.mxu0 %v3837_v38 }
 0x3ba   : > { %3840 = vmatprep.subr.bf16.mxu0 %v3839_v39 }
 0x3bd   : > { %3842 = vmatpush1.bf16.msra.mxu0 %v3841_v44 }
 0x3f7   : > { %v2211_v50 = vpop.f32.mrb[2].mxu1 }
 0x3f8   : > { %v2213_v43 = vpop.f32.mrb[3].mxu1  ;;  %v2244_v17 = vadd.f32 %v2233_v49, %v2211_v50 }
 0x3f9   : > { %v2245_v52 = vadd.f32 %v2237_v47, %v2213_v43 }
 0x3fb   : > { %2521 = vmatprep.mubr.f32.mxu0 %v2245_v52 }
 0x3fc   : > { %2522 = vmatmul.mubr.f32.vlgmr.msra.gmra.mrb[2].mxu0 %v2244_v17 }
 0x4cf   : > { %v2523_v4 = vpop.f32.mrb[2].mxu0 }
 0x4d0   : > { %v3877_v30 = vadd.f32 %v2523_v4, %v2379_v1  ;;  %v2525_v7 = vpop.f32.mrb[3].mxu0 }
 0x4d1   : > { %v3878_v8 = vadd.f32 %v2525_v7, %v2383_v3 }
 0x4d2   : > { %v2540_v10 = vmul.f32 %v3877_v30, %v2533_v51 }
 0x4d3   : > { %v2541_v11 = vmul.f32 %v3878_v8, %v2537_v5 }
 0x4d4   : > { %v2554_v12 = vadd.f32 %v2547_v6, %v2540_v10 }
 0x4d5   : > { %v2555_v13 = vadd.f32 %v2551_v9, %v2541_v11 }
 0x4d6   : > { %v2556_v15 = vmax.f32 %v2554_v12, 0.0 }
 0x4d7   : > { %v2557_v14 = vmax.f32 %v2555_v13, 0.0 }
 0x4d9   : > { %2661 = vmatprep.mubr.f32.mxu1 %v2557_v14 }
 0x4da   : > { %2662 = vmatmul.mubr.f32.vlgmr.msra.gmra.mrb[4].mxu1 %v2556_v15 }
 0x5ad   : > { %v2944_v18 = vpop.f32.mrb[4].mxu1 }
 0x5ae   : > { %v2945_v21 = vpop.f32.mrb[5].mxu1 }
 0x5af   : > { %v2946_v28 = vadd.f32 %v2945_v21, %v2944_v18 }
 0x5b1   : > { %v2664_v22 = vadd.f32 %v2946_v28, %v2904_v20 }
 0x5b3   : > { %2667 = vst [vmem:[%s581_s1] sm:$0xff] %v2664_v22 }
 0x5b4   : > { %4375 = shalt.err (!%p4372_p1)
}
 0x5b5   : > { %s4376_s11 = scalar_lea.hbm %s4986_s29, 128  ;;  %s4380_s13 = scalar_lea.hbm %s5106_s2, 256 }
 0x5b6   : > { %p4377_p12 = scmp.ne.s32.totalorder %s4986_s29, %s4376_s11  ;;  %p4381_p6 = scmp.lt.u32.totalorder %s4986_s29, %s5106_s2 }
 0x5b7   : > { %p4382_p8 = scmp.lt.u32.totalorder %s4380_s13, %s4376_s11  ;;  %p4384_p2 = scmp.lt.u32.totalorder %s4376_s11, %s4986_s29 }
 0x5b8   : > { %p4378_p0 = pnand %p4377_p12, %p5107_p10 }
 0x5b9   : > { %p4383_p3 = por %p4382_p8, %p4381_p6 }
 0x5ba   : > { %p4379_p5 = pneg %p4378_p0 }
 0x5bb   : > { %p4385_p7 = por %p4384_p2, %p4383_p3 }
 0x5bd   : > { %p4386_p9 = pnand %p4385_p7, %p4379_p5 }
 0x5bf   : > { %4389 = shalt.err (!%p4386_p9)
}
 0x5c0   : > { %3937 = dma.vmem_to_hbm [thread:$0]  (%p5107_p10), %s4988_s9, 128, %s4986_s29, %s2669_s28  }
 0x5c1 PF: > { %s5108_s24 = sld [smem:[#allocation32_spill]]  ;;  %s5109_s30 = sld [smem:[#allocation28_spill]] }
 0x5c2   : > { %s2694_s15 = sand.u32 1, %s4436_s17  }
 0x5c3   : > { %s2695_s3 = scalar_lea.sflag [#allocation4], %s2694_s15 }
 0x5c7   : > { %p5110_p13 = scmp.ne.s32.totalorder %s5108_s24, 0  ;;  %p5111_p11 = scmp.ge.s32.totalorder %s5109_s30, 2 }
 0x5c9   : > { %p3975_p4 = pnand %p5111_p11, %p5110_p13 }
 0x5cb   : > { %4431 = dma.done.wait (!%p3975_p4), %s2695_s3, 128  }
 0x5cc   : > { %4433 = vsyncadd (!%p3975_p4), %s2695_s3, 4294967168  ;;  %s5112_s20 = sld [smem:[#allocation30_spill]]  ;;  %s5113_s1 = sld [smem:[#allocation31_spill]] }
 0x5cd   : > { %s5114_s17 = smov %s4440_s18  ;;  %s5115_s18 = smov %s4444_s19 }
 0x5d2   : > { %p31_p1 = scmp.ge.s32.totalorder %s5112_s20, 4   ;;  %s5116_s19 = smov %s5113_s1 }
 0x5d4   :  { %33 = sbr.rel (!%p31_p1) target bundleno = 19 (0x13), region = 167 }
 0x5db   :  { %2700 = vsyncpa [#allocation3], 1 }
 0x5dc   :  { %2702 = vsyncpa [#allocation3 + $0x1], 1 }
 0x5dd   :  { %2703 = vsyncpa [#allocation6], 1 }
 0x5de   :  { %2705 = vsyncpa [#allocation6 + $0x1], 1 }
 0x5df   :  { %2706 = vsyncpa [#allocation9], 1 }
 0x5e0   :  { %2707 = vsyncpa [#allocation12], 1 }
 0x5e1   :  { %2708 = vsyncpa [#allocation15], 1 }
 0x5e2   :  { %2709 = vsyncpa [#allocation18], 1 }
 0x5e3   :  { %2710 = vsyncpa [#allocation4], 1 }
 0x5e4   :  { %2712 = vsyncpa [#allocation4 + $0x1], 1 }

</bundles_post_ra>
